<compile_context>
chip_gen: v6e
topology: v6e:2x2x1
jax: 0.10.0
libtpu: 0.0.40
codegen_flags: <defaults>
</compile_context>

<pallas_src>
import functools

import jax
import jax.numpy as jnp
from jax import lax
from jax.experimental import pallas as pl
from jax.experimental.pallas import tpu as pltpu


_LN_EPS = 1e-5
_NEG_BIG = -1e9


# ----------------------------- in-kernel math helpers ------------------------

def _erf(x):
    # Abramowitz & Stegun 7.1.26 polynomial, max abs err ~1.5e-7 (f32-exact).
    a1, a2, a3, a4, a5 = 0.254829592, -0.284496736, 1.421413741, -1.453152027, 1.061405429
    p = 0.3275911
    sign = jnp.where(x >= 0.0, 1.0, -1.0)
    ax = jnp.abs(x)
    t = 1.0 / (1.0 + p * ax)
    poly = ((((a5 * t + a4) * t + a3) * t + a2) * t + a1) * t
    return sign * (1.0 - poly * jnp.exp(-ax * ax))


def _gelu_exact(x):
    # PyTorch nn.GELU default (erf form), not the tanh approximation.
    return x * 0.5 * (1.0 + _erf(x * 0.7071067811865476))


def _layernorm_f32(x, g, b):
    mu = jnp.mean(x, axis=-1, keepdims=True)
    var = jnp.mean(jnp.square(x - mu), axis=-1, keepdims=True)
    return (x - mu) * lax.rsqrt(var + _LN_EPS) * g + b


def _row_tile(m, target=256):
    """Largest row tile <= target that divides m and is a multiple of 8."""
    if m <= target:
        return m
    for t in range(target, 7, -1):
        if m % t == 0 and t % 8 == 0:
            return t
    return m


def _pp(n=1):
    return pltpu.CompilerParams(dimension_semantics=("parallel",) * n)


# ----------------------------- Pallas kernels --------------------------------

def _linear_kernel(x_ref, w_ref, b_ref, o_ref, *, act):
    acc = jnp.dot(x_ref[...].astype(jnp.bfloat16), w_ref[...],
                  preferred_element_type=jnp.float32)
    acc = acc + b_ref[...].astype(jnp.float32)
    if act == "gelu":
        acc = _gelu_exact(acc)
    o_ref[...] = acc.astype(o_ref.dtype)


def linear(x2d, w, b, act=None):
    """y = act(x2d @ w + b); bf16 matmul, f32 accumulation; row-tiled grid."""
    M, K = x2d.shape
    K2, N = w.shape
    assert K == K2
    tm = _row_tile(M)
    return pl.pallas_call(
        functools.partial(_linear_kernel, act=act),
        out_shape=jax.ShapeDtypeStruct((M, N), jnp.float32),
        grid=(M // tm,),
        in_specs=[
            pl.BlockSpec((tm, K), lambda i: (i, 0)),
            pl.BlockSpec((K, N), lambda i: (0, 0)),
            pl.BlockSpec((1, N), lambda i: (0, 0)),
        ],
        out_specs=pl.BlockSpec((tm, N), lambda i: (i, 0)),
        compiler_params=_pp(),
    )(x2d, w, b.reshape(1, N))


def _ln_linear_kernel(x_ref, g_ref, b_ref, w_ref, bias_ref, o_ref):
    x = x_ref[...].astype(jnp.float32)
    xn = _layernorm_f32(x, g_ref[...].astype(jnp.float32), b_ref[...].astype(jnp.float32))
    acc = jnp.dot(xn.astype(jnp.bfloat16), w_ref[...], preferred_element_type=jnp.float32)
    acc = acc + bias_ref[...].astype(jnp.float32)
    o_ref[...] = acc.astype(o_ref.dtype)


def ln_linear(x2d, g, b, w, bias):
    """Fused LayerNorm + Linear (used for final encoder norm + out_proj)."""
    M, D = x2d.shape
    N = w.shape[1]
    tm = _row_tile(M)
    return pl.pallas_call(
        _ln_linear_kernel,
        out_shape=jax.ShapeDtypeStruct((M, N), jnp.float32),
        grid=(M // tm,),
        in_specs=[
            pl.BlockSpec((tm, D), lambda i: (i, 0)),
            pl.BlockSpec((1, D), lambda i: (0, 0)),
            pl.BlockSpec((1, D), lambda i: (0, 0)),
            pl.BlockSpec((D, N), lambda i: (0, 0)),
            pl.BlockSpec((1, N), lambda i: (0, 0)),
        ],
        out_specs=pl.BlockSpec((tm, N), lambda i: (i, 0)),
        compiler_params=_pp(),
    )(x2d, g.reshape(1, D), b.reshape(1, D), w, bias.reshape(1, N))


def _connector_kernel(x_ref, pos_ref, w1, b1, w2, b2, ln_g, ln_b, w3, b3, wp, bp, o_ref):
    # connector = Linear(LN(MLP(x)));  fused with  + pos_emb(pos).
    x = x_ref[...].astype(jnp.bfloat16)
    h = jnp.dot(x, w1[...], preferred_element_type=jnp.float32) + b1[...].astype(jnp.float32)
    h = _gelu_exact(h)
    h = jnp.dot(h.astype(jnp.bfloat16), w2[...],
                preferred_element_type=jnp.float32) + b2[...].astype(jnp.float32)
    hn = _layernorm_f32(h, ln_g[...].astype(jnp.float32), ln_b[...].astype(jnp.float32))
    y = jnp.dot(hn.astype(jnp.bfloat16), w3[...],
                preferred_element_type=jnp.float32) + b3[...].astype(jnp.float32)
    pos = pos_ref[...].astype(jnp.bfloat16)
    y = y + jnp.dot(pos, wp[...], preferred_element_type=jnp.float32) + bp[...].astype(jnp.float32)
    o_ref[...] = y.astype(o_ref.dtype)


def connector_with_pos(x2d, pos2d, cp, pos_w, pos_b):
    M, Dtok = x2d.shape
    H = cp["w1"].shape[1]
    Dp = cp["w3"].shape[1]
    tm = _row_tile(M)

    def const(shape):
        return pl.BlockSpec(shape, lambda i: (0,) * len(shape))

    return pl.pallas_call(
        _connector_kernel,
        out_shape=jax.ShapeDtypeStruct((M, Dp), jnp.float32),
        grid=(M // tm,),
        in_specs=[
            pl.BlockSpec((tm, Dtok), lambda i: (i, 0)),
            pl.BlockSpec((tm, Dtok), lambda i: (i, 0)),
            const((Dtok, H)), const((1, H)),
            const((H, Dtok)), const((1, Dtok)),
            const((1, Dtok)), const((1, Dtok)),
            const((Dtok, Dp)), const((1, Dp)),
            const((Dtok, Dp)), const((1, Dp)),
        ],
        out_specs=pl.BlockSpec((tm, Dp), lambda i: (i, 0)),
        compiler_params=_pp(),
    )(x2d, pos2d,
      cp["w1"], cp["b1"].reshape(1, H),
      cp["w2"], cp["b2"].reshape(1, Dtok),
      cp["ln_g"].reshape(1, Dtok), cp["ln_b"].reshape(1, Dtok),
      cp["w3"], cp["b3"].reshape(1, Dp),
      pos_w, pos_b.reshape(1, Dp))


def _mha_residual(x, ksrc_bf, bias, ln_g, ln_b, wq, bq, wk, bk, wv, bv, wo, bo,
                  *, num_heads, scale, use_self_kv):
    """Pre-LN multi-head attention + residual on a single (Nq, D) slab."""
    xn = _layernorm_f32(x, ln_g[...].astype(jnp.float32), ln_b[...].astype(jnp.float32))
    xn_bf = xn.astype(jnp.bfloat16)

    q = jnp.dot(xn_bf, wq[...], preferred_element_type=jnp.float32) + bq[...].astype(jnp.float32)
    if use_self_kv:
        ksrc = xn_bf
    else:
        # TODO(synk): kv is projected un-normalized (assumed norm-on-q-only cross-attn).
        ksrc = ksrc_bf
    k = jnp.dot(ksrc, wk[...], preferred_element_type=jnp.float32) + bk[...].astype(jnp.float32)
    v = jnp.dot(ksrc, wv[...], preferred_element_type=jnp.float32) + bv[...].astype(jnp.float32)

    D = q.shape[-1]
    dh = D // num_heads
    head_outs = []
    for h in range(num_heads):                      # heads = static lane slices
        sl = slice(h * dh, (h + 1) * dh)
        qh = q[:, sl].astype(jnp.bfloat16)
        kh = k[:, sl].astype(jnp.bfloat16)
        vh = v[:, sl].astype(jnp.bfloat16)
        s = lax.dot_general(qh, kh, (((1,), (1,)), ((), ())),
                            preferred_element_type=jnp.float32) * scale
        s = s + bias
        s = s - jnp.max(s, axis=-1, keepdims=True)
        p = jnp.exp(s)
        p = p * pl.reciprocal(jnp.sum(p, axis=-1, keepdims=True), approx=True)
        head_outs.append(jnp.dot(p.astype(jnp.bfloat16), vh,
                                 preferred_element_type=jnp.float32))
    attn = jnp.concatenate(head_outs, axis=-1)      # (Nq, D), lane-dense
    out = jnp.dot(attn.astype(jnp.bfloat16), wo[...],
                  preferred_element_type=jnp.float32) + bo[...].astype(jnp.float32)
    return x + out


def _layer_kernel(q_ref, ctx_ref, smask_ref, cmask_ref,
                  s_lng, s_lnb, s_wq, s_bq, s_wk, s_bk, s_wv, s_bv, s_wo, s_bo,
                  c_lng, c_lnb, c_wq, c_bq, c_wk, c_bk, c_wv, c_bv, c_wo, c_bo,
                  m_lng, m_lnb, m_w1, m_b1, m_w2, m_b2,
                  o_ref, *, num_heads, scale):
    # Whole transformer layer fused: self-attn -> cross-attn -> MLP, residuals kept in VMEM.
    x = q_ref[0].astype(jnp.float32)                        # (Nq, D) residual stream
    ctx_bf = ctx_ref[0].astype(jnp.bfloat16)                # (Nk, D)

    # Additive key-pad biases built in-kernel from (1, N) float pad masks.
    self_bias = smask_ref[0].astype(jnp.float32) * _NEG_BIG
    cross_bias = cmask_ref[0].astype(jnp.float32) * _NEG_BIG

    x = _mha_residual(x, None, self_bias,
                      s_lng, s_lnb, s_wq, s_bq, s_wk, s_bk, s_wv, s_bv, s_wo, s_bo,
                      num_heads=num_heads, scale=scale, use_self_kv=True)
    x = _mha_residual(x, ctx_bf, cross_bias,
                      c_lng, c_lnb, c_wq, c_bq, c_wk, c_bk, c_wv, c_bv, c_wo, c_bo,
                      num_heads=num_heads, scale=scale, use_self_kv=False)

    # MLP: x + fc2(GELU(fc1(LN(x))))
    xn = _layernorm_f32(x, m_lng[...].astype(jnp.float32), m_lnb[...].astype(jnp.float32))
    h = jnp.dot(xn.astype(jnp.bfloat16), m_w1[...],
                preferred_element_type=jnp.float32) + m_b1[...].astype(jnp.float32)
    h = _gelu_exact(h)
    h = jnp.dot(h.astype(jnp.bfloat16), m_w2[...],
                preferred_element_type=jnp.float32) + m_b2[...].astype(jnp.float32)
    o_ref[0] = (x + h).astype(o_ref.dtype)


def encoder_layer(q, ctx, self_mask, cross_mask, layer, num_heads):
    """One fused encoder layer.  q: (B,Nq,D); ctx: (B,Nk,D); masks: (B,1,N*) f32."""
    B, Nq, D = q.shape
    Nk = ctx.shape[1]
    scale = 1.0 / float(D // num_heads) ** 0.5
    sa, ca, mp = layer["self_attn"], layer["cross_attn"], layer["mlp"]
    H = mp["w1"].shape[1]

    def const(shape):
        return pl.BlockSpec(shape, lambda b: (0,) * len(shape))

    def attn_args(p):
        return [p["ln_g"].reshape(1, D), p["ln_b"].reshape(1, D),
                p["wq"], p["bq"].reshape(1, D),
                p["wk"], p["bk"].reshape(1, D),
                p["wv"], p["bv"].reshape(1, D),
                p["wo"], p["bo"].reshape(1, D)]

    def attn_specs():
        return [const((1, D)), const((1, D)),
                const((D, D)), const((1, D)),
                const((D, D)), const((1, D)),
                const((D, D)), const((1, D)),
                const((D, D)), const((1, D))]

    args = ([q, ctx, self_mask, cross_mask]
            + attn_args(sa) + attn_args(ca)
            + [mp["ln_g"].reshape(1, D), mp["ln_b"].reshape(1, D),
               mp["w1"], mp["b1"].reshape(1, H), mp["w2"], mp["b2"].reshape(1, D)])

    in_specs = ([pl.BlockSpec((1, Nq, D), lambda b: (b, 0, 0)),
                 pl.BlockSpec((1, Nk, D), lambda b: (b, 0, 0)),
                 pl.BlockSpec((1, 1, Nq), lambda b: (b, 0, 0)),
                 pl.BlockSpec((1, 1, Nk), lambda b: (b, 0, 0))]
                + attn_specs() + attn_specs()
                + [const((1, D)), const((1, D)),
                   const((D, H)), const((1, H)),
                   const((H, D)), const((1, D))])

    return pl.pallas_call(
        functools.partial(_layer_kernel, num_heads=num_heads, scale=scale),
        out_shape=jax.ShapeDtypeStruct((B, Nq, D), jnp.float32),
        grid=(B,),
        in_specs=in_specs,
        out_specs=pl.BlockSpec((1, Nq, D), lambda b: (b, 0, 0)),
        compiler_params=_pp(),
    )(*args)


# ------------------------------ model (glue) ---------------------------------

def cross_predictor_forward(params, num_heads, context_tokens, context_pos,
                            target_pos, context_padding_mask, target_padding_mask):
    B, N_ctx, Dtok = context_tokens.shape
    _, N_tgt, _ = target_pos.shape
    Dp = params["mask_token"].shape[-1]

    # ctx = connector(context_tokens) + pos_emb(context_pos)   (one fused kernel)
    ctx = connector_with_pos(
        context_tokens.reshape(B * N_ctx, Dtok),
        context_pos.reshape(B * N_ctx, Dtok),
        params["connector"], params["pos_w"], params["pos_b"],
    ).reshape(B, N_ctx, Dp)

    # m = mask_token + pos_emb(target_pos): fold mask_token into the pos_emb bias.
    tgt_bias = params["pos_b"] + params["mask_token"].reshape(-1)
    q = linear(target_pos.reshape(B * N_tgt, Dtok),
               params["pos_w"], tgt_bias).reshape(B, N_tgt, Dp)

    # Key-padding masks (True/1.0 == padded key); additive bias built in-kernel.
    self_mask = target_padding_mask.astype(jnp.float32).reshape(B, 1, N_tgt)
    cross_mask = context_padding_mask.astype(jnp.float32).reshape(B, 1, N_ctx)

    for layer in params["encoder"]["layers"]:
        q = encoder_layer(q, ctx, self_mask, cross_mask, layer, num_heads)

    # final encoder LayerNorm fused into out_proj
    out = ln_linear(q.reshape(B * N_tgt, Dp),
                    params["encoder"]["lnf_g"], params["encoder"]["lnf_b"],
                    params["out_w"], params["out_b"])
    return out.reshape(B, N_tgt, Dtok)


# ------------------------------ param init -----------------------------------

def init_params(key, token_dim, predictor_dim, depth):
    w_dtype = jnp.bfloat16        # MXU operands in bf16; biases / LN params f32

    def lin(k, din, dout):
        bound = (6.0 / (din + dout)) ** 0.5       # xavier_uniform, zero bias
        w = jax.random.uniform(k, (din, dout), jnp.float32, -bound, bound)
        return w.astype(w_dtype), jnp.zeros((dout,), jnp.float32)

    hidden = 4 * predictor_dim
    keys = jax.random.split(key, 4 + depth)

    ck = jax.random.split(keys[0], 3)
    c_w1, c_b1 = lin(ck[0], token_dim, hidden)
    c_w2, c_b2 = lin(ck[1], hidden, token_dim)
    c_w3, c_b3 = lin(ck[2], token_dim, predictor_dim)

    pos_w, pos_b = lin(keys[1], token_dim, predictor_dim)
    out_w, out_b = lin(keys[2], predictor_dim, token_dim)

    def ln_pair(d):
        return jnp.ones((d,), jnp.float32), jnp.zeros((d,), jnp.float32)

    def attn_params(ks):
        wq, bq = lin(ks[0], predictor_dim, predictor_dim)
        wk, bk = lin(ks[1], predictor_dim, predictor_dim)
        wv, bv = lin(ks[2], predictor_dim, predictor_dim)
        wo, bo = lin(ks[3], predictor_dim, predictor_dim)
        g, b = ln_pair(predictor_dim)
        return dict(ln_g=g, ln_b=b, wq=wq, bq=bq, wk=wk, bk=bk,
                    wv=wv, bv=bv, wo=wo, bo=bo)

    layers = []
    for d in range(depth):
        lk = jax.random.split(keys[4 + d], 10)
        m_w1, m_b1 = lin(lk[8], predictor_dim, hidden)
        m_w2, m_b2 = lin(lk[9], hidden, predictor_dim)
        g, b = ln_pair(predictor_dim)
        layers.append(dict(
            self_attn=attn_params(lk[0:4]),
            cross_attn=attn_params(lk[4:8]),
            mlp=dict(ln_g=g, ln_b=b, w1=m_w1, b1=m_b1, w2=m_w2, b2=m_b2),
        ))

    lnf_g, lnf_b = ln_pair(predictor_dim)
    cln_g, cln_b = ln_pair(token_dim)
    return dict(
        connector=dict(w1=c_w1, b1=c_b1, w2=c_w2, b2=c_b2,
                       ln_g=cln_g, ln_b=cln_b, w3=c_w3, b3=c_b3),
        pos_w=pos_w, pos_b=pos_b,
        mask_token=jnp.zeros((1, 1, predictor_dim), jnp.float32),
        cls_token=0.02 * jax.random.normal(keys[3], (1, 1, predictor_dim), jnp.float32),
        encoder=dict(layers=layers, lnf_g=lnf_g, lnf_b=lnf_b),
        out_w=out_w, out_b=out_b,
    )


# --------------------------------- main ---------------------------------------

if __name__ == "__main__":
    token_dim = 128        # lane-dense (multiple of 128)
    predictor_dim = 128    # lane-dense (multiple of 128)
    depth = 2
    num_heads = 4
    B, N_ctx, N_tgt = 2, 64, 32

    root = jax.random.PRNGKey(0)
    kp, k1, k2, k3 = jax.random.split(root, 4)

    params = init_params(kp, token_dim, predictor_dim, depth)

    context_tokens = jax.random.normal(k1, (B, N_ctx, token_dim), jnp.float32)
    context_pos = jax.random.normal(k2, (B, N_ctx, token_dim), jnp.float32)
    target_pos = jax.random.normal(k3, (B, N_tgt, token_dim), jnp.float32)
    context_padding_mask = jnp.zeros((B, N_ctx), jnp.bool_).at[1, -8:].set(True)
    target_padding_mask = jnp.zeros((B, N_tgt), jnp.bool_).at[1, -4:].set(True)

    out = cross_predictor_forward(params, num_heads, context_tokens, context_pos,
                                  target_pos, context_padding_mask, target_padding_mask)
    out = jax.block_until_ready(out)
    assert out.shape == (B, N_tgt, token_dim)
    assert bool(jnp.all(jnp.isfinite(out)))
    print("KERNEL_OK")
</pallas_src>

<mosaic_0001>
module attributes {stable_mosaic.version = 11 : i64} {
  func.func @_connector_kernel(%arg0: i32, %arg1: memref<128x128xf32, #tpu.memory_space<vmem>>, %arg2: memref<128x128xf32, #tpu.memory_space<vmem>>, %arg3: memref<128x512xbf16, #tpu.memory_space<vmem>>, %arg4: memref<1x512xf32, #tpu.memory_space<vmem>>, %arg5: memref<512x128xbf16, #tpu.memory_space<vmem>>, %arg6: memref<1x128xf32, #tpu.memory_space<vmem>>, %arg7: memref<1x128xf32, #tpu.memory_space<vmem>>, %arg8: memref<1x128xf32, #tpu.memory_space<vmem>>, %arg9: memref<128x128xbf16, #tpu.memory_space<vmem>>, %arg10: memref<1x128xf32, #tpu.memory_space<vmem>>, %arg11: memref<128x128xbf16, #tpu.memory_space<vmem>>, %arg12: memref<1x128xf32, #tpu.memory_space<vmem>>, %arg13: memref<128x128xf32, #tpu.memory_space<vmem>>) attributes {dimension_semantics = [#tpu.dimension_semantics<parallel>], iteration_bounds = array<i64: 1>, scalar_prefetch = 0 : i64, scratch_operands = 0 : i64, tpu.core_type = #tpu.core_type<tc>, window_params = [{transform_indices = @transform_0, window_bounds = array<i64: 128, 128>}, {transform_indices = @transform_1, window_bounds = array<i64: 128, 128>}, {pipeline_mode = #tpu.pipeline_mode<synchronous>, transform_indices = @transform_2, window_bounds = array<i64: 128, 512>}, {pipeline_mode = #tpu.pipeline_mode<synchronous>, transform_indices = @transform_3, window_bounds = array<i64: 1, 512>}, {pipeline_mode = #tpu.pipeline_mode<synchronous>, transform_indices = @transform_4, window_bounds = array<i64: 512, 128>}, {pipeline_mode = #tpu.pipeline_mode<synchronous>, transform_indices = @transform_5, window_bounds = array<i64: 1, 128>}, {pipeline_mode = #tpu.pipeline_mode<synchronous>, transform_indices = @transform_6, window_bounds = array<i64: 1, 128>}, {pipeline_mode = #tpu.pipeline_mode<synchronous>, transform_indices = @transform_7, window_bounds = array<i64: 1, 128>}, {pipeline_mode = #tpu.pipeline_mode<synchronous>, transform_indices = @transform_8, window_bounds = array<i64: 128, 128>}, {pipeline_mode = #tpu.pipeline_mode<synchronous>, transform_indices = @transform_9, window_bounds = array<i64: 1, 128>}, {pipeline_mode = #tpu.pipeline_mode<synchronous>, transform_indices = @transform_10, window_bounds = array<i64: 128, 128>}, {pipeline_mode = #tpu.pipeline_mode<synchronous>, transform_indices = @transform_11, window_bounds = array<i64: 1, 128>}, {transform_indices = @transform_12, window_bounds = array<i64: 128, 128>}]} {
    %c0 = arith.constant 0 : index
    %c0_0 = arith.constant 0 : index
    %0 = vector.load %arg1[%c0, %c0_0] : memref<128x128xf32, #tpu.memory_space<vmem>>, vector<128x128xf32>
    %1 = arith.truncf %0 : vector<128x128xf32> to vector<128x128xbf16>
    %c0_1 = arith.constant 0 : index
    %c0_2 = arith.constant 0 : index
    %2 = vector.load %arg3[%c0_1, %c0_2] : memref<128x512xbf16, #tpu.memory_space<vmem>>, vector<128x512xbf16>
    %cst = arith.constant dense<0.000000e+00> : vector<128x512xf32>
    %3 = tpu.matmul %1, %2, %cst {dimension_numbers = #tpu.dot_dimension_numbers<[1], [0], [0], [1], [0, 0, 1, 1], [], []>} : vector<128x128xbf16>, vector<128x512xbf16>, vector<128x512xf32> -> vector<128x512xf32>
    %c0_3 = arith.constant 0 : index
    %c0_4 = arith.constant 0 : index
    %4 = vector.load %arg4[%c0_3, %c0_4] : memref<1x512xf32, #tpu.memory_space<vmem>>, vector<1x512xf32>
    %5 = vector.broadcast %4 : vector<1x512xf32> to vector<128x512xf32>
    %6 = arith.addf %3, %5 : vector<128x512xf32>
    %cst_5 = arith.constant 5.000000e-01 : f32
    %7 = vector.broadcast %cst_5 : f32 to vector<128x512xf32>
    %8 = arith.mulf %6, %7 : vector<128x512xf32>
    %cst_6 = arith.constant 0.707106769 : f32
    %9 = vector.broadcast %cst_6 : f32 to vector<128x512xf32>
    %10 = arith.mulf %6, %9 : vector<128x512xf32>
    %cst_7 = arith.constant 0.000000e+00 : f32
    %11 = vector.broadcast %cst_7 : f32 to vector<128x512xf32>
    %12 = arith.cmpf oge, %10, %11 : vector<128x512xf32>
    %cst_8 = arith.constant 1.000000e+00 : f32
    %cst_9 = arith.constant -1.000000e+00 : f32
    %13 = vector.broadcast %cst_8 : f32 to vector<128x512xf32>
    %14 = vector.broadcast %cst_9 : f32 to vector<128x512xf32>
    %15 = arith.select %12, %13, %14 : vector<128x512xi1>, vector<128x512xf32>
    %16 = math.absf %10 : vector<128x512xf32>
    %cst_10 = arith.constant 0.327591091 : f32
    %17 = vector.broadcast %cst_10 : f32 to vector<128x512xf32>
    %18 = arith.mulf %17, %16 : vector<128x512xf32>
    %cst_11 = arith.constant 1.000000e+00 : f32
    %19 = vector.broadcast %cst_11 : f32 to vector<128x512xf32>
    %20 = arith.addf %19, %18 : vector<128x512xf32>
    %cst_12 = arith.constant 1.000000e+00 : f32
    %21 = vector.broadcast %cst_12 : f32 to vector<128x512xf32>
    %22 = arith.divf %21, %20 : vector<128x512xf32>
    %cst_13 = arith.constant 1.06140542 : f32
    %23 = vector.broadcast %cst_13 : f32 to vector<128x512xf32>
    %24 = arith.mulf %23, %22 : vector<128x512xf32>
    %cst_14 = arith.constant -1.45315206 : f32
    %25 = vector.broadcast %cst_14 : f32 to vector<128x512xf32>
    %26 = arith.addf %24, %25 : vector<128x512xf32>
    %27 = arith.mulf %26, %22 : vector<128x512xf32>
    %cst_15 = arith.constant 1.42141378 : f32
    %28 = vector.broadcast %cst_15 : f32 to vector<128x512xf32>
    %29 = arith.addf %27, %28 : vector<128x512xf32>
    %30 = arith.mulf %29, %22 : vector<128x512xf32>
    %cst_16 = arith.constant -0.284496725 : f32
    %31 = vector.broadcast %cst_16 : f32 to vector<128x512xf32>
    %32 = arith.addf %30, %31 : vector<128x512xf32>
    %33 = arith.mulf %32, %22 : vector<128x512xf32>
    %cst_17 = arith.constant 0.254829586 : f32
    %34 = vector.broadcast %cst_17 : f32 to vector<128x512xf32>
    %35 = arith.addf %33, %34 : vector<128x512xf32>
    %36 = arith.mulf %35, %22 : vector<128x512xf32>
    %cst_18 = arith.constant 0.000000e+00 : f32
    %37 = vector.broadcast %cst_18 : f32 to vector<128x512xf32>
    %38 = arith.subf %37, %16 : vector<128x512xf32>
    %39 = arith.mulf %38, %16 : vector<128x512xf32>
    %40 = math.exp %39 : vector<128x512xf32>
    %41 = arith.mulf %36, %40 : vector<128x512xf32>
    %cst_19 = arith.constant 1.000000e+00 : f32
    %42 = vector.broadcast %cst_19 : f32 to vector<128x512xf32>
    %43 = arith.subf %42, %41 : vector<128x512xf32>
    %44 = arith.mulf %15, %43 : vector<128x512xf32>
    %cst_20 = arith.constant 1.000000e+00 : f32
    %45 = vector.broadcast %cst_20 : f32 to vector<128x512xf32>
    %46 = arith.addf %45, %44 : vector<128x512xf32>
    %47 = arith.mulf %8, %46 : vector<128x512xf32>
    %48 = arith.truncf %47 : vector<128x512xf32> to vector<128x512xbf16>
    %c0_21 = arith.constant 0 : index
    %c0_22 = arith.constant 0 : index
    %49 = vector.load %arg5[%c0_21, %c0_22] : memref<512x128xbf16, #tpu.memory_space<vmem>>, vector<512x128xbf16>
    %cst_23 = arith.constant dense<0.000000e+00> : vector<128x128xf32>
    %50 = tpu.matmul %48, %49, %cst_23 {dimension_numbers = #tpu.dot_dimension_numbers<[1], [0], [0], [1], [0, 0, 1, 1], [], []>} : vector<128x512xbf16>, vector<512x128xbf16>, vector<128x128xf32> -> vector<128x128xf32>
    %c0_24 = arith.constant 0 : index
    %c0_25 = arith.constant 0 : index
    %51 = vector.load %arg6[%c0_24, %c0_25] : memref<1x128xf32, #tpu.memory_space<vmem>>, vector<1x128xf32>
    %52 = vector.broadcast %51 : vector<1x128xf32> to vector<128x128xf32>
    %53 = arith.addf %50, %52 : vector<128x128xf32>
    %c0_26 = arith.constant 0 : index
    %c0_27 = arith.constant 0 : index
    %54 = vector.load %arg7[%c0_26, %c0_27] : memref<1x128xf32, #tpu.memory_space<vmem>>, vector<1x128xf32>
    %c0_28 = arith.constant 0 : index
    %c0_29 = arith.constant 0 : index
    %55 = vector.load %arg8[%c0_28, %c0_29] : memref<1x128xf32, #tpu.memory_space<vmem>>, vector<1x128xf32>
    %cst_30 = arith.constant dense<0.000000e+00> : vector<128xf32>
    %56 = vector.multi_reduction <add>, %53, %cst_30 [1] : vector<128x128xf32> to vector<128xf32>
    %57 = vector.shape_cast %56 : vector<128xf32> to vector<128x1xf32>
    %cst_31 = arith.constant 1.280000e+02 : f32
    %58 = vector.broadcast %cst_31 : f32 to vector<128x1xf32>
    %59 = arith.divf %57, %58 : vector<128x1xf32>
    %60 = vector.broadcast %59 : vector<128x1xf32> to vector<128x128xf32>
    %61 = arith.subf %53, %60 : vector<128x128xf32>
    %62 = arith.mulf %61, %61 : vector<128x128xf32>
    %cst_32 = arith.constant dense<0.000000e+00> : vector<128xf32>
    %63 = vector.multi_reduction <add>, %62, %cst_32 [1] : vector<128x128xf32> to vector<128xf32>
    %64 = vector.shape_cast %63 : vector<128xf32> to vector<128x1xf32>
    %cst_33 = arith.constant 1.280000e+02 : f32
    %65 = vector.broadcast %cst_33 : f32 to vector<128x1xf32>
    %66 = arith.divf %64, %65 : vector<128x1xf32>
    %67 = vector.broadcast %59 : vector<128x1xf32> to vector<128x128xf32>
    %68 = arith.subf %53, %67 : vector<128x128xf32>
    %cst_34 = arith.constant 9.99999974E-6 : f32
    %69 = vector.broadcast %cst_34 : f32 to vector<128x1xf32>
    %70 = arith.addf %66, %69 : vector<128x1xf32>
    %71 = math.rsqrt %70 : vector<128x1xf32>
    %72 = vector.broadcast %71 : vector<128x1xf32> to vector<128x128xf32>
    %73 = arith.mulf %68, %72 : vector<128x128xf32>
    %74 = vector.broadcast %54 : vector<1x128xf32> to vector<128x128xf32>
    %75 = arith.mulf %73, %74 : vector<128x128xf32>
    %76 = vector.broadcast %55 : vector<1x128xf32> to vector<128x128xf32>
    %77 = arith.addf %75, %76 : vector<128x128xf32>
    %78 = arith.truncf %77 : vector<128x128xf32> to vector<128x128xbf16>
    %c0_35 = arith.constant 0 : index
    %c0_36 = arith.constant 0 : index
    %79 = vector.load %arg9[%c0_35, %c0_36] : memref<128x128xbf16, #tpu.memory_space<vmem>>, vector<128x128xbf16>
    %cst_37 = arith.constant dense<0.000000e+00> : vector<128x128xf32>
    %80 = tpu.matmul %78, %79, %cst_37 {dimension_numbers = #tpu.dot_dimension_numbers<[1], [0], [0], [1], [0, 0, 1, 1], [], []>} : vector<128x128xbf16>, vector<128x128xbf16>, vector<128x128xf32> -> vector<128x128xf32>
    %c0_38 = arith.constant 0 : index
    %c0_39 = arith.constant 0 : index
    %81 = vector.load %arg10[%c0_38, %c0_39] : memref<1x128xf32, #tpu.memory_space<vmem>>, vector<1x128xf32>
    %82 = vector.broadcast %81 : vector<1x128xf32> to vector<128x128xf32>
    %83 = arith.addf %80, %82 : vector<128x128xf32>
    %c0_40 = arith.constant 0 : index
    %c0_41 = arith.constant 0 : index
    %84 = vector.load %arg2[%c0_40, %c0_41] : memref<128x128xf32, #tpu.memory_space<vmem>>, vector<128x128xf32>
    %85 = arith.truncf %84 : vector<128x128xf32> to vector<128x128xbf16>
    %c0_42 = arith.constant 0 : index
    %c0_43 = arith.constant 0 : index
    %86 = vector.load %arg11[%c0_42, %c0_43] : memref<128x128xbf16, #tpu.memory_space<vmem>>, vector<128x128xbf16>
    %cst_44 = arith.constant dense<0.000000e+00> : vector<128x128xf32>
    %87 = tpu.matmul %85, %86, %cst_44 {dimension_numbers = #tpu.dot_dimension_numbers<[1], [0], [0], [1], [0, 0, 1, 1], [], []>} : vector<128x128xbf16>, vector<128x128xbf16>, vector<128x128xf32> -> vector<128x128xf32>
    %88 = arith.addf %83, %87 : vector<128x128xf32>
    %c0_45 = arith.constant 0 : index
    %c0_46 = arith.constant 0 : index
    %89 = vector.load %arg12[%c0_45, %c0_46] : memref<1x128xf32, #tpu.memory_space<vmem>>, vector<1x128xf32>
    %90 = vector.broadcast %89 : vector<1x128xf32> to vector<128x128xf32>
    %91 = arith.addf %88, %90 : vector<128x128xf32>
    %c0_47 = arith.constant 0 : index
    %c0_48 = arith.constant 0 : index
    %92 = vector.load %arg13[%c0_47, %c0_48] : memref<128x128xf32, #tpu.memory_space<vmem>>, vector<128x128xf32>
    tpu.vector_store %arg13[%c0_47, %c0_48], %91 {strides = array<i32>} : memref<128x128xf32, #tpu.memory_space<vmem>>, vector<128x128xf32>,
    return
  }
  func.func @transform_0(%arg0: i32) -> (i32, i32) {
    %c0_i32 = arith.constant 0 : i32
    %c0_i32_0 = arith.constant 0 : i32
    return %arg0, %c0_i32 : i32, i32
  }
  func.func @transform_1(%arg0: i32) -> (i32, i32) {
    %c0_i32 = arith.constant 0 : i32
    %c0_i32_0 = arith.constant 0 : i32
    return %arg0, %c0_i32 : i32, i32
  }
  func.func @transform_2(%arg0: i32) -> (i32, i32) {
    %c0_i32 = arith.constant 0 : i32
    %c0_i32_0 = arith.constant 0 : i32
    %c0_i32_1 = arith.constant 0 : i32
    return %c0_i32, %c0_i32_0 : i32, i32
  }
  func.func @transform_3(%arg0: i32) -> (i32, i32) {
    %c0_i32 = arith.constant 0 : i32
    %c0_i32_0 = arith.constant 0 : i32
    %c0_i32_1 = arith.constant 0 : i32
    return %c0_i32, %c0_i32_0 : i32, i32
  }
  func.func @transform_4(%arg0: i32) -> (i32, i32) {
    %c0_i32 = arith.constant 0 : i32
    %c0_i32_0 = arith.constant 0 : i32
    %c0_i32_1 = arith.constant 0 : i32
    return %c0_i32, %c0_i32_0 : i32, i32
  }
  func.func @transform_5(%arg0: i32) -> (i32, i32) {
    %c0_i32 = arith.constant 0 : i32
    %c0_i32_0 = arith.constant 0 : i32
    %c0_i32_1 = arith.constant 0 : i32
    return %c0_i32, %c0_i32_0 : i32, i32
  }
  func.func @transform_6(%arg0: i32) -> (i32, i32) {
    %c0_i32 = arith.constant 0 : i32
    %c0_i32_0 = arith.constant 0 : i32
    %c0_i32_1 = arith.constant 0 : i32
    return %c0_i32, %c0_i32_0 : i32, i32
  }
  func.func @transform_7(%arg0: i32) -> (i32, i32) {
    %c0_i32 = arith.constant 0 : i32
    %c0_i32_0 = arith.constant 0 : i32
    %c0_i32_1 = arith.constant 0 : i32
    return %c0_i32, %c0_i32_0 : i32, i32
  }
  func.func @transform_8(%arg0: i32) -> (i32, i32) {
    %c0_i32 = arith.constant 0 : i32
    %c0_i32_0 = arith.constant 0 : i32
    %c0_i32_1 = arith.constant 0 : i32
    return %c0_i32, %c0_i32_0 : i32, i32
  }
  func.func @transform_9(%arg0: i32) -> (i32, i32) {
    %c0_i32 = arith.constant 0 : i32
    %c0_i32_0 = arith.constant 0 : i32
    %c0_i32_1 = arith.constant 0 : i32
    return %c0_i32, %c0_i32_0 : i32, i32
  }
  func.func @transform_10(%arg0: i32) -> (i32, i32) {
    %c0_i32 = arith.constant 0 : i32
    %c0_i32_0 = arith.constant 0 : i32
    %c0_i32_1 = arith.constant 0 : i32
    return %c0_i32, %c0_i32_0 : i32, i32
  }
  func.func @transform_11(%arg0: i32) -> (i32, i32) {
    %c0_i32 = arith.constant 0 : i32
    %c0_i32_0 = arith.constant 0 : i32
    %c0_i32_1 = arith.constant 0 : i32
    return %c0_i32, %c0_i32_0 : i32, i32
  }
  func.func @transform_12(%arg0: i32) -> (i32, i32) {
    %c0_i32 = arith.constant 0 : i32
    %c0_i32_0 = arith.constant 0 : i32
    return %arg0, %c0_i32 : i32, i32
  }
}

</mosaic_0001>

<bundles_post_ra>
// kernel: tpu_custom_call.1
= control target key start
LH: loop header
LB: loop body
LE: loop exit
PB: predicated region body
PF: predicated region fallthrough
CT: control target
= control target key end

     0   :  { %17 = vsyncpa [#allocation3], 0  ;;  %s6740_s0 = inlined_call_operand.hbm [shape: f32[128,128], index: 0, kind: input, shape index: {}]   ;;  %s6741_s1 = inlined_call_operand.hbm [shape: f32[128,128], index: 1, kind: input, shape index: {}]   ;;  %s6742_s2 = inlined_call_operand.hbm [shape: bf16[128,512], index: 2, kind: input, shape index: {}]   ;;  %s6743_s3 = inlined_call_operand.vmem [shape: f32[1,512], index: 3, kind: input, shape index: {}]   ;;  %s6744_s4 = inlined_call_operand.hbm [shape: bf16[512,128], index: 4, kind: input, shape index: {}]   ;;  %s6745_s5 = inlined_call_operand.vmem [shape: f32[1,128], index: 5, kind: input, shape index: {}]   ;;  %s6746_s6 = inlined_call_operand.vmem [shape: f32[1,128], index: 6, kind: input, shape index: {}]   ;;  %s6747_s7 = inlined_call_operand.vmem [shape: f32[1,128], index: 7, kind: input, shape index: {}]   ;;  %s6748_s8 = inlined_call_operand.hbm [shape: bf16[128,128], index: 8, kind: input, shape index: {}]   ;;  %s6749_s9 = inlined_call_operand.vmem [shape: f32[1,128], index: 9, kind: input, shape index: {}]   ;;  %s6750_s10 = inlined_call_operand.hbm [shape: bf16[128,128], index: 10, kind: input, shape index: {}]   ;;  %s6751_s11 = inlined_call_operand.vmem [shape: f32[1,128], index: 11, kind: input, shape index: {}]   ;;  %s6752_s12 = inlined_call_operand.hbm [shape: f32[128,128], index: 12, kind: output, shape index: {}]  }
   0x1   :  { %18 = vsyncpa [#allocation6], 0 }
   0x2   :  { %19 = vsyncpa [#allocation9], 0 }
   0x3   :  { %20 = vsyncpa [#allocation12], 0 }
   0x4   :  { %21 = vsyncpa [#allocation4], 0  ;;  %s4323_s21 = smov [#allocation5]   ;;  %s4324_s23 = smov [#allocation8]  }
   0x5   :  { %s39_s22 = sshll.u32 %s4323_s21, 4  ;;  %s65_s24 = sshll.u32 %s4324_s23, 4  ;;  %s40_s22 = int_to_ptr.vmem [resolvable:$true] %s39_s22  ;;  %s66_s24 = int_to_ptr.vmem [resolvable:$true] %s65_s24 }
   0x6   :  { %s4181_s25 = scalar_lea.vmem %s40_s22, 2048  ;;  %p4186_p1 = scmp.lt.s32.totalorder %s40_s22, %s40_s22 }
   0x7   :  { %p4182_p0 = scmp.ne.s32.totalorder %s40_s22, %s4181_s25  ;;  %p4187_p2 = scmp.lt.s32.totalorder %s4181_s25, %s4181_s25 }
   0x9   :  { %p4188_p3 = por %p4187_p2, %p4186_p1 }
   0xb   :  { %p4189_p4 = pnand %p4188_p3, %p4182_p0 }
   0xd   :  { %4192 = shalt.err (!%p4189_p4)
}
   0xe   :  { %s4325_s26 = smov 128   ;;  %s4326_s27 = smov 8  }
   0xf   :  { %45 = dma.hbm_to_vmem [thread:$0]  %s6741_s1, 2048, %s40_s22, [#allocation6], %s4325_s26, %s4325_s26, %s4326_s27  }
  0x10   :  { %s4201_s30 = scalar_lea.vmem %s66_s24, 4096  ;;  %p4206_p6 = scmp.lt.s32.totalorder %s66_s24, %s66_s24 }
  0x11   :  { %p4202_p5 = scmp.ne.s32.totalorder %s66_s24, %s4201_s30  ;;  %p4207_p7 = scmp.lt.s32.totalorder %s4201_s30, %s4201_s30 }
  0x13   :  { %p4208_p8 = por %p4207_p7, %p4206_p6 }
  0x15   :  { %p4209_p9 = pnand %p4208_p8, %p4202_p5 }
  0x17   :  { %4212 = shalt.err (!%p4209_p9)
}
  0x18   :  { %s4327_s13 = smov 64   ;;  %s4328_s14 = smov 4  }
  0x19   :  { %71 = dma.hbm_to_vmem [thread:$0]  %s6744_s4, 4096, %s66_s24, [#allocation9], %s4327_s13, %s4327_s13, %s4328_s14  }
  0x1a   :  { %s4329_s17 = smov [#allocation2]   ;;  %s4330_s19 = smov [#allocation7]  }
  0x1b   :  { %s27_s18 = sshll.u32 %s4329_s17, 4  ;;  %s51_s1 = sshll.u32 %s4330_s19, 4  ;;  %s28_s18 = int_to_ptr.vmem [resolvable:$true] %s27_s18  ;;  %s52_s1 = int_to_ptr.vmem [resolvable:$true] %s51_s1 }
  0x1c   :  { %s4221_s20 = scalar_lea.vmem %s28_s18, 2048  ;;  %p4226_p11 = scmp.lt.s32.totalorder %s28_s18, %s28_s18 }
  0x1d   :  { %p4222_p10 = scmp.ne.s32.totalorder %s28_s18, %s4221_s20  ;;  %p4227_p12 = scmp.lt.s32.totalorder %s4221_s20, %s4221_s20 }
  0x1f   :  { %p4228_p13 = por %p4227_p12, %p4226_p11 }
  0x21   :  { %p4229_p0 = pnand %p4228_p13, %p4222_p10 }
  0x23   :  { %4232 = shalt.err (!%p4229_p0)
}
  0x24   :  { %33 = dma.hbm_to_vmem [thread:$0]  %s6740_s0, 2048, %s28_s18, [#allocation3], %s4325_s26, %s4325_s26, %s4326_s27  }
  0x25   :  { %s4241_s4 = scalar_lea.vmem %s52_s1, 4096  ;;  %p4246_p2 = scmp.lt.s32.totalorder %s52_s1, %s52_s1 }
  0x26   :  { %p4242_p1 = scmp.ne.s32.totalorder %s52_s1, %s4241_s4  ;;  %p4247_p3 = scmp.lt.s32.totalorder %s4241_s4, %s4241_s4 }
  0x28   :  { %p4248_p4 = por %p4247_p3, %p4246_p2 }
  0x2a   :  { %p4249_p5 = pnand %p4248_p4, %p4242_p1 }
  0x2c   :  { %4252 = shalt.err (!%p4249_p5)
}
  0x2d   :  { %s4331_s23 = smov 256   ;;  %s4332_s24 = smov 16  }
  0x2e   :  { %57 = dma.hbm_to_vmem [thread:$0]  %s6742_s2, 4096, %s52_s1, [#allocation6], %s4331_s23, %s4331_s23, %s4332_s24  }
  0x2f   :  { %s4333_s29 = smov [#allocation10]   ;;  %s4334_s15 = smov [#allocation11]  }
  0x30   :  { %s83_s30 = sshll.u32 %s4333_s29, 4  ;;  %s97_s16 = sshll.u32 %s4334_s15, 4  ;;  %s84_s30 = int_to_ptr.vmem [resolvable:$true] %s83_s30  ;;  %s98_s16 = int_to_ptr.vmem [resolvable:$true] %s97_s16 }
  0x31   :  { %s4261_s0 = scalar_lea.vmem %s84_s30, 1024  ;;  %p4266_p7 = scmp.lt.s32.totalorder %s84_s30, %s84_s30 }
  0x32   :  { %p4262_p6 = scmp.ne.s32.totalorder %s84_s30, %s4261_s0  ;;  %p4267_p8 = scmp.lt.s32.totalorder %s4261_s0, %s4261_s0 }
  0x34   :  { %p4268_p9 = por %p4267_p8, %p4266_p7 }
  0x36   :  { %p4269_p10 = pnand %p4268_p9, %p4262_p6 }
  0x38   :  { %4272 = shalt.err (!%p4269_p10)
}
  0x39   :  { %89 = dma.hbm_to_vmem [thread:$0]  %s6748_s8, 1024, %s84_s30, [#allocation9], %s4327_s13, %s4327_s13, %s4328_s14  }
  0x3a   :  { %s4281_s2 = scalar_lea.vmem %s98_s16, 1024  ;;  %p4286_p12 = scmp.lt.s32.totalorder %s98_s16, %s98_s16 }
  0x3b   :  { %p4282_p11 = scmp.ne.s32.totalorder %s98_s16, %s4281_s2  ;;  %p4287_p13 = scmp.lt.s32.totalorder %s4281_s2, %s4281_s2 }
  0x3d   :  { %p4288_p0 = por %p4287_p13, %p4286_p12 }
  0x3f   :  { %p4289_p1 = pnand %p4288_p0, %p4282_p11 }
  0x41   :  { %4292 = shalt.err (!%p4289_p1)
}
  0x42   :  { %103 = dma.hbm_to_vmem [thread:$0]  %s6750_s10, 1024, %s98_s16, [#allocation12], %s4327_s13, %s4327_s13, %s4328_s14  }
  0x43   :  { %4313 = dma.done.wait [#allocation3], 2048  }
  0x44   :  { %4314 = vsyncadd [#allocation3], 4294965248 }
  0x45   :  { %4315 = dma.done.wait [#allocation6], 6144  }
  0x46   :  { %4316 = vsyncadd [#allocation6], 4294961152 }
  0x47   :  { %4317 = dma.done.wait [#allocation9], 5120  }
  0x48   :  { %4318 = vsyncadd [#allocation9], 4294962176 }
  0x49   :  { %4319 = dma.done.wait [#allocation12], 1024  }
  0x4a   :  { %4320 = vsyncadd [#allocation12], 4294966272  ;;  %v4335_v0 = vmov 0   ;;  %v3789_v1 = vld [vmem:[#allocation7 + $0xe4] ss:$16 sps:$4 sm:$0xff]   ;;  %v126_v34 = vld [vmem:[#allocation2 + $0x8] sm:$0xff] }
  0x4b   :  { %395 = vmatprep.mubr.bf16.mxu0 %v4335_v0  ;;  %508 = vmatprep.mubr.bf16.mxu1 %v4335_v0  ;;  %v3791_v2 = vld [vmem:[#allocation7 + $0xec] ss:$16 sps:$4 sm:$0xff]   ;;  %v3793_v3 = vld [vmem:[#allocation7 + $0xe0] ss:$16 sps:$4 sm:$0xff]   ;;  %v3794_v4 = vld [vmem:[#allocation7 + $0xe8] ss:$16 sps:$4 sm:$0xff]  }
  0x4c   :  { %363 = vmatprep.subr.bf16.mxu0 %v3789_v1  ;;  %476 = vmatprep.subr.bf16.mxu1 %v3791_v2  ;;  %v3795_v5 = vld [vmem:[#allocation7 + $0xc4] ss:$16 sps:$4 sm:$0xff]   ;;  %v3797_v6 = vld [vmem:[#allocation7 + $0xcc] ss:$16 sps:$4 sm:$0xff]   ;;  %v3799_v7 = vld [vmem:[#allocation7 + $0xc0] ss:$16 sps:$4 sm:$0xff]  }
  0x4d   :  { %364 = vmatpush1.bf16.msra.mxu0 %v3793_v3  ;;  %477 = vmatpush1.bf16.msra.mxu1 %v3794_v4  ;;  %v3800_v8 = vld [vmem:[#allocation7 + $0xc8] ss:$16 sps:$4 sm:$0xff]   ;;  %v3801_v9 = vld [vmem:[#allocation7 + $0xa4] ss:$16 sps:$4 sm:$0xff]   ;;  %v3803_v10 = vld [vmem:[#allocation7 + $0xac] ss:$16 sps:$4 sm:$0xff]  }
  0x4e   :  { %365 = vmatprep.subr.bf16.mxu0 %v3795_v5  ;;  %478 = vmatprep.subr.bf16.mxu1 %v3797_v6  ;;  %v3805_v11 = vld [vmem:[#allocation7 + $0xa0] ss:$16 sps:$4 sm:$0xff]   ;;  %v3806_v12 = vld [vmem:[#allocation7 + $0xa8] ss:$16 sps:$4 sm:$0xff]   ;;  %v3807_v13 = vld [vmem:[#allocation7 + $0x84] ss:$16 sps:$4 sm:$0xff]  }
  0x4f   :  { %v3809_v14 = vld [vmem:[#allocation7 + $0x8c] ss:$16 sps:$4 sm:$0xff]   ;;  %v3811_v15 = vld [vmem:[#allocation7 + $0x80] ss:$16 sps:$4 sm:$0xff]   ;;  %v3812_v16 = vld [vmem:[#allocation7 + $0x88] ss:$16 sps:$4 sm:$0xff]  }
  0x50   :  { %v3813_v17 = vld [vmem:[#allocation7 + $0x64] ss:$16 sps:$4 sm:$0xff]   ;;  %v3815_v18 = vld [vmem:[#allocation7 + $0x6c] ss:$16 sps:$4 sm:$0xff]   ;;  %v3817_v19 = vld [vmem:[#allocation7 + $0x60] ss:$16 sps:$4 sm:$0xff]  }
  0x51   :  { %366 = vmatpush1.bf16.msra.mxu0 %v3799_v7  ;;  %479 = vmatpush1.bf16.msra.mxu1 %v3800_v8  ;;  %v3818_v20 = vld [vmem:[#allocation7 + $0x68] ss:$16 sps:$4 sm:$0xff]   ;;  %v3819_v21 = vld [vmem:[#allocation7 + $0x44] ss:$16 sps:$4 sm:$0xff]   ;;  %v3821_v22 = vld [vmem:[#allocation7 + $0x4c] ss:$16 sps:$4 sm:$0xff]  }
  0x52   :  { %367 = vmatprep.subr.bf16.mxu0 %v3801_v9  ;;  %480 = vmatprep.subr.bf16.mxu1 %v3803_v10  ;;  %v3823_v23 = vld [vmem:[#allocation7 + $0x40] ss:$16 sps:$4 sm:$0xff]   ;;  %v3824_v24 = vld [vmem:[#allocation7 + $0x48] ss:$16 sps:$4 sm:$0xff]   ;;  %v3825_v25 = vld [vmem:[#allocation7 + $0x24] ss:$16 sps:$4 sm:$0xff]  }
  0x53   :  { %v3827_v26 = vld [vmem:[#allocation7 + $0x2c] ss:$16 sps:$4 sm:$0xff]   ;;  %v3829_v27 = vld [vmem:[#allocation7 + $0x20] ss:$16 sps:$4 sm:$0xff]   ;;  %v3830_v28 = vld [vmem:[#allocation7 + $0x28] ss:$16 sps:$4 sm:$0xff]  }
  0x54   :  { %v3831_v29 = vld [vmem:[#allocation7 + $0x4] ss:$16 sps:$4 sm:$0xff]   ;;  %v3833_v30 = vld [vmem:[#allocation7 + $0xc] ss:$16 sps:$4 sm:$0xff]   ;;  %v3835_v31 = vld [vmem:[#allocation7] ss:$16 sps:$4 sm:$0xff]  }
  0x55   :  { %368 = vmatpush1.bf16.msra.mxu0 %v3805_v11  ;;  %481 = vmatpush1.bf16.msra.mxu1 %v3806_v12  ;;  %v3836_v32 = vld [vmem:[#allocation7 + $0x8] ss:$16 sps:$4 sm:$0xff]   ;;  %v125_v33 = vld [vmem:[#allocation2] sm:$0xff]  ;;  %v127_v39 = vld [vmem:[#allocation2 + $0x10] sm:$0xff] }
  0x56   :  { %369 = vmatprep.subr.bf16.mxu0 %v3807_v13  ;;  %482 = vmatprep.subr.bf16.mxu1 %v3809_v14  ;;  %v3837_v35 = vld [vmem:[#allocation8 + $0x78] sm:$0xff]   ;;  %v141_v37 = vpack.c.bf16 %v126_v34, %v125_v33  ;;  %v129_v42 = vld [vmem:[#allocation2 + $0x20] sm:$0xff]  ;;  %v130_v43 = vld [vmem:[#allocation2 + $0x28] sm:$0xff] }
  0x57   :  { %v3839_v36 = vld [vmem:[#allocation8 + $0xf8] sm:$0xff]   ;;  %v143_v44 = vpack.c.bf16 %v130_v43, %v129_v42  ;;  %v131_v45 = vld [vmem:[#allocation2 + $0x30] sm:$0xff]  ;;  %v133_v48 = vld [vmem:[#allocation2 + $0x40] sm:$0xff] }
  0x58   :  { %v3838_v38 = vld [vmem:[#allocation8 + $0x38] sm:$0xff]   ;;  %v134_v49 = vld [vmem:[#allocation2 + $0x48] sm:$0xff]  ;;  %v135_v51 = vld [vmem:[#allocation2 + $0x50] sm:$0xff] }
  0x59   :  { %370 = vmatpush1.bf16.msra.mxu0 %v3811_v15  ;;  %483 = vmatpush1.bf16.msra.mxu1 %v3812_v16  ;;  %v128_v40 = vld [vmem:[#allocation2 + $0x18] sm:$0xff]  ;;  %v145_v50 = vpack.c.bf16 %v134_v49, %v133_v48  ;;  %v137_v54 = vld [vmem:[#allocation2 + $0x60] sm:$0xff]  ;;  %v138_v55 = vld [vmem:[#allocation2 + $0x68] sm:$0xff] }
  0x5a   :  { %371 = vmatprep.subr.bf16.mxu0 %v3813_v17  ;;  %484 = vmatprep.subr.bf16.mxu1 %v3815_v18  ;;  %v142_v41 = vpack.c.bf16 %v128_v40, %v127_v39  ;;  %v132_v46 = vld [vmem:[#allocation2 + $0x38] sm:$0xff]  ;;  %v147_v56 = vpack.c.bf16 %v138_v55, %v137_v54  ;;  %v139_v57 = vld [vmem:[#allocation2 + $0x70] sm:$0xff]  ;;  %v3845_v2 = vld [vmem:[#allocation8 + $0x68] sm:$0xff]  }
  0x5b   :  { %v144_v47 = vpack.c.bf16 %v132_v46, %v131_v45  ;;  %v136_v52 = vld [vmem:[#allocation2 + $0x58] sm:$0xff]  ;;  %v3841_v61 = vld [vmem:[#allocation8 + $0x70] sm:$0xff]   ;;  %v3847_v3 = vld [vmem:[#allocation8 + $0xe8] sm:$0xff]  }
  0x5c   :  { %v146_v53 = vpack.c.bf16 %v136_v52, %v135_v51  ;;  %v140_v58 = vld [vmem:[#allocation2 + $0x78] sm:$0xff]  ;;  %v3843_v62 = vld [vmem:[#allocation8 + $0xf0] sm:$0xff]   ;;  %v3846_v4 = vld [vmem:[#allocation8 + $0x28] sm:$0xff]  }
  0x5d   :  { %372 = vmatpush1.bf16.msra.mxu0 %v3817_v19  ;;  %485 = vmatpush1.bf16.msra.mxu1 %v3818_v20  ;;  %v148_v59 = vpack.c.bf16 %v140_v58, %v139_v57  ;;  %v3840_v60 = vld [vmem:[#allocation8 + $0xb8] sm:$0xff]   ;;  %v3842_v63 = vld [vmem:[#allocation8 + $0x30] sm:$0xff]   ;;  %v3848_v5 = vld [vmem:[#allocation8 + $0xa8] sm:$0xff]  }
  0x5e   :  { %373 = vmatprep.subr.bf16.mxu0 %v3819_v21  ;;  %486 = vmatprep.subr.bf16.mxu1 %v3821_v22  ;;  %v3844_v1 = vld [vmem:[#allocation8 + $0xb0] sm:$0xff]   ;;  %v181_v9 = vld [vmem:[%s6743_s3] sm:$0xf] }
  0x61   :  { %374 = vmatpush1.bf16.msra.mxu0 %v3823_v23  ;;  %487 = vmatpush1.bf16.msra.mxu1 %v3824_v24 }
  0x62   :  { %375 = vmatprep.subr.bf16.mxu0 %v3825_v25  ;;  %488 = vmatprep.subr.bf16.mxu1 %v3827_v26 }
  0x65   :  { %376 = vmatpush1.bf16.msra.mxu0 %v3829_v27  ;;  %489 = vmatpush1.bf16.msra.mxu1 %v3830_v28 }
  0x66   :  { %377 = vmatprep.subr.bf16.mxu0 %v3831_v29  ;;  %490 = vmatprep.subr.bf16.mxu1 %v3833_v30 }
  0x69   :  { %378 = vmatpush1.bf16.msra.mxu0 %v3835_v31  ;;  %491 = vmatpush1.bf16.msra.mxu1 %v3836_v32 }
  0x6a   :  { %3550 = vmatprep.subr.bf16.mxu0 %v3837_v35  ;;  %3614 = vmatprep.subr.bf16.mxu1 %v3839_v36 }
  0x6c   :  { %396 = vmatmul.mubr.bf16.vlgmr.msra.gmra.mxu0 %v141_v37  ;;  %509 = vmatmul.mubr.bf16.vlgmr.msra.gmra.mxu1 %v141_v37 }
  0x6d   :  { %405 = vmatprep.mubr.bf16.mxu0 %v4335_v0  ;;  %518 = vmatprep.mubr.bf16.mxu1 %v4335_v0 }
  0x6e   :  { %3551 = vmatpush3.bf16.msra.mxu0 %v3838_v38  ;;  %3615 = vmatpush3.bf16.msra.mxu1 %v3840_v60 }
  0x6f   :  { %3552 = vmatprep.subr.bf16.mxu0 %v3841_v61  ;;  %3616 = vmatprep.subr.bf16.mxu1 %v3843_v62 }
  0x72   :  { %3553 = vmatpush3.bf16.msra.mxu0 %v3842_v63  ;;  %3617 = vmatpush3.bf16.msra.mxu1 %v3844_v1 }
  0x73   :  { %3554 = vmatprep.subr.bf16.mxu0 %v3845_v2  ;;  %3618 = vmatprep.subr.bf16.mxu1 %v3847_v3  ;;  %v3851_v2 = vld [vmem:[#allocation8 + $0xe0] sm:$0xff]  }
  0x74   :  { %406 = vmatmul.mubr.bf16.gmra.mxu0 %v142_v41  ;;  %519 = vmatmul.mubr.bf16.gmra.mxu1 %v142_v41 }
  0x75   :  { %415 = vmatprep.mubr.bf16.mxu0 %v4335_v0  ;;  %528 = vmatprep.mubr.bf16.mxu1 %v4335_v0 }
  0x76   :  { %3555 = vmatpush3.bf16.msra.mxu0 %v3846_v4  ;;  %3619 = vmatpush3.bf16.msra.mxu1 %v3848_v5 }
  0x77   :  { %3620 = vmatprep.subr.bf16.mxu1 %v3851_v2 }
  0x7c   :  { %416 = vmatmul.mubr.bf16.gmra.mxu0 %v143_v44  ;;  %529 = vmatmul.mubr.bf16.gmra.mxu1 %v143_v44 }
  0x7d   :  { %425 = vmatprep.mubr.bf16.mxu0 %v4335_v0  ;;  %538 = vmatprep.mubr.bf16.mxu1 %v4335_v0 }
  0x84   :  { %426 = vmatmul.mubr.bf16.gmra.mxu0 %v144_v47  ;;  %539 = vmatmul.mubr.bf16.gmra.mxu1 %v144_v47 }
  0x85   :  { %435 = vmatprep.mubr.bf16.mxu0 %v4335_v0  ;;  %548 = vmatprep.mubr.bf16.mxu1 %v4335_v0 }
  0x8c   :  { %436 = vmatmul.mubr.bf16.gmra.mxu0 %v145_v50  ;;  %549 = vmatmul.mubr.bf16.gmra.mxu1 %v145_v50 }
  0x8d   :  { %445 = vmatprep.mubr.bf16.mxu0 %v4335_v0  ;;  %558 = vmatprep.mubr.bf16.mxu1 %v4335_v0 }
  0x94   :  { %446 = vmatmul.mubr.bf16.gmra.mxu0 %v146_v53  ;;  %559 = vmatmul.mubr.bf16.gmra.mxu1 %v146_v53  ;;  %v3849_v53 = vld [vmem:[#allocation8 + $0x60] sm:$0xff]  }
  0x95   :  { %455 = vmatprep.mubr.bf16.mxu0 %v4335_v0  ;;  %568 = vmatprep.mubr.bf16.mxu1 %v4335_v0 }
  0x96   :  { %3556 = vmatprep.subr.bf16.mxu0 %v3849_v53 }
  0x9c   :  { %456 = vmatmul.mubr.bf16.gmra.mxu0 %v147_v56  ;;  %569 = vmatmul.mubr.bf16.gmra.mxu1 %v147_v56 }
  0x9d   :  { %465 = vmatprep.mubr.bf16.mxu0 %v4335_v0  ;;  %578 = vmatprep.mubr.bf16.mxu1 %v4335_v0  ;;  %v183_v0 = vlaneseq }
  0x9f   :  { %v184_v6 = vshrl.u32 %v183_v0, 7 }
  0xa1   :  { %v185_v7 = vsub.s32 0, %v184_v6  ;;  %v193_v8 = vsub.s32 2, %v184_v6  ;;  %v189_v12 = vsub.s32 1, %v184_v6  ;;  %v197_v13 = vsub.s32 3, %v184_v6  ;;  %v3850_v6 = vld [vmem:[#allocation8 + $0x20] sm:$0xff]  }
  0xa2   :  { %3557 = vmatpush3.bf16.msra.mxu0 %v3850_v6 }
  0xa3   :  { %v4455_v10 = vrot.slane %v181_v9, %v185_v7  ;;  %v4457_v11 = vrot.slane %v181_v9, %v193_v8  ;;  %v4465_v18 = vrot.slane %v181_v9, %v189_v12  ;;  %v4467_v20 = vrot.slane %v181_v9, %v197_v13 }
  0xa4   :  { %466 = vmatmul.mubr.bf16.gmra.mxu0 %v148_v59  ;;  %579 = vmatmul.mubr.bf16.gmra.mxu1 %v148_v59 }
 0x12c   :  { %v397_v14 = vpop.f32.mrf.mxu0  ;;  %v510_v15 = vpop.f32.mrf.mxu1 }
 0x12d   :  { %v4460_v16 = vadd.f32 %v397_v14, %v4455_v10  ;;  %v4463_v17 = vadd.f32 %v510_v15, %v4457_v11 }
 0x12e   :  { %v399_v19 = vpop.f32.mrf.mxu0  ;;  %v512_v21 = vpop.f32.mrf.mxu1 }
 0x12f   :  { %v4470_v22 = vmul.f32 0.70710677, %v4460_v16  ;;  %v4473_v23 = vmul.f32 0.70710677, %v4463_v17  ;;  %v4476_v24 = vadd.f32 %v399_v19, %v4465_v18  ;;  %v4479_v25 = vadd.f32 %v512_v21, %v4467_v20 }
 0x130   :  { %v401_v29 = vpop.f32.mrf.mxu0  ;;  %v514_v31 = vpop.f32.mrf.mxu1 }
 0x131   :  { %v4482_v26 = vand.u32 2147483647, %v4470_v22  ;;  %v4485_v27 = vand.u32 2147483647, %v4473_v23  ;;  %v4488_v28 = vmul.f32 0.70710677, %v4476_v24  ;;  %v4499_v35 = vadd.f32 %v401_v29, %v4455_v10 }
 0x132   :  { %v4491_v30 = vmul.f32 0.70710677, %v4479_v25  ;;  %v4502_v36 = vadd.f32 %v514_v31, %v4457_v11  ;;  %v403_v37 = vpop.f32.mrf.mxu0  ;;  %v516_v47 = vpop.f32.mrf.mxu1  ;;  %vm717_vm0 = vcmp.ge.f32.partialorder %v4470_v22, 0.0  ;;  %vm719_vm1 = vcmp.ge.f32.partialorder %v4473_v23, 0.0 }
 0x133   :  { %v909_v32 = vmul.f32 0.3275911, %v4482_v26  ;;  %v911_v33 = vmul.f32 0.3275911, %v4485_v27  ;;  %v4496_v34 = vand.u32 2147483647, %v4488_v28  ;;  %v4514_v42 = vadd.f32 %v403_v37, %v4465_v18 }
 0x134   :  { %v4505_v38 = vand.u32 2147483647, %v4491_v30  ;;  %v4508_v39 = vmul.f32 0.70710677, %v4499_v35  ;;  %v4511_v41 = vmul.f32 0.70710677, %v4502_v36  ;;  %v4529_v52 = vadd.f32 %v516_v47, %v4467_v20  ;;  %v407_v56 = vpop.f32.mrf.mxu0 }
 0x135   :  { %v973_v40 = vadd.f32 1.0, %v909_v32  ;;  %v975_v43 = vadd.f32 1.0, %v911_v33  ;;  %v910_v44 = vmul.f32 0.3275911, %v4496_v34  ;;  %v4526_v50 = vmul.f32 0.70710677, %v4514_v42 }
 0x136   :  { %v4518_v45 = vand.u32 2147483647, %v4508_v39  ;;  %v912_v46 = vmul.f32 0.3275911, %v4505_v38  ;;  %v4522_v48 = vand.u32 2147483647, %v4511_v41  ;;  %v4539_v60 = vadd.f32 %v407_v56, %v4455_v10 }
 0x137   :  { %3885 = vrcp.f32 %v973_v40  ;;  %v974_v51 = vadd.f32 1.0, %v910_v44  ;;  %v4533_v58 = vand.u32 2147483647, %v4526_v50  ;;  %v4536_v59 = vmul.f32 0.70710677, %v4529_v52 }
 0x138   :  { %v913_v49 = vmul.f32 0.3275911, %v4518_v45  ;;  %3887 = vrcp.f32 %v975_v43  ;;  %v976_v54 = vadd.f32 1.0, %v912_v46  ;;  %v915_v55 = vmul.f32 0.3275911, %v4522_v48  ;;  %v3852_v43 = vld [vmem:[#allocation8 + $0xa0] sm:$0xff]  }
 0x139   :  { %3889 = vrcp.f32 %v974_v51  ;;  %v914_v62 = vmul.f32 0.3275911, %v4533_v58  ;;  %v4543_v63 = vand.u32 2147483647, %v4536_v59  ;;  %v4546_v1 = vmul.f32 0.70710677, %v4539_v60  ;;  %3621 = vmatpush3.bf16.msra.mxu1 %v3852_v43 }
 0x13a   :  { %v977_v57 = vadd.f32 1.0, %v913_v49  ;;  %3891 = vrcp.f32 %v976_v54  ;;  %v979_v61 = vadd.f32 1.0, %v915_v55  ;;  %v1741_v8 = vsub.f32 0.0, %v4482_v26  ;;  %v520_v55 = vpop.f32.mrf.mxu1 }
 0x13b   :  { %v978_v3 = vadd.f32 1.0, %v914_v62  ;;  %v916_v0 = vmul.f32 0.3275911, %v4543_v63  ;;  %v4552_v5 = vand.u32 2147483647, %v4546_v1  ;;  %v1743_v12 = vsub.f32 0.0, %v4485_v27 }
 0x13c   :  { %3893 = vrcp.f32 %v977_v57  ;;  %v1805_v29 = vmul.f32 %v1741_v8, %v4482_v26  ;;  %v1742_v31 = vsub.f32 0.0, %v4496_v34  ;;  %v4570_v32 = vmul.f32 0.5, %v4460_v16 }
 0x13d   :  { %3895 = vrcp.f32 %v979_v61  ;;  %v980_v14 = vadd.f32 1.0, %v916_v0  ;;  %v917_v15 = vmul.f32 0.3275911, %v4552_v5  ;;  %v4573_v37 = vmul.f32 0.5, %v4463_v17 }
 0x13e   :  { %3897 = vrcp.f32 %v978_v3  ;;  %v1807_v40 = vmul.f32 %v1743_v12, %v4485_v27  ;;  %v6753_v23 = vmov -1.0   ;;  %v4586_v17 = vmul.f32 0.5, %v4476_v24 }
 0x13f   :  { %3899 = vrcp.f32 %v980_v14  ;;  %v981_v26 = vadd.f32 1.0, %v917_v15  ;;  %v4580_v47 = vsel %vm717_vm0, 1.0, %v6753_v23  ;;  %v4583_v16 = vsel %vm719_vm1, 1.0, %v6753_v23 }
 0x140   :  { %v1869_v51 = vmul.f32 1.442695, %v1805_v29  ;;  %vm718_vm2 = vcmp.ge.f32.partialorder %v4488_v28, 0.0  ;;  %v1806_v53 = vmul.f32 %v1742_v31, %v4496_v34  ;;  %v1744_v54 = vsub.f32 0.0, %v4505_v38 }
 0x141   :  { %v1873_v57 = vmul.f32 1.442695, %v1807_v40  ;;  %v4596_v61 = vmul.f32 0.5, %v4479_v25  ;;  %vm720_vm3 = vcmp.ge.f32.partialorder %v4491_v30, 0.0  ;;  %3901 = vrcp.f32 %v981_v26 }
 0x142   :  { %v4602_v28 = vsel %vm718_vm2, 1.0, %v6753_v23  ;;  %v4606_v0 = vadd.f32 %v520_v55, %v4457_v11  ;;  %3903 = vpow2.f32 %v1869_v51  ;;  %v1871_v25 = vmul.f32 1.442695, %v1806_v53 }
 0x143   :  { %v1808_v6 = vmul.f32 %v1744_v54, %v4505_v38  ;;  %v1745_v8 = vsub.f32 0.0, %v4518_v45  ;;  %3905 = vpow2.f32 %v1873_v57  ;;  %v4611_v30 = vsel %vm720_vm3, 1.0, %v6753_v23 }
 0x144   :  { %v4548_v4 = vpop.eup %3885  ;;  %v4617_v29 = vmul.f32 0.5, %v4499_v35  ;;  %v4620_v31 = vmul.f32 0.5, %v4502_v36  ;;  %vm721_vm4 = vcmp.ge.f32.partialorder %v4508_v39, 0.0  ;;  %v4625_v40 = vmul.f32 0.70710677, %v4606_v0 }
 0x145   :  { %v4554_v7 = vpop.eup %3887  ;;  %v1165_v9 = vmul.f32 1.0614054, %v4548_v4  ;;  %3907 = vpow2.f32 %v1871_v25  ;;  %v1875_v43 = vmul.f32 1.442695, %v1808_v6  ;;  %vm723_vm5 = vcmp.ge.f32.partialorder %v4511_v41, 0.0 }
 0x146   :  { %v1167_v13 = vmul.f32 1.0614054, %v4554_v7  ;;  %v4561_v19 = vpop.eup %3889  ;;  %v4635_v51 = vsel %vm721_vm4, 1.0, %v6753_v23  ;;  %v4638_v53 = vmul.f32 0.5, %v4514_v42  ;;  %vm722_vm6 = vcmp.ge.f32.partialorder %v4526_v50, 0.0  ;;  %v409_v42 = vpop.f32.mrf.mxu0 }
 0x147   :  { %v4563_v21 = vpop.eup %3891  ;;  %v1229_v33 = vadd.f32 -1.4531521, %v1165_v9  ;;  %v1166_v22 = vmul.f32 1.0614054, %v4561_v19  ;;  %v4645_v41 = vand.u32 2147483647, %v4625_v40  ;;  %3909 = vpow2.f32 %v1875_v43 }
 0x148   :  { %v1231_v46 = vadd.f32 -1.4531521, %v1167_v13  ;;  %v1168_v27 = vmul.f32 1.0614054, %v4563_v21  ;;  %6769 = vst [vmem:[#allocation19_spill] sm:$0xff] %v4638_v53  ;;  %v4648_v57 = vsel %vm723_vm5, 1.0, %v6753_v23 }
 0x149   :  { %v4576_v44 = vpop.eup %3893  ;;  %v1293_v56 = vmul.f32 %v4548_v4, %v1229_v33  ;;  %v1230_v2 = vadd.f32 -1.4531521, %v1166_v22  ;;  %v1747_v22 = vsub.f32 0.0, %v4522_v48  ;;  %v4654_v50 = vsel %vm722_vm6, 1.0, %v6753_v23 }
 0x14a   :  { %v4589_v49 = vpop.eup %3895  ;;  %v1169_v24 = vmul.f32 1.0614054, %v4576_v44  ;;  %v1295_v62 = vmul.f32 %v4554_v7, %v1231_v46  ;;  %v1232_v34 = vadd.f32 -1.4531521, %v1168_v27  ;;  %v1809_v46 = vmul.f32 %v1745_v8, %v4518_v45 }
 0x14b   :  { %v1171_v3 = vmul.f32 1.0614054, %v4589_v49  ;;  %v1357_v9 = vadd.f32 1.4214138, %v1293_v56  ;;  %v4613_v13 = vpop.eup %3897  ;;  %v1294_v15 = vmul.f32 %v4561_v19, %v1230_v2  ;;  %v4666_v43 = vmul.f32 0.5, %v4529_v52 }
 0x14c   :  { %v1233_v12 = vadd.f32 -1.4531521, %v1169_v24  ;;  %v1359_v14 = vadd.f32 1.4214138, %v1295_v62  ;;  %v1296_v38 = vmul.f32 %v4563_v21, %v1232_v34  ;;  %v1170_v36 = vmul.f32 1.0614054, %v4613_v13  ;;  %v4640_v45 = vpop.eup %3899 }
 0x14d   :  { %v1235_v33 = vadd.f32 -1.4531521, %v1171_v3  ;;  %v1421_v35 = vmul.f32 %v4548_v4, %v1357_v9  ;;  %v1358_v27 = vadd.f32 1.4214138, %v1294_v15  ;;  %v1877_v56 = vmul.f32 1.442695, %v1809_v46 }
 0x14e   :  { %v1297_v26 = vmul.f32 %v4576_v44, %v1233_v12  ;;  %v1423_v39 = vmul.f32 %v4554_v7, %v1359_v14  ;;  %v1360_v54 = vadd.f32 1.4214138, %v1296_v38  ;;  %v1811_v24 = vmul.f32 %v1747_v22, %v4522_v48  ;;  %v4657_v9 = vpop.eup %3901  ;;  %6770 = vst [vmem:[#allocation20_spill] sm:$0xff] %v4666_v43  ;;  %v411_v43 = vpop.f32.mrf.mxu0 }
 0x14f   :  { %v1299_v55 = vmul.f32 %v4589_v49, %v1235_v33  ;;  %v1746_v62 = vsub.f32 0.0, %v4533_v58  ;;  %v1485_v2 = vadd.f32 -0.28449672, %v1421_v35  ;;  %v1234_v3 = vadd.f32 -1.4531521, %v1170_v36  ;;  %v4668_v46 = vpop.eup %3903  ;;  %v522_v36 = vpop.f32.mrf.mxu1 }
 0x150   :  { %v1361_v34 = vadd.f32 1.4214138, %v1297_v26  ;;  %v1487_v25 = vadd.f32 -0.28449672, %v1423_v39  ;;  %v1422_v6 = vmul.f32 %v4561_v19, %v1358_v27  ;;  %v1172_v8 = vmul.f32 1.0614054, %v4640_v45  ;;  %v3906_v39 = vpop.eup %3905 }
 0x151   :  { %v1424_v12 = vmul.f32 %v4563_v21, %v1360_v54  ;;  %v1363_v48 = vadd.f32 1.4214138, %v1299_v55  ;;  %v919_v14 = vmul.f32 0.3275911, %v4645_v41  ;;  %v4662_v15 = vadd.f32 %v409_v42, %v4465_v18 }
 0x152   :  { %3911 = vpow2.f32 %v1877_v56  ;;  %v1881_v38 = vmul.f32 1.442695, %v1811_v24  ;;  %v1810_v33 = vmul.f32 %v1746_v62, %v4533_v58  ;;  %v1549_v22 = vmul.f32 %v4548_v4, %v1485_v2 }
 0x153   :  { %v1425_v35 = vmul.f32 %v4576_v44, %v1361_v34  ;;  %v1298_v26 = vmul.f32 %v4613_v13, %v1234_v3  ;;  %vm724_vm7 = vcmp.ge.f32.partialorder %v4536_v59, 0.0  ;;  %v1551_v27 = vmul.f32 %v4554_v7, %v1487_v25  ;;  %v4687_v3 = vpop.eup %3907 }
 0x154   :  { %v1486_v54 = vadd.f32 -0.28449672, %v1422_v6  ;;  %v1236_v55 = vadd.f32 -1.4531521, %v1172_v8  ;;  %v1173_v58 = vmul.f32 1.0614054, %v4657_v9  ;;  %v1427_v56 = vmul.f32 %v4589_v49, %v1363_v48 }
 0x155   :  { %v1488_v52 = vadd.f32 -0.28449672, %v1424_v12  ;;  %v983_v24 = vadd.f32 1.0, %v919_v14  ;;  %v4678_v62 = vmul.f32 0.70710677, %v4662_v15  ;;  %v4681_v2 = vsel %vm724_vm7, 1.0, %v6753_v23 }
 0x156   :  { %v1879_v42 = vmul.f32 1.442695, %v1810_v33  ;;  %6771 = vst [vmem:[#allocation21_spill] sm:$0xff] %v4681_v2  ;;  %v1748_v59 = vsub.f32 0.0, %v4543_v63  ;;  %v4685_v34 = vadd.f32 %v522_v36, %v4467_v20  ;;  %v1613_v25 = vadd.f32 0.2548296, %v1549_v22 }
 0x157   :  { %v1489_v6 = vadd.f32 -0.28449672, %v1425_v35  ;;  %3913 = vpow2.f32 %v1881_v38  ;;  %v1362_v8 = vadd.f32 1.4214138, %v1298_v26  ;;  %v1615_v12 = vadd.f32 0.2548296, %v1551_v27 }
 0x158   :  { %6772 = vst [vmem:[#allocation22_spill] sm:$0xff] %v4685_v34  ;;  %v1550_v48 = vmul.f32 %v4561_v19, %v1486_v54  ;;  %v1300_v14 = vmul.f32 %v4640_v45, %v1236_v55  ;;  %v1237_v33 = vadd.f32 -1.4531521, %v1173_v58  ;;  %v1552_v23 = vmul.f32 %v4563_v21, %v1488_v52  ;;  %v3910_v55 = vpop.eup %3909 }
 0x159   :  { %v1491_v53 = vadd.f32 -0.28449672, %v1427_v56  ;;  %3915 = vrcp.f32 %v983_v24  ;;  %v4693_v36 = vand.u32 2147483647, %v4678_v62  ;;  %v1812_v2 = vmul.f32 %v1748_v59, %v4543_v63  ;;  %v524_v56 = vpop.f32.mrf.mxu1 }
 0x15a   :  { %v4697_v22 = vmul.f32 0.5, %v4539_v60  ;;  %vm725_vm8 = vcmp.ge.f32.partialorder %v4546_v1, 0.0  ;;  %v4701_v38 = vmul.f32 0.70710677, %v4685_v34  ;;  %v1553_v35 = vmul.f32 %v4576_v44, %v1489_v6 }
 0x15b   :  { %v1426_v26 = vmul.f32 %v4613_v13, %v1362_v8  ;;  %v1749_v27 = vsub.f32 0.0, %v4552_v5  ;;  %v4707_v54 = vadd.f32 %v411_v43, %v4455_v10  ;;  %v1677_v63 = vmul.f32 %v4548_v4, %v1613_v25  ;;  %v3853_v25 = vld [vmem:[#allocation8 + $0x58] sm:$0xff]  }
 0x15c   :  { %6773 = vst [vmem:[#allocation23_spill] sm:$0xff] %v4697_v22  ;;  %6774 = vst [vmem:[#allocation24_spill] sm:$0xff] %v4701_v38  ;;  %v1679_v60 = vmul.f32 %v4554_v7, %v1615_v12  ;;  %v1364_v58 = vadd.f32 1.4214138, %v1300_v14  ;;  %v1301_v52 = vmul.f32 %v4657_v9, %v1237_v33  ;;  %v1614_v24 = vadd.f32 0.2548296, %v1550_v48  ;;  %3558 = vmatprep.subr.bf16.mxu0 %v3853_v25 }
 0x15d   :  { %6775 = vst [vmem:[#allocation25_spill] sm:$0xff] %v4707_v54  ;;  %v1616_v59 = vadd.f32 0.2548296, %v1552_v23  ;;  %v1555_v6 = vmul.f32 %v4589_v49, %v1491_v53  ;;  %v918_v8 = vmul.f32 0.3275911, %v4693_v36  ;;  %3917 = vpow2.f32 %v1879_v42 }
 0x15e   :  { %v6776_v22 = vmov -1.0   ;;  %v4720_v4 = vand.u32 2147483647, %v4701_v38  ;;  %v4723_v7 = vmul.f32 0.70710677, %v4707_v54  ;;  %v1813_v53 = vmul.f32 %v1749_v27, %v4552_v5 }
 0x15f   :  { %v4717_v43 = vsel %vm725_vm8, 1.0, %v6776_v22  ;;  %v3912_v12 = vpop.eup %3911  ;;  %v1617_v48 = vadd.f32 0.2548296, %v1553_v35  ;;  %v1490_v23 = vadd.f32 -0.28449672, %v1426_v26  ;;  %v4727_v14 = vadd.f32 %v524_v56, %v4457_v11  ;;  %v413_v26 = vpop.f32.mrf.mxu0 }
 0x160   :  { %6777 = vst [vmem:[#allocation26_spill] sm:$0xff] %v4717_v43  ;;  %v1428_v42 = vmul.f32 %v4640_v45, %v1364_v58  ;;  %v1883_v1 = vmul.f32 1.442695, %v1812_v2  ;;  %v1365_v33 = vadd.f32 1.4214138, %v1301_v52  ;;  %v4731_v43 = vmul.f32 0.5, %v4606_v0 }
 0x161   :  { %v1997_v54 = vmul.f32 %v4668_v46, %v1677_v63  ;;  %v1999_v38 = vmul.f32 %v3906_v39, %v1679_v60  ;;  %v1678_v34 = vmul.f32 %v4561_v19, %v1614_v24  ;;  %v1619_v35 = vadd.f32 0.2548296, %v1555_v6  ;;  %v526_v6 = vpop.f32.mrf.mxu1 }
 0x162   :  { %v1680_v5 = vmul.f32 %v4563_v21, %v1616_v59  ;;  %v982_v27 = vadd.f32 1.0, %v918_v8  ;;  %v920_v56 = vmul.f32 0.3275911, %v4720_v4  ;;  %v4738_v58 = vand.u32 2147483647, %v4723_v7 }
 0x163   :  { %v1681_v2 = vmul.f32 %v4576_v44, %v1617_v48  ;;  %v1554_v0 = vmul.f32 %v4613_v13, %v1490_v23  ;;  %v1885_v52 = vmul.f32 1.442695, %v1813_v53  ;;  %v4743_v46 = vmul.f32 0.70710677, %v4727_v14 }
 0x164   :  { %v3914_v39 = vpop.eup %3913  ;;  %v1492_v19 = vadd.f32 -0.28449672, %v1428_v42  ;;  %3919 = vpow2.f32 %v1883_v1  ;;  %v1429_v63 = vmul.f32 %v4657_v9, %v1365_v33  ;;  %v4747_v21 = vadd.f32 %v413_v26, %v4465_v18  ;;  %v3855_v26 = vld [vmem:[#allocation8 + $0xd8] sm:$0xff]  }
 0x165   :  { %v2061_v60 = vsub.f32 1.0, %v1997_v54  ;;  %v2063_v24 = vsub.f32 1.0, %v1999_v38  ;;  %v1998_v59 = vmul.f32 %v4687_v3, %v1678_v34  ;;  %v1683_v44 = vmul.f32 %v4589_v49, %v1619_v35  ;;  %v417_v35 = vpop.f32.mrf.mxu0  ;;  %3622 = vmatprep.subr.bf16.mxu1 %v3855_v26 }
 0x166   :  { %v4751_v8 = vpop.eup %3915  ;;  %v2000_v25 = vmul.f32 %v3910_v55, %v1680_v5  ;;  %vm727_vm9 = vcmp.ge.f32.partialorder %v4625_v40, 0.0  ;;  %3921 = vrcp.f32 %v982_v27  ;;  %v984_v48 = vadd.f32 1.0, %v920_v56 }
 0x167   :  { %v921_v23 = vmul.f32 0.3275911, %v4738_v58  ;;  %v2001_v53 = vmul.f32 %v3912_v12, %v1681_v2  ;;  %v1618_v42 = vadd.f32 0.2548296, %v1554_v0  ;;  %3923 = vpow2.f32 %v1885_v52 }
 0x168   :  { %v4756_v54 = vand.u32 2147483647, %v4743_v46  ;;  %v1556_v34 = vmul.f32 %v4640_v45, %v1492_v19  ;;  %v1493_v3 = vadd.f32 -0.28449672, %v1429_v63  ;;  %v4760_v49 = vmul.f32 0.70710677, %v4747_v21 }
 0x169   :  { %v4763_v38 = vadd.f32 %v526_v6, %v4467_v20  ;;  %v2125_v55 = vmul.f32 %v2061_v60, %v4580_v47  ;;  %v2062_v1 = vsub.f32 1.0, %v1998_v59  ;;  %v2003_v33 = vmul.f32 %v3914_v39, %v1683_v44 }
 0x16a   :  { %v1175_v12 = vmul.f32 1.0614054, %v4751_v8  ;;  %v2127_v5 = vmul.f32 %v2063_v24, %v4583_v16  ;;  %v2064_v27 = vsub.f32 1.0, %v2000_v25  ;;  %3925 = vrcp.f32 %v984_v48  ;;  %v3918_v2 = vpop.eup %3917  ;;  %v3854_v24 = vld [vmem:[#allocation8 + $0x18] sm:$0xff]  }
 0x16b   :  { %v985_v56 = vadd.f32 1.0, %v921_v23  ;;  %v1682_v0 = vmul.f32 %v4613_v13, %v1618_v42  ;;  %v923_v52 = vmul.f32 0.3275911, %v4756_v54  ;;  %v4771_v19 = vand.u32 2147483647, %v4760_v49  ;;  %3559 = vmatpush3.bf16.msra.mxu0 %v3854_v24 }
 0x16c   :  { %v4774_v47 = vmul.f32 0.70710677, %v4763_v38  ;;  %v2065_v39 = vsub.f32 1.0, %v2001_v53  ;;  %v1620_v63 = vadd.f32 0.2548296, %v1556_v34  ;;  %v1557_v60 = vmul.f32 %v4657_v9, %v1493_v3 }
 0x16d   :  { %v4778_v16 = vadd.f32 %v417_v35, %v4455_v10  ;;  %v2189_v59 = vadd.f32 1.0, %v2125_v55  ;;  %v2126_v13 = vmul.f32 %v2062_v1, %v4602_v28  ;;  %v2067_v44 = vsub.f32 1.0, %v2003_v33 }
 0x16e   :  { %v1239_v6 = vadd.f32 -1.4531521, %v1175_v12  ;;  %v2191_v25 = vadd.f32 1.0, %v2127_v5  ;;  %v2128_v48 = vmul.f32 %v2064_v27, %v4611_v30  ;;  %v1751_v23 = vsub.f32 0.0, %v4645_v41 }
 0x16f   :  { %3927 = vrcp.f32 %v985_v56  ;;  %v2002_v53 = vmul.f32 %v3918_v2, %v1682_v0  ;;  %v987_v42 = vadd.f32 1.0, %v923_v52  ;;  %v922_v34 = vmul.f32 0.3275911, %v4771_v19  ;;  %v530_v2 = vpop.f32.mrf.mxu1 }
 0x170   :  { %v4785_v3 = vand.u32 2147483647, %v4774_v47  ;;  %v2129_v55 = vmul.f32 %v2065_v39, %v4635_v51  ;;  %v1684_v28 = vmul.f32 %v4640_v45, %v1620_v63  ;;  %v1621_v1 = vadd.f32 0.2548296, %v1557_v60 }
 0x171   :  { %v4790_v33 = vmul.f32 0.70710677, %v4778_v16  ;;  %v3920_v30 = vpop.eup %3919  ;;  %v2190_v12 = vadd.f32 1.0, %v2126_v13  ;;  %v2131_v35 = vmul.f32 %v2067_v44, %v4648_v57  ;;  %v4796_v26 = vsel %vm727_vm9, 1.0, %v6776_v22 }
 0x172   :  { %v1303_v5 = vmul.f32 %v4751_v8, %v1239_v6  ;;  %v4800_v27 = vmul.f32 %v2189_v59, %v4570_v32  ;;  %v4803_v51 = vmul.f32 %v2191_v25, %v4573_v37  ;;  %v2192_v45 = vadd.f32 1.0, %v2128_v48  ;;  %v3856_v37 = vld [vmem:[#allocation8 + $0x98] sm:$0xff]  }
 0x173   :  { %v1815_v56 = vmul.f32 %v1751_v23, %v4645_v41  ;;  %v4806_v0 = vpop.eup %3921  ;;  %v2066_v57 = vsub.f32 1.0, %v2002_v53  ;;  %3929 = vrcp.f32 %v987_v42  ;;  %v986_v52 = vadd.f32 1.0, %v922_v34  ;;  %3623 = vmatpush3.bf16.msra.mxu1 %v3856_v37 }
 0x174   :  { %6778 = vst [vmem:[#allocation27_spill] sm:$0xff] %v4800_v27  ;;  %6779 = vst [vmem:[#allocation28_spill] sm:$0xff] %v4803_v51  ;;  %v924_v40 = vmul.f32 0.3275911, %v4785_v3  ;;  %v3924_v39 = vpop.eup %3923  ;;  %v2193_v63 = vadd.f32 1.0, %v2129_v55  ;;  %v2004_v60 = vmul.f32 %v3920_v30, %v1684_v28  ;;  %v1685_v32 = vmul.f32 %v4657_v9, %v1621_v1 }
 0x175   :  { %v4811_v24 = vand.u32 2147483647, %v4790_v33  ;;  %v4814_v59 = vmul.f32 %v2190_v12, %v4586_v17  ;;  %v2195_v41 = vadd.f32 1.0, %v2131_v35  ;;  %v1367_v13 = vadd.f32 1.4214138, %v1303_v5 }
 0x176   :  { %v4817_v44 = vadd.f32 %v530_v2, %v4457_v11  ;;  %v4820_v6 = vmul.f32 %v2192_v45, %v4596_v61  ;;  %v1889_v25 = vmul.f32 1.442695, %v1815_v56  ;;  %vm726_vm10 = vcmp.ge.f32.partialorder %v4678_v62, 0.0  ;;  %v6784_v2 = vld [vmem:[#allocation21_spill] sm:$0xff] }
 0x177   :  { %6780 = vst [vmem:[#allocation29_spill] sm:$0xff] %v4814_v59  ;;  %v1174_v9 = vmul.f32 1.0614054, %v4806_v0  ;;  %v4824_v48 = vpop.eup %3925  ;;  %v2130_v23 = vmul.f32 %v2066_v57, %v4654_v50  ;;  %v1750_v17 = vsub.f32 0.0, %v4693_v36  ;;  %3931 = vrcp.f32 %v986_v52 }
 0x178   :  { %6781 = vst [vmem:[#allocation30_spill] sm:$0xff] %v4820_v6  ;;  %v988_v53 = vadd.f32 1.0, %v924_v40  ;;  %v4829_v42 = vmul.f32 %v2193_v63, %v4617_v29  ;;  %v2068_v34 = vsub.f32 1.0, %v2004_v60  ;;  %v2005_v61 = vmul.f32 %v3924_v39, %v1685_v32  ;;  %v419_v40 = vpop.f32.mrf.mxu0  ;;  %v6785_v60 = vld [vmem:[#allocation22_spill] sm:$0xff] }
 0x179   :  { %v925_v55 = vmul.f32 0.3275911, %v4811_v24  ;;  %v4833_v28 = vmul.f32 %v2195_v41, %v4620_v31  ;;  %v1431_v1 = vmul.f32 %v4751_v8, %v1367_v13  ;;  %v4837_v30 = vmul.f32 0.5, %v4662_v15  ;;  %v6786_v41 = vld [vmem:[#allocation24_spill] sm:$0xff] }
 0x17a   :  { %6782 = vst [vmem:[#allocation31_spill] sm:$0xff] %v4829_v42  ;;  %v4840_v50 = vmul.f32 0.70710677, %v4817_v44  ;;  %3933 = vpow2.f32 %v1889_v25  ;;  %v4845_v29 = vsel %vm726_vm10, 1.0, %v6776_v22  ;;  %v1238_v12 = vadd.f32 -1.4531521, %v1174_v9 }
 0x17b   :  { %6783 = vst [vmem:[#allocation32_spill] sm:$0xff] %v4833_v28  ;;  %v1176_v35 = vmul.f32 1.0614054, %v4824_v48  ;;  %v2194_v31 = vadd.f32 1.0, %v2130_v23  ;;  %v1814_v45 = vmul.f32 %v1750_v17, %v4693_v36  ;;  %v1752_v15 = vsub.f32 0.0, %v4720_v4  ;;  %v6787_v9 = vld [vmem:[#allocation19_spill] sm:$0xff] }
 0x17c   :  { %v4848_v5 = vpop.eup %3927  ;;  %3935 = vrcp.f32 %v988_v53  ;;  %v2132_v57 = vmul.f32 %v2068_v34, %v6784_v2  ;;  %v2069_v52 = vsub.f32 1.0, %v2005_v61  ;;  %v989_v62 = vadd.f32 1.0, %v925_v55 }
 0x17d   :  { %v1495_v63 = vadd.f32 -0.28449672, %v1431_v1  ;;  %v4858_v32 = vmul.f32 0.5, %v6785_v60  ;;  %v4861_v36 = vand.u32 2147483647, %v4840_v50  ;;  %v1302_v37 = vmul.f32 %v4806_v0, %v1238_v12  ;;  %v6789_v1 = vld [vmem:[#allocation26_spill] sm:$0xff] }
 0x17e   :  { %vm728_vm11 = vcmp.ge.f32.partialorder %v6786_v41, 0.0  ;;  %v1240_v13 = vadd.f32 -1.4531521, %v1176_v35  ;;  %v1177_v25 = vmul.f32 1.0614054, %v4848_v5  ;;  %v4867_v23 = vmul.f32 %v2194_v31, %v6787_v9  ;;  %v6790_v31 = vld [vmem:[#allocation25_spill] sm:$0xff] }
 0x17f   :  { %v1887_v17 = vmul.f32 1.442695, %v1814_v45  ;;  %v1816_v53 = vmul.f32 %v1752_v15, %v4720_v4  ;;  %v4871_v34 = vadd.f32 %v419_v40, %v4465_v18  ;;  %v2196_v55 = vadd.f32 1.0, %v2132_v57  ;;  %v6791_v9 = vld [vmem:[#allocation20_spill] sm:$0xff] }
 0x180   :  { %6788 = vst [vmem:[#allocation21_spill] sm:$0xff] %v4867_v23  ;;  %v4873_v61 = vpop.eup %3929  ;;  %v2133_v2 = vmul.f32 %v2069_v52, %v6789_v1  ;;  %v1753_v12 = vsub.f32 0.0, %v4738_v58  ;;  %3937 = vrcp.f32 %v989_v62  ;;  %v1559_v35 = vmul.f32 %v4751_v8, %v1495_v63 }
 0x181   :  { %v4879_v60 = vsel %vm728_vm11, 1.0, %v6776_v22  ;;  %v4882_v45 = vmul.f32 0.5, %v6790_v31  ;;  %v927_v4 = vmul.f32 0.3275911, %v4861_v36  ;;  %v1366_v15 = vadd.f32 1.4214138, %v1302_v37 }
 0x182   :  { %v1304_v40 = vmul.f32 %v4824_v48, %v1240_v13  ;;  %vm729_vm12 = vcmp.ge.f32.partialorder %v4723_v7, 0.0  ;;  %v1241_v57 = vadd.f32 -1.4531521, %v1177_v25  ;;  %3939 = vpow2.f32 %v1887_v17 }
 0x183   :  { %v1891_v52 = vmul.f32 1.442695, %v1816_v53  ;;  %v1179_v62 = vmul.f32 1.0614054, %v4873_v61  ;;  %v4889_v63 = vmul.f32 0.70710677, %v4871_v34  ;;  %v4894_v1 = vmul.f32 %v2196_v55, %v6791_v9  ;;  %v532_v9 = vpop.f32.mrf.mxu1 }
 0x184   :  { %v4891_v41 = vpop.eup %3931  ;;  %v2197_v31 = vadd.f32 1.0, %v2133_v2  ;;  %v1817_v37 = vmul.f32 %v1753_v12, %v4738_v58  ;;  %v1755_v13 = vsub.f32 0.0, %v4756_v54  ;;  %v1623_v39 = vadd.f32 0.2548296, %v1559_v35 }
 0x185   :  { %6792 = vst [vmem:[#allocation22_spill] sm:$0xff] %v4894_v1  ;;  %v4899_v7 = vsel %vm729_vm12, 1.0, %v6776_v22  ;;  %vm731_vm13 = vcmp.ge.f32.partialorder %v4743_v46, 0.0  ;;  %v991_v25 = vadd.f32 1.0, %v927_v4  ;;  %v1430_v17 = vmul.f32 %v4806_v0, %v1366_v15  ;;  %v6793_v46 = vld [vmem:[#allocation23_spill] sm:$0xff] }
 0x186   :  { %v1368_v53 = vadd.f32 1.4214138, %v1304_v40  ;;  %v1305_v56 = vmul.f32 %v4848_v5, %v1241_v57  ;;  %v4905_v55 = vmul.f32 0.5, %v4727_v14  ;;  %3941 = vpow2.f32 %v1891_v52 }
 0x187   :  { %v3934_v2 = vpop.eup %3933  ;;  %v1243_v58 = vadd.f32 -1.4531521, %v1179_v62  ;;  %v1178_v12 = vmul.f32 1.0614054, %v4891_v41  ;;  %v4909_v35 = vand.u32 2147483647, %v4889_v63  ;;  %v4914_v4 = vmul.f32 %v2197_v31, %v6793_v46 }
 0x188   :  { %v1893_v15 = vmul.f32 1.442695, %v1817_v37  ;;  %v4917_v40 = vsel %vm731_vm13, 1.0, %v6776_v22  ;;  %v1819_v14 = vmul.f32 %v1755_v13, %v4756_v54  ;;  %v1687_v57 = vmul.f32 %v4751_v8, %v1623_v39 }
 0x189   :  { %v4911_v51 = vpop.eup %3935  ;;  %6794 = vst [vmem:[#allocation24_spill] sm:$0xff] %v4914_v4  ;;  %vm730_vm14 = vcmp.ge.f32.partialorder %v4760_v49, 0.0  ;;  %v1754_v52 = vsub.f32 0.0, %v4771_v19  ;;  %3943 = vrcp.f32 %v991_v25  ;;  %v1494_v62 = vadd.f32 -0.28449672, %v1430_v17 }
 0x18a   :  { %v1432_v28 = vmul.f32 %v4824_v48, %v1368_v53  ;;  %v1369_v1 = vadd.f32 1.4214138, %v1305_v56  ;;  %v4925_v31 = vadd.f32 %v532_v9, %v4467_v20  ;;  %v1307_v37 = vmul.f32 %v4873_v61, %v1243_v58 }
 0x18b   :  { %v1242_v46 = vadd.f32 -1.4531521, %v1178_v12  ;;  %v1180_v4 = vmul.f32 1.0614054, %v4911_v51  ;;  %v926_v54 = vmul.f32 0.3275911, %v4909_v35  ;;  %3945 = vpow2.f32 %v1893_v15  ;;  %v421_v12 = vpop.f32.mrf.mxu0 }
 0x18c   :  { %v1897_v8 = vmul.f32 1.442695, %v1819_v14  ;;  %v4931_v39 = vmul.f32 0.5, %v4747_v21  ;;  %v4934_v13 = vmul.f32 0.5, %v4763_v38  ;;  %v2007_v56 = vmul.f32 %v3934_v2, %v1687_v57  ;;  %v3857_v14 = vld [vmem:[#allocation8 + $0x50] sm:$0xff]  }
 0x18d   :  { %v4936_v25 = vpop.eup %3937  ;;  %v4941_v17 = vsel %vm730_vm14, 1.0, %v6776_v22  ;;  %v1818_v53 = vmul.f32 %v1754_v52, %v4771_v19  ;;  %v1756_v58 = vsub.f32 0.0, %v4785_v3  ;;  %v1558_v9 = vmul.f32 %v4806_v0, %v1494_v62  ;;  %3560 = vmatprep.subr.bf16.mxu0 %v3857_v14 }
 0x18e   :  { %6795 = vst [vmem:[#allocation19_spill] sm:$0xff] %v4931_v39  ;;  %6796 = vst [vmem:[#allocation26_spill] sm:$0xff] %v4934_v13  ;;  %v1496_v21 = vadd.f32 -0.28449672, %v1432_v28  ;;  %v1433_v15 = vmul.f32 %v4848_v5, %v1369_v1  ;;  %v4948_v38 = vmul.f32 0.70710677, %v4925_v31  ;;  %v1306_v57 = vmul.f32 %v4891_v41, %v1242_v46 }
 0x18f   :  { %v1371_v2 = vadd.f32 1.4214138, %v1307_v37  ;;  %v1244_v49 = vadd.f32 -1.4531521, %v1180_v4  ;;  %v990_v6 = vadd.f32 1.0, %v926_v54  ;;  %v3940_v27 = vpop.eup %3939  ;;  %3947 = vpow2.f32 %v1897_v8 }
 0x190   :  { %vm732_vm15 = vcmp.ge.f32.partialorder %v4774_v47, 0.0  ;;  %v1181_v19 = vmul.f32 1.0614054, %v4936_v25  ;;  %v4954_v52 = vadd.f32 %v421_v12, %v4455_v10  ;;  %v2071_v28 = vsub.f32 1.0, %v2007_v56  ;;  %v534_v47 = vpop.f32.mrf.mxu1 }
 0x191   :  { %v1895_v1 = vmul.f32 1.442695, %v1818_v53  ;;  %v1820_v62 = vmul.f32 %v1756_v58, %v4785_v3  ;;  %vm733_vm0 = vcmp.ge.f32.partialorder %v4790_v33, 0.0  ;;  %v1622_v37 = vadd.f32 0.2548296, %v1558_v9 }
 0x192   :  { %v1560_v4 = vmul.f32 %v4824_v48, %v1496_v21  ;;  %v1497_v46 = vadd.f32 -0.28449672, %v1433_v15  ;;  %v4960_v54 = vand.u32 2147483647, %v4948_v38  ;;  %v1435_v8 = vmul.f32 %v4873_v61, %v1371_v2 }
 0x193   :  { %v1370_v42 = vadd.f32 1.4214138, %v1306_v57  ;;  %v1308_v12 = vmul.f32 %v4911_v51, %v1244_v49  ;;  %3949 = vrcp.f32 %v990_v6  ;;  %v3942_v14 = vpop.eup %3941  ;;  %v4967_v3 = vsel %vm732_vm15, 1.0, %v6776_v22 }
 0x194   :  { %v4970_v56 = vmul.f32 0.5, %v4778_v16  ;;  %v1245_v53 = vadd.f32 -1.4531521, %v1181_v19  ;;  %v4973_v58 = vmul.f32 0.70710677, %v4954_v52  ;;  %v2135_v9 = vmul.f32 %v2071_v28, %v4796_v26 }
 0x195   :  { %3951 = vpow2.f32 %v1895_v1  ;;  %v4979_v6 = vsel %vm733_vm0, 1.0, %v6776_v22  ;;  %v1757_v21 = vsub.f32 0.0, %v4811_v24  ;;  %v1624_v2 = vadd.f32 0.2548296, %v1560_v4 }
 0x196   :  { %6797 = vst [vmem:[#allocation25_spill] sm:$0xff] %v4970_v56  ;;  %6798 = vst [vmem:[#allocation20_spill] sm:$0xff] %v4979_v6  ;;  %v4982_v15 = vpop.eup %3943  ;;  %v1561_v16 = vmul.f32 %v4848_v5, %v1497_v46  ;;  %v1899_v57 = vmul.f32 1.442695, %v1820_v62  ;;  %v928_v49 = vmul.f32 0.3275911, %v4960_v54  ;;  %v1686_v19 = vmul.f32 %v4806_v0, %v1622_v37 }
 0x197   :  { %v1499_v26 = vadd.f32 -0.28449672, %v1435_v8  ;;  %v1434_v28 = vmul.f32 %v4891_v41, %v1370_v42  ;;  %v1372_v1 = vadd.f32 1.4214138, %v1308_v12  ;;  %v1309_v33 = vmul.f32 %v4936_v25, %v1245_v53  ;;  %v3859_v37 = vld [vmem:[#allocation8 + $0xd0] sm:$0xff]   ;;  %v423_v53 = vpop.f32.mrf.mxu0 }
 0x198   :  { %v4990_v23 = vmul.f32 0.5, %v4817_v44  ;;  %v4993_v59 = vand.u32 2147483647, %v4973_v58  ;;  %v4996_v4 = vadd.f32 %v534_v47, %v4457_v11  ;;  %v3946_v62 = vpop.eup %3945  ;;  %v2199_v46 = vadd.f32 1.0, %v2135_v9  ;;  %3624 = vmatprep.subr.bf16.mxu1 %v3859_v37 }
 0x199   :  { %v1821_v56 = vmul.f32 %v1757_v21, %v4811_v24  ;;  %v1183_v0 = vmul.f32 1.0614054, %v4982_v15  ;;  %v1759_v42 = vsub.f32 0.0, %v4861_v36  ;;  %v1688_v8 = vmul.f32 %v4824_v48, %v1624_v2 }
 0x19a   :  { %6799 = vst [vmem:[#allocation23_spill] sm:$0xff] %v4990_v23  ;;  %v1625_v12 = vadd.f32 0.2548296, %v1561_v16  ;;  %vm735_vm1 = vcmp.ge.f32.partialorder %v4840_v50, 0.0  ;;  %v992_v44 = vadd.f32 1.0, %v928_v49  ;;  %v3858_v23 = vld [vmem:[#allocation8 + $0x10] sm:$0xff]   ;;  %v2006_v13 = vmul.f32 %v3940_v27, %v1686_v19 }
 0x19b   :  { %v1563_v47 = vmul.f32 %v4873_v61, %v1499_v26  ;;  %v1498_v6 = vadd.f32 -0.28449672, %v1434_v28  ;;  %v1436_v9 = vmul.f32 %v4911_v51, %v1372_v1  ;;  %3953 = vpow2.f32 %v1899_v57  ;;  %3561 = vmatpush3.bf16.msra.mxu0 %v3858_v23  ;;  %v536_v28 = vpop.f32.mrf.mxu1  ;;  %v427_v23 = vpop.f32.mrf.mxu0 }
 0x19c   :  { %v1373_v24 = vadd.f32 1.4214138, %v1309_v33  ;;  %v929_v21 = vmul.f32 0.3275911, %v4993_v59  ;;  %v5007_v39 = vmul.f32 0.70710677, %v4996_v4  ;;  %v3948_v48 = vpop.eup %3947  ;;  %v5010_v2 = vmul.f32 %v2199_v46, %v4731_v43 }
 0x19d   :  { %v1247_v16 = vadd.f32 -1.4531521, %v1183_v0  ;;  %v1823_v27 = vmul.f32 %v1759_v42, %v4861_v36  ;;  %v5014_v49 = vadd.f32 %v423_v53, %v4465_v18  ;;  %v2008_v19 = vmul.f32 %v3942_v14, %v1688_v8 }
 0x19e   :  { %6800 = vst [vmem:[#allocation33_spill] sm:$0xff] %v5010_v2  ;;  %v1689_v57 = vmul.f32 %v4848_v5, %v1625_v12  ;;  %v1901_v26 = vmul.f32 1.442695, %v1821_v56  ;;  %3955 = vrcp.f32 %v992_v44  ;;  %v2070_v1 = vsub.f32 1.0, %v2006_v13 }
 0x19f   :  { %v1627_v33 = vadd.f32 0.2548296, %v1563_v47  ;;  %v1500_v37 = vadd.f32 -0.28449672, %v1436_v9  ;;  %v5020_v43 = vsel %vm735_vm1, 1.0, %v6776_v22  ;;  %v1562_v36 = vmul.f32 %v4891_v41, %v1498_v6 }
 0x1a0   :  { %v5022_v46 = vpop.eup %3949  ;;  %v1437_v14 = vmul.f32 %v4936_v25, %v1373_v24  ;;  %v993_v0 = vadd.f32 1.0, %v929_v21  ;;  %v5027_v5 = vand.u32 2147483647, %v5007_v39  ;;  %v1311_v13 = vmul.f32 %v4982_v15, %v1247_v16  ;;  %v3860_v21 = vld [vmem:[#allocation8 + $0x90] sm:$0xff]  }
 0x1a1   :  { %v1905_v56 = vmul.f32 1.442695, %v1823_v27  ;;  %v5031_v42 = vmul.f32 0.70710677, %v5014_v49  ;;  %v5034_v50 = vadd.f32 %v536_v28, %v4467_v20  ;;  %v2072_v12 = vsub.f32 1.0, %v2008_v19  ;;  %3625 = vmatpush3.bf16.msra.mxu1 %v3860_v21 }
 0x1a2   :  { %v3952_v8 = vpop.eup %3951  ;;  %v2009_v44 = vmul.f32 %v3946_v62, %v1689_v57  ;;  %3957 = vpow2.f32 %v1901_v26  ;;  %v5037_v6 = vadd.f32 %v427_v23, %v4455_v10  ;;  %v2134_v53 = vmul.f32 %v2070_v1, %v4845_v29 }
 0x1a3   :  { %v1691_v47 = vmul.f32 %v4873_v61, %v1627_v33  ;;  %v1564_v9 = vmul.f32 %v4911_v51, %v1500_v37  ;;  %v1182_v24 = vmul.f32 1.0614054, %v5022_v46  ;;  %v1626_v16 = vadd.f32 0.2548296, %v1562_v36 }
 0x1a4   :  { %v1501_v27 = vadd.f32 -0.28449672, %v1437_v14  ;;  %3959 = vrcp.f32 %v993_v0  ;;  %v931_v28 = vmul.f32 0.3275911, %v5027_v5  ;;  %v1375_v19 = vadd.f32 1.4214138, %v1311_v13 }
 0x1a5   :  { %3961 = vpow2.f32 %v1905_v56  ;;  %v5045_v62 = vand.u32 2147483647, %v5031_v42  ;;  %v5048_v57 = vmul.f32 0.70710677, %v5034_v50  ;;  %v2136_v29 = vmul.f32 %v2072_v12, %v4879_v60 }
 0x1a6   :  { %v2073_v61 = vsub.f32 1.0, %v2009_v44  ;;  %v5052_v26 = vmul.f32 0.5, %v4871_v34  ;;  %v5055_v1 = vmul.f32 0.70710677, %v5037_v6  ;;  %v2198_v33 = vadd.f32 1.0, %v2134_v53 }
 0x1a7   :  { %v1628_v37 = vadd.f32 0.2548296, %v1564_v9  ;;  %v1246_v23 = vadd.f32 -1.4531521, %v1182_v24  ;;  %v1758_v36 = vsub.f32 0.0, %v4909_v35  ;;  %v2011_v14 = vmul.f32 %v3948_v48, %v1691_v47 }
 0x1a8   :  { %v1690_v0 = vmul.f32 %v4891_v41, %v1626_v16  ;;  %v1565_v13 = vmul.f32 %v4936_v25, %v1501_v27  ;;  %v995_v56 = vadd.f32 1.0, %v931_v28  ;;  %v3954_v21 = vpop.eup %3953  ;;  %v1439_v60 = vmul.f32 %v4982_v15, %v1375_v19 }
 0x1a9   :  { %v5062_v34 = vmul.f32 0.5, %v4925_v31  ;;  %v930_v12 = vmul.f32 0.3275911, %v5045_v62  ;;  %v5066_v44 = vand.u32 2147483647, %v5048_v57  ;;  %v2200_v53 = vadd.f32 1.0, %v2136_v29 }
 0x1aa   :  { %v2137_v9 = vmul.f32 %v2073_v61, %v4899_v7  ;;  %vm734_vm2 = vcmp.ge.f32.partialorder %v4889_v63, 0.0  ;;  %v5071_v41 = vand.u32 2147483647, %v5055_v1  ;;  %v5076_v47 = vmul.f32 %v2198_v33, %v4837_v30  ;;  %v540_v7 = vpop.f32.mrf.mxu1 }
 0x1ab   :  { %v5073_v48 = vpop.eup %3955  ;;  %v1692_v31 = vmul.f32 %v4911_v51, %v1628_v37  ;;  %v1310_v24 = vmul.f32 %v5022_v46, %v1246_v23  ;;  %v1822_v16 = vmul.f32 %v1758_v36, %v4909_v35  ;;  %v2075_v27 = vsub.f32 1.0, %v2011_v14  ;;  %v429_v14 = vpop.f32.mrf.mxu0 }
 0x1ac   :  { %6801 = vst [vmem:[#allocation34_spill] sm:$0xff] %v5076_v47  ;;  %v2010_v28 = vmul.f32 %v3952_v8, %v1690_v0  ;;  %v1629_v19 = vadd.f32 0.2548296, %v1565_v13  ;;  %3963 = vrcp.f32 %v995_v56  ;;  %v1503_v63 = vadd.f32 -0.28449672, %v1439_v60 }
 0x1ad   :  { %v5082_v29 = vsel %vm734_vm2, 1.0, %v6776_v22  ;;  %v994_v61 = vadd.f32 1.0, %v930_v12  ;;  %v932_v2 = vmul.f32 0.3275911, %v5066_v44  ;;  %v5086_v30 = vmul.f32 %v2200_v53, %v4858_v32 }
 0x1ae   :  { %v2201_v51 = vadd.f32 1.0, %v2137_v9  ;;  %v1184_v33 = vmul.f32 1.0614054, %v5073_v48  ;;  %v933_v35 = vmul.f32 0.3275911, %v5071_v41  ;;  %v2012_v8 = vmul.f32 %v3954_v21, %v1692_v31 }
 0x1af   :  { %6802 = vst [vmem:[#allocation35_spill] sm:$0xff] %v5086_v30  ;;  %v3958_v37 = vpop.eup %3957  ;;  %v1374_v23 = vadd.f32 1.4214138, %v1310_v24  ;;  %vm736_vm3 = vcmp.ge.f32.partialorder %v4948_v38, 0.0  ;;  %v5092_v36 = vadd.f32 %v540_v7, %v4457_v11  ;;  %v2139_v0 = vmul.f32 %v2075_v27, %v4917_v40 }
 0x1b0   :  { %v2074_v13 = vsub.f32 1.0, %v2010_v28  ;;  %v1693_v32 = vmul.f32 %v4936_v25, %v1629_v19  ;;  %v1903_v56 = vmul.f32 1.442695, %v1822_v16  ;;  %v1567_v12 = vmul.f32 %v4982_v15, %v1503_v63 }
 0x1b1   :  { %v5096_v60 = vpop.eup %3959  ;;  %v1760_v53 = vsub.f32 0.0, %v4960_v54  ;;  %3965 = vrcp.f32 %v994_v61  ;;  %v996_v21 = vadd.f32 1.0, %v932_v2  ;;  %v5101_v38 = vsel %vm736_vm3, 1.0, %v6776_v22 }
 0x1b2   :  { %v3962_v9 = vpop.eup %3961  ;;  %v1248_v31 = vadd.f32 -1.4531521, %v1184_v33  ;;  %v997_v24 = vadd.f32 1.0, %v933_v35  ;;  %v5104_v40 = vadd.f32 %v429_v14, %v4465_v18  ;;  %v5107_v25 = vmul.f32 %v2201_v51, %v4882_v45 }
 0x1b3   :  { %v2076_v16 = vsub.f32 1.0, %v2012_v8  ;;  %v1438_v27 = vmul.f32 %v5022_v46, %v1374_v23  ;;  %v5111_v28 = vmul.f32 0.70710677, %v5092_v36  ;;  %v2138_v2 = vmul.f32 %v2074_v13, %v4941_v17  ;;  %v542_v13 = vpop.f32.mrf.mxu1 }
 0x1b4   :  { %6803 = vst [vmem:[#allocation36_spill] sm:$0xff] %v5107_v25  ;;  %v2013_v19 = vmul.f32 %v3958_v37, %v1693_v32  ;;  %3967 = vpow2.f32 %v1903_v56  ;;  %v1185_v7 = vmul.f32 1.0614054, %v5096_v60  ;;  %v2203_v63 = vadd.f32 1.0, %v2139_v0 }
 0x1b5   :  { %v1631_v61 = vadd.f32 0.2548296, %v1567_v12  ;;  %v1824_v33 = vmul.f32 %v1760_v53, %v4960_v54  ;;  %3969 = vrcp.f32 %v996_v21  ;;  %v1312_v45 = vmul.f32 %v5073_v48, %v1248_v31 }
 0x1b6   :  { %v1761_v51 = vsub.f32 0.0, %v4993_v59  ;;  %3971 = vrcp.f32 %v997_v24  ;;  %v5119_v35 = vmul.f32 0.70710677, %v5104_v40  ;;  %v2140_v8 = vmul.f32 %v2076_v16, %v4967_v3 }
 0x1b7   :  { %v1502_v17 = vadd.f32 -0.28449672, %v1438_v27  ;;  %vm737_vm4 = vcmp.ge.f32.partialorder %v4973_v58, 0.0  ;;  %v5124_v37 = vand.u32 2147483647, %v5111_v28  ;;  %v2202_v23 = vadd.f32 1.0, %v2138_v2 }
 0x1b8   :  { %v2077_v14 = vsub.f32 1.0, %v2013_v19  ;;  %v5127_v54 = vmul.f32 0.5, %v4954_v52  ;;  %v1249_v0 = vadd.f32 -1.4531521, %v1185_v7  ;;  %v5132_v56 = vmul.f32 %v2203_v63, %v4905_v55  ;;  %v6807_v19 = vld [vmem:[#allocation20_spill] sm:$0xff] }
 0x1b9   :  { %v5129_v32 = vpop.eup %3963  ;;  %v1695_v3 = vmul.f32 %v4982_v15, %v1631_v61  ;;  %v1907_v12 = vmul.f32 1.442695, %v1824_v33  ;;  %v1763_v58 = vsub.f32 0.0, %v5027_v5  ;;  %v1376_v53 = vadd.f32 1.4214138, %v1312_v45  ;;  %v6805_v15 = vld [vmem:[#allocation19_spill] sm:$0xff] }
 0x1ba   :  { %6804 = vst [vmem:[#allocation37_spill] sm:$0xff] %v5132_v56  ;;  %v5137_v21 = vsel %vm737_vm4, 1.0, %v6776_v22  ;;  %v1825_v31 = vmul.f32 %v1761_v51, %v4993_v59  ;;  %v5141_v52 = vand.u32 2147483647, %v5119_v35  ;;  %v2204_v24 = vadd.f32 1.0, %v2140_v8 }
 0x1bb   :  { %v1566_v16 = vmul.f32 %v5022_v46, %v1502_v17  ;;  %v935_v55 = vmul.f32 0.3275911, %v5124_v37  ;;  %v5146_v27 = vadd.f32 %v542_v13, %v4467_v20  ;;  %v5149_v2 = vmul.f32 %v2202_v23, %v6805_v15 }
 0x1bc   :  { %v2141_v7 = vmul.f32 %v2077_v14, %v6807_v19  ;;  %v1313_v63 = vmul.f32 %v5096_v60, %v1249_v0  ;;  %v1187_v59 = vmul.f32 1.0614054, %v5129_v32  ;;  %v2015_v61 = vmul.f32 %v3962_v9, %v1695_v3  ;;  %v6808_v14 = vld [vmem:[#allocation26_spill] sm:$0xff] }
 0x1bd   :  { %6806 = vst [vmem:[#allocation19_spill] sm:$0xff] %v5149_v2  ;;  %3973 = vpow2.f32 %v1907_v12  ;;  %vm739_vm5 = vcmp.ge.f32.partialorder %v5007_v39, 0.0  ;;  %v1827_v33 = vmul.f32 %v1763_v58, %v5027_v5  ;;  %v1440_v51 = vmul.f32 %v5073_v48, %v1376_v53  ;;  %v3861_v39 = vld [vmem:[#allocation8 + $0x48] sm:$0xff]  }
 0x1be   :  { %v5156_v45 = vpop.eup %3965  ;;  %v1909_v8 = vmul.f32 1.442695, %v1825_v31  ;;  %v5160_v17 = vmul.f32 0.5, %v4996_v4  ;;  %v934_v23 = vmul.f32 0.3275911, %v5141_v52  ;;  %v5164_v0 = vmul.f32 %v2204_v24, %v6808_v14  ;;  %v431_v31 = vpop.f32.mrf.mxu0  ;;  %3562 = vmatprep.subr.bf16.mxu0 %v3861_v39 }
 0x1bf   :  { %v1630_v13 = vadd.f32 0.2548296, %v1566_v16  ;;  %v999_v9 = vadd.f32 1.0, %v935_v55  ;;  %v5167_v3 = vmul.f32 0.70710677, %v5146_v27  ;;  %v2205_v5 = vadd.f32 1.0, %v2141_v7 }
 0x1c0   :  { %6809 = vst [vmem:[#allocation20_spill] sm:$0xff] %v5164_v0  ;;  %v1377_v12 = vadd.f32 1.4214138, %v1313_v63  ;;  %v5170_v58 = vsel %vm739_vm5, 1.0, %v6776_v22  ;;  %v1251_v53 = vadd.f32 -1.4531521, %v1187_v59  ;;  %3975 = vpow2.f32 %v1909_v8 }
 0x1c1   :  { %v3968_v4 = vpop.eup %3967  ;;  %v2079_v15 = vsub.f32 1.0, %v2015_v61  ;;  %v1913_v19 = vmul.f32 1.442695, %v1827_v33  ;;  %v5173_v56 = vmul.f32 0.5, %v5014_v49  ;;  %v1186_v24 = vmul.f32 1.0614054, %v5156_v45 }
 0x1c2   :  { %v5176_v16 = vpop.eup %3969  ;;  %v1504_v55 = vadd.f32 -0.28449672, %v1440_v51  ;;  %vm738_vm6 = vcmp.ge.f32.partialorder %v5031_v42, 0.0  ;;  %v998_v7 = vadd.f32 1.0, %v934_v23  ;;  %v1694_v59 = vmul.f32 %v5022_v46, %v1630_v13  ;;  %v6810_v33 = vld [vmem:[#allocation25_spill] sm:$0xff] }
 0x1c3   :  { %v5179_v63 = vpop.eup %3971  ;;  %3977 = vrcp.f32 %v999_v9  ;;  %v5183_v61 = vand.u32 2147483647, %v5167_v3  ;;  %v5186_v49 = vadd.f32 %v431_v31, %v4455_v10  ;;  %v5189_v14 = vmul.f32 %v2205_v5, %v6810_v33 }
 0x1c4   :  { %v1441_v51 = vmul.f32 %v5096_v60, %v1377_v12  ;;  %v1315_v8 = vmul.f32 %v5129_v32, %v1251_v53  ;;  %v1762_v23 = vsub.f32 0.0, %v5045_v62  ;;  %v2143_v39 = vmul.f32 %v2079_v15, %v5020_v43 }
 0x1c5   :  { %6811 = vst [vmem:[#allocation26_spill] sm:$0xff] %v5189_v14  ;;  %3979 = vpow2.f32 %v1913_v19  ;;  %v1250_v46 = vadd.f32 -1.4531521, %v1186_v24  ;;  %v1188_v13 = vmul.f32 1.0614054, %v5176_v16  ;;  %v1568_v9 = vmul.f32 %v5073_v48, %v1504_v55 }
 0x1c6   :  { %v5200_v31 = vsel %vm738_vm6, 1.0, %v6776_v22  ;;  %v1189_v5 = vmul.f32 1.0614054, %v5179_v63  ;;  %3981 = vrcp.f32 %v998_v7  ;;  %v2014_v12 = vmul.f32 %v3968_v4, %v1694_v59  ;;  %v544_v7 = vpop.f32.mrf.mxu1 }
 0x1c7   :  { %v1764_v53 = vsub.f32 0.0, %v5066_v44  ;;  %v936_v33 = vmul.f32 0.3275911, %v5183_v61  ;;  %v5206_v43 = vmul.f32 0.70710677, %v5186_v49  ;;  %v1826_v24 = vmul.f32 %v1762_v23, %v5045_v62 }
 0x1c8   :  { %v1505_v15 = vadd.f32 -0.28449672, %v1441_v51  ;;  %v1379_v19 = vadd.f32 1.4214138, %v1315_v8  ;;  %v5210_v55 = vmul.f32 0.5, %v5034_v50  ;;  %v2207_v42 = vadd.f32 1.0, %v2143_v39 }
 0x1c9   :  { %v1314_v14 = vmul.f32 %v5156_v45, %v1250_v46  ;;  %v1252_v25 = vadd.f32 -1.4531521, %v1188_v13  ;;  %v5214_v4 = vmul.f32 0.5, %v5037_v6  ;;  %v1632_v0 = vadd.f32 0.2548296, %v1568_v9  ;;  %v3863_v39 = vld [vmem:[#allocation8 + $0xc8] sm:$0xff]  }
 0x1ca   :  { %v3974_v59 = vpop.eup %3973  ;;  %vm740_vm7 = vcmp.ge.f32.partialorder %v5048_v57, 0.0  ;;  %v1253_v30 = vadd.f32 -1.4531521, %v1189_v5  ;;  %v1765_v51 = vsub.f32 0.0, %v5071_v41  ;;  %v2078_v8 = vsub.f32 1.0, %v2014_v12  ;;  %v3862_v57 = vld [vmem:[#allocation8 + $0x8] sm:$0xff]   ;;  %3626 = vmatprep.subr.bf16.mxu1 %v3863_v39 }
 0x1cb   :  { %v1828_v62 = vmul.f32 %v1764_v53, %v5066_v44  ;;  %v1000_v50 = vadd.f32 1.0, %v936_v33  ;;  %v5220_v23 = vand.u32 2147483647, %v5206_v43  ;;  %v1569_v46 = vmul.f32 %v5096_v60, %v1505_v15  ;;  %v6812_v5 = vld [vmem:[#allocation23_spill] sm:$0xff]  ;;  %3563 = vmatpush3.bf16.msra.mxu0 %v3862_v57 }
 0x1cc   :  { %v1443_v6 = vmul.f32 %v5129_v32, %v1379_v19  ;;  %v1911_v13 = vmul.f32 1.442695, %v1826_v24  ;;  %v5225_v9 = vadd.f32 %v544_v7, %v4457_v11  ;;  %v5228_v2 = vmul.f32 %v2207_v42, %v6812_v5  ;;  %v433_v24 = vpop.f32.mrf.mxu0 }
 0x1cd   :  { %v1378_v12 = vadd.f32 1.4214138, %v1314_v14  ;;  %v5231_v44 = vsel %vm740_vm7, 1.0, %v6776_v22  ;;  %v1316_v53 = vmul.f32 %v5176_v16, %v1252_v25  ;;  %v1696_v33 = vmul.f32 %v5073_v48, %v1632_v0  ;;  %v3976_v7 = vpop.eup %3975 }
 0x1ce   :  { %6813 = vst [vmem:[#allocation25_spill] sm:$0xff] %v5228_v2  ;;  %vm741_vm8 = vcmp.ge.f32.partialorder %v5055_v1, 0.0  ;;  %v1317_v15 = vmul.f32 %v5179_v63, %v1253_v30  ;;  %v1829_v19 = vmul.f32 %v1765_v51, %v5071_v41  ;;  %v2142_v42 = vmul.f32 %v2078_v8, %v5082_v29 }
 0x1cf   :  { %v1915_v14 = vmul.f32 1.442695, %v1828_v62  ;;  %3983 = vrcp.f32 %v1000_v50  ;;  %v937_v5 = vmul.f32 0.3275911, %v5220_v23  ;;  %v1633_v25 = vadd.f32 0.2548296, %v1569_v46 }
 0x1d0   :  { %v5240_v2 = vpop.eup %3977  ;;  %v1507_v39 = vadd.f32 -0.28449672, %v1443_v6  ;;  %3985 = vpow2.f32 %v1911_v13  ;;  %v5243_v48 = vmul.f32 0.70710677, %v5225_v9  ;;  %v1442_v30 = vmul.f32 %v5156_v45, %v1378_v12 }
 0x1d1   :  { %v1380_v41 = vadd.f32 1.4214138, %v1316_v53  ;;  %v5249_v0 = vsel %vm741_vm8, 1.0, %v6776_v22  ;;  %v5252_v29 = vadd.f32 %v433_v24, %v4465_v18  ;;  %v2016_v8 = vmul.f32 %v3974_v59, %v1696_v33 }
 0x1d2   :  { %v5254_v51 = vpop.eup %3979  ;;  %v1381_v62 = vadd.f32 1.4214138, %v1317_v15  ;;  %v1917_v50 = vmul.f32 1.442695, %v1829_v19  ;;  %v5257_v46 = vmul.f32 0.5, %v5092_v36  ;;  %v2206_v13 = vadd.f32 1.0, %v2142_v42 }
 0x1d3   :  { %v5259_v6 = vpop.eup %3981  ;;  %v1191_v57 = vmul.f32 1.0614054, %v5240_v2  ;;  %v1767_v1 = vsub.f32 0.0, %v5124_v37  ;;  %v1001_v12 = vadd.f32 1.0, %v937_v5  ;;  %v1697_v53 = vmul.f32 %v5096_v60, %v1633_v25  ;;  %v546_v5 = vpop.f32.mrf.mxu1 }
 0x1d4   :  { %v1571_v24 = vmul.f32 %v5129_v32, %v1507_v39  ;;  %3987 = vpow2.f32 %v1915_v14  ;;  %v5266_v59 = vand.u32 2147483647, %v5243_v48  ;;  %v1506_v33 = vadd.f32 -0.28449672, %v1442_v30 }
 0x1d5   :  { %v1444_v36 = vmul.f32 %v5176_v16, %v1380_v41  ;;  %vm743_vm9 = vcmp.ge.f32.partialorder %v5111_v28, 0.0  ;;  %v5271_v15 = vmul.f32 0.70710677, %v5252_v29  ;;  %v2080_v19 = vsub.f32 1.0, %v2016_v8 }
 0x1d6   :  { %v1445_v42 = vmul.f32 %v5179_v63, %v1381_v62  ;;  %3989 = vpow2.f32 %v1917_v50  ;;  %v1190_v60 = vmul.f32 1.0614054, %v5259_v6  ;;  %v5276_v14 = vmul.f32 %v2206_v13, %v5052_v26  ;;  %v3864_v13 = vld [vmem:[#allocation8 + $0x88] sm:$0xff]  }
 0x1d7   :  { %v1255_v25 = vadd.f32 -1.4531521, %v1191_v57  ;;  %v1831_v39 = vmul.f32 %v1767_v1, %v5124_v37  ;;  %3991 = vrcp.f32 %v1001_v12  ;;  %v2017_v30 = vmul.f32 %v3976_v7, %v1697_v53  ;;  %3627 = vmatpush3.bf16.msra.mxu1 %v3864_v13 }
 0x1d8   :  { %6814 = vst [vmem:[#allocation23_spill] sm:$0xff] %v5276_v14  ;;  %v1635_v41 = vadd.f32 0.2548296, %v1571_v24  ;;  %v5280_v28 = vsel %vm743_vm9, 1.0, %v6776_v22  ;;  %v939_v8 = vmul.f32 0.3275911, %v5266_v59  ;;  %v1570_v62 = vmul.f32 %v5156_v45, %v1506_v33 }
 0x1d9   :  { %v1508_v50 = vadd.f32 -0.28449672, %v1444_v36  ;;  %v5285_v47 = vand.u32 2147483647, %v5271_v15  ;;  %v5288_v26 = vadd.f32 %v546_v5, %v4467_v20  ;;  %v2144_v37 = vmul.f32 %v2080_v19, %v5101_v38  ;;  %v437_v19 = vpop.f32.mrf.mxu0 }
 0x1da   :  { %v1509_v57 = vadd.f32 -0.28449672, %v1445_v42  ;;  %v1254_v7 = vadd.f32 -1.4531521, %v1190_v60  ;;  %v1766_v1 = vsub.f32 0.0, %v5141_v52  ;;  %v1319_v12 = vmul.f32 %v5240_v2, %v1255_v25 }
 0x1db   :  { %v1921_v53 = vmul.f32 1.442695, %v1831_v39  ;;  %v5294_v24 = vmul.f32 0.5, %v5104_v40  ;;  %v5297_v33 = vmul.f32 0.5, %v5146_v27  ;;  %v2081_v5 = vsub.f32 1.0, %v2017_v30 }
 0x1dc   :  { %v5299_v36 = vpop.eup %3983  ;;  %v1699_v14 = vmul.f32 %v5129_v32, %v1635_v41  ;;  %vm742_vm10 = vcmp.ge.f32.partialorder %v5119_v35, 0.0  ;;  %v1003_v38 = vadd.f32 1.0, %v939_v8  ;;  %v1634_v60 = vadd.f32 0.2548296, %v1570_v62 }
 0x1dd   :  { %6815 = vst [vmem:[#allocation38_spill] sm:$0xff] %v5294_v24  ;;  %6816 = vst [vmem:[#allocation39_spill] sm:$0xff] %v5297_v33  ;;  %v3986_v42 = vpop.eup %3985  ;;  %v1572_v25 = vmul.f32 %v5176_v16, %v1508_v50  ;;  %v938_v40 = vmul.f32 0.3275911, %v5285_v47  ;;  %v5306_v39 = vmul.f32 0.70710677, %v5288_v26  ;;  %v1573_v13 = vmul.f32 %v5179_v63, %v1509_v57 }
 0x1de   :  { %v2208_v27 = vadd.f32 1.0, %v2144_v37  ;;  %v1318_v30 = vmul.f32 %v5259_v6, %v1254_v7  ;;  %v1830_v32 = vmul.f32 %v1766_v1, %v5141_v52  ;;  %v1383_v41 = vadd.f32 1.4214138, %v1319_v12 }
 0x1df   :  { %3993 = vpow2.f32 %v1921_v53  ;;  %v1192_v8 = vmul.f32 1.0614054, %v5299_v36  ;;  %v5313_v62 = vadd.f32 %v437_v19, %v4455_v10  ;;  %v2145_v50 = vmul.f32 %v2081_v5, %v5137_v21  ;;  %v550_v53 = vpop.f32.mrf.mxu1 }
 0x1e0   :  { %v2019_v33 = vmul.f32 %v5254_v51, %v1699_v14  ;;  %v5320_v37 = vsel %vm742_vm10, 1.0, %v6776_v22  ;;  %3995 = vrcp.f32 %v1003_v38  ;;  %v1698_v52 = vmul.f32 %v5156_v45, %v1634_v60 }
 0x1e1   :  { %v3988_v57 = vpop.eup %3987  ;;  %v1636_v7 = vadd.f32 0.2548296, %v1572_v25  ;;  %v1002_v1 = vadd.f32 1.0, %v938_v40  ;;  %v5324_v12 = vand.u32 2147483647, %v5306_v39  ;;  %v5327_v19 = vmul.f32 %v2208_v27, %v5062_v34 }
 0x1e2   :  { %v1637_v21 = vadd.f32 0.2548296, %v1573_v13  ;;  %v1382_v51 = vadd.f32 1.4214138, %v1318_v30  ;;  %v1919_v14 = vmul.f32 1.442695, %v1830_v32  ;;  %v1447_v35 = vmul.f32 %v5240_v2, %v1383_v41 }
 0x1e3   :  { %6817 = vst [vmem:[#allocation40_spill] sm:$0xff] %v5327_v19  ;;  %v3990_v5 = vpop.eup %3989  ;;  %vm744_vm11 = vcmp.ge.f32.partialorder %v5167_v3, 0.0  ;;  %v1256_v38 = vadd.f32 -1.4531521, %v1192_v8  ;;  %v5332_v45 = vmul.f32 0.70710677, %v5313_v62  ;;  %v5338_v34 = vadd.f32 %v550_v53, %v4457_v11 }
 0x1e4   :  { %v5334_v60 = vpop.eup %3991  ;;  %v2209_v25 = vadd.f32 1.0, %v2145_v50  ;;  %v2083_v40 = vsub.f32 1.0, %v2019_v33  ;;  %v1768_v24 = vsub.f32 0.0, %v5183_v61  ;;  %v2018_v27 = vmul.f32 %v3986_v42, %v1698_v52 }
 0x1e5   :  { %v1700_v13 = vmul.f32 %v5176_v16, %v1636_v7  ;;  %3997 = vrcp.f32 %v1002_v1  ;;  %v940_v30 = vmul.f32 0.3275911, %v5324_v12  ;;  %v1701_v3 = vmul.f32 %v5179_v63, %v1637_v21 }
 0x1e6   :  { %v1446_v32 = vmul.f32 %v5259_v6, %v1382_v51  ;;  %3999 = vpow2.f32 %v1919_v14  ;;  %v5345_v41 = vsel %vm744_vm11, 1.0, %v6776_v22  ;;  %v1511_v33 = vadd.f32 -0.28449672, %v1447_v35  ;;  %v439_v14 = vpop.f32.mrf.mxu0 }
 0x1e7   :  { %v1320_v8 = vmul.f32 %v5299_v36, %v1256_v38  ;;  %v1193_v50 = vmul.f32 1.0614054, %v5334_v60  ;;  %v5350_v42 = vand.u32 2147483647, %v5332_v45  ;;  %v5353_v16 = vmul.f32 %v2209_v25, %v5127_v54  ;;  %v552_v25 = vpop.f32.mrf.mxu1 }
 0x1e8   :  { %v2147_v52 = vmul.f32 %v2083_v40, %v5170_v58  ;;  %v1832_v63 = vmul.f32 %v1768_v24, %v5183_v61  ;;  %v5358_v7 = vmul.f32 0.70710677, %v5338_v34  ;;  %v2082_v1 = vsub.f32 1.0, %v2018_v27 }
 0x1e9   :  { %6818 = vst [vmem:[#allocation41_spill] sm:$0xff] %v5353_v16  ;;  %v2020_v53 = vmul.f32 %v3988_v57, %v1700_v13  ;;  %v1769_v21 = vsub.f32 0.0, %v5220_v23  ;;  %v1004_v51 = vadd.f32 1.0, %v940_v30  ;;  %v2021_v35 = vmul.f32 %v3990_v5, %v1701_v3 }
 0x1ea   :  { %v1510_v38 = vadd.f32 -0.28449672, %v1446_v32  ;;  %v5362_v19 = vmul.f32 0.5, %v5186_v49  ;;  %vm745_vm12 = vcmp.ge.f32.partialorder %v5206_v43, 0.0  ;;  %v1575_v54 = vmul.f32 %v5240_v2, %v1511_v33 }
 0x1eb   :  { %v1384_v58 = vadd.f32 1.4214138, %v1320_v8  ;;  %v1257_v61 = vadd.f32 -1.4531521, %v1193_v50  ;;  %v941_v24 = vmul.f32 0.3275911, %v5350_v42  ;;  %v5371_v5 = vadd.f32 %v439_v14, %v4465_v18 }
 0x1ec   :  { %6819 = vst [vmem:[#allocation42_spill] sm:$0xff] %v5362_v19  ;;  %v3994_v40 = vpop.eup %3993  ;;  %v2211_v57 = vadd.f32 1.0, %v2147_v52  ;;  %v1923_v27 = vmul.f32 1.442695, %v1832_v63  ;;  %v5368_v13 = vand.u32 2147483647, %v5358_v7  ;;  %v2146_v30 = vmul.f32 %v2082_v1, %v5200_v31 }
 0x1ed   :  { %v5373_v49 = vpop.eup %3995  ;;  %v2084_v3 = vsub.f32 1.0, %v2020_v53  ;;  %v1833_v32 = vmul.f32 %v1769_v21, %v5220_v23  ;;  %4001 = vrcp.f32 %v1004_v51  ;;  %v2085_v33 = vsub.f32 1.0, %v2021_v35 }
 0x1ee   :  { %v1574_v8 = vmul.f32 %v5259_v6, %v1510_v38  ;;  %v5381_v50 = vsel %vm745_vm12, 1.0, %v6776_v22  ;;  %v5384_v52 = vadd.f32 %v552_v25, %v4467_v20  ;;  %v1639_v63 = vadd.f32 0.2548296, %v1575_v54  ;;  %v3865_v54 = vld [vmem:[#allocation8 + $0x40] sm:$0xff]  }
 0x1ef   :  { %v1448_v14 = vmul.f32 %v5299_v36, %v1384_v58  ;;  %v1321_v31 = vmul.f32 %v5334_v60, %v1257_v61  ;;  %v1005_v1 = vadd.f32 1.0, %v941_v24  ;;  %4003 = vpow2.f32 %v1923_v27  ;;  %3564 = vmatprep.subr.bf16.mxu0 %v3865_v54 }
 0x1f0   :  { %v1195_v23 = vmul.f32 1.0614054, %v5373_v49  ;;  %v943_v53 = vmul.f32 0.3275911, %v5368_v13  ;;  %v5391_v21 = vmul.f32 0.70710677, %v5371_v5  ;;  %v5394_v43 = vmul.f32 %v2211_v57, %v5160_v17 }
 0x1f1   :  { %v2210_v51 = vadd.f32 1.0, %v2146_v30  ;;  %v2148_v35 = vmul.f32 %v2084_v3, %v5231_v44  ;;  %v1925_v38 = vmul.f32 1.442695, %v1833_v32  ;;  %v2149_v61 = vmul.f32 %v2085_v33, %v5249_v0 }
 0x1f2   :  { %6820 = vst [vmem:[#allocation43_spill] sm:$0xff] %v5394_v43  ;;  %v5397_v58 = vpop.eup %3997  ;;  %v1638_v24 = vadd.f32 0.2548296, %v1574_v8  ;;  %v1771_v25 = vsub.f32 0.0, %v5266_v59  ;;  %v5402_v27 = vmul.f32 0.70710677, %v5384_v52  ;;  %v1703_v19 = vmul.f32 %v5240_v2, %v1639_v63 }
 0x1f3   :  { %v4000_v16 = vpop.eup %3999  ;;  %v1512_v17 = vadd.f32 -0.28449672, %v1448_v14  ;;  %v1385_v57 = vadd.f32 1.4214138, %v1321_v31  ;;  %4005 = vrcp.f32 %v1005_v1  ;;  %v5406_v44 = vmul.f32 0.5, %v5225_v9  ;;  %v441_v14 = vpop.f32.mrf.mxu0 }
 0x1f4   :  { %v1259_v30 = vadd.f32 -1.4531521, %v1195_v23  ;;  %v1007_v3 = vadd.f32 1.0, %v943_v53  ;;  %v5409_v0 = vand.u32 2147483647, %v5391_v21  ;;  %v5412_v32 = vmul.f32 %v2210_v51, %v5173_v56 }
 0x1f5   :  { %vm747_vm13 = vcmp.ge.f32.partialorder %v5243_v48, 0.0  ;;  %v1194_v33 = vmul.f32 1.0614054, %v5397_v58  ;;  %v5417_v2 = vand.u32 2147483647, %v5402_v27  ;;  %v2212_v8 = vadd.f32 1.0, %v2148_v35 }
 0x1f6   :  { %6821 = vst [vmem:[#allocation44_spill] sm:$0xff] %v5412_v32  ;;  %v1702_v63 = vmul.f32 %v5259_v6, %v1638_v24  ;;  %4007 = vpow2.f32 %v1925_v38  ;;  %v1835_v9 = vmul.f32 %v1771_v25, %v5266_v59  ;;  %v2213_v31 = vadd.f32 1.0, %v2149_v61 }
 0x1f7   :  { %v2023_v1 = vmul.f32 %v3994_v40, %v1703_v19  ;;  %v1576_v23 = vmul.f32 %v5299_v36, %v1512_v17  ;;  %vm746_vm14 = vcmp.ge.f32.partialorder %v5271_v15, 0.0  ;;  %v1449_v56 = vmul.f32 %v5334_v60, %v1385_v57 }
 0x1f8   :  { %v1323_v53 = vmul.f32 %v5373_v49, %v1259_v30  ;;  %4009 = vrcp.f32 %v1007_v3  ;;  %v942_v51 = vmul.f32 0.3275911, %v5409_v0  ;;  %v5429_v6 = vsel %vm747_vm13, 1.0, %v6776_v22  ;;  %v3867_v30 = vld [vmem:[#allocation8 + $0xc0] sm:$0xff]  }
 0x1f9   :  { %v1258_v59 = vadd.f32 -1.4531521, %v1194_v33  ;;  %v944_v35 = vmul.f32 0.3275911, %v5417_v2  ;;  %v5433_v19 = vadd.f32 %v441_v14, %v4455_v10  ;;  %v2022_v38 = vmul.f32 %v4000_v16, %v1702_v63  ;;  %v3866_v63 = vld [vmem:[#allocation8] sm:$0xff]   ;;  %3628 = vmatprep.subr.bf16.mxu1 %v3867_v30 }
 0x1fa   :  { %v5435_v40 = vpop.eup %4001  ;;  %v1929_v54 = vmul.f32 1.442695, %v1835_v9  ;;  %v5438_v61 = vmul.f32 0.5, %v5252_v29  ;;  %v1770_v24 = vsub.f32 0.0, %v5285_v47  ;;  %v5442_v25 = vmul.f32 %v2212_v8, %v5210_v55  ;;  %3565 = vmatpush3.bf16.msra.mxu0 %v3866_v63 }
 0x1fb   :  { %v2087_v48 = vsub.f32 1.0, %v2023_v1  ;;  %v1640_v17 = vadd.f32 0.2548296, %v1576_v23  ;;  %v5447_v57 = vsel %vm746_vm14, 1.0, %v6776_v22  ;;  %v5450_v3 = vmul.f32 %v2213_v31, %v5214_v4 }
 0x1fc   :  { %6822 = vst [vmem:[#allocation45_spill] sm:$0xff] %v5442_v25  ;;  %v1513_v16 = vadd.f32 -0.28449672, %v1449_v56  ;;  %v1387_v33 = vadd.f32 1.4214138, %v1323_v53  ;;  %v1006_v29 = vadd.f32 1.0, %v942_v51  ;;  %v4004_v9 = vpop.eup %4003  ;;  %v1322_v14 = vmul.f32 %v5397_v58, %v1258_v59  ;;  %v554_v51 = vpop.f32.mrf.mxu1 }
 0x1fd   :  { %6823 = vst [vmem:[#allocation46_spill] sm:$0xff] %v5450_v3  ;;  %v1196_v55 = vmul.f32 1.0614054, %v5435_v40  ;;  %v1008_v8 = vadd.f32 1.0, %v944_v35  ;;  %v5455_v1 = vmul.f32 0.70710677, %v5433_v19  ;;  %4011 = vpow2.f32 %v1929_v54 }
 0x1fe   :  { %v2086_v15 = vsub.f32 1.0, %v2022_v38  ;;  %v1834_v23 = vmul.f32 %v1770_v24, %v5285_v47  ;;  %v5459_v4 = vmul.f32 0.5, %v5288_v26  ;;  %v2151_v31 = vmul.f32 %v2087_v48, %v5280_v28 }
 0x1ff   :  { %v1704_v56 = vmul.f32 %v5299_v36, %v1640_v17  ;;  %vm748_vm15 = vcmp.ge.f32.partialorder %v5306_v39, 0.0  ;;  %v1772_v53 = vsub.f32 0.0, %v5324_v12  ;;  %v1577_v35 = vmul.f32 %v5334_v60, %v1513_v16 }
 0x200   :  { %v5465_v59 = vpop.eup %4005  ;;  %v1451_v38 = vmul.f32 %v5373_v49, %v1387_v33  ;;  %v1773_v47 = vsub.f32 0.0, %v5350_v42  ;;  %4013 = vrcp.f32 %v1006_v29  ;;  %v1386_v26 = vadd.f32 1.4214138, %v1322_v14  ;;  %v443_v14 = vpop.f32.mrf.mxu0 }
 0x201   :  { %v1260_v54 = vadd.f32 -1.4531521, %v1196_v55  ;;  %4015 = vrcp.f32 %v1008_v8  ;;  %v5471_v28 = vand.u32 2147483647, %v5455_v1  ;;  %v2150_v36 = vmul.f32 %v2086_v15, %v5320_v37 }
 0x202   :  { %v1927_v24 = vmul.f32 1.442695, %v1834_v23  ;;  %v5475_v48 = vmul.f32 0.5, %v5313_v62  ;;  %v5478_v17 = vadd.f32 %v554_v51, %v4457_v11  ;;  %v2215_v16 = vadd.f32 1.0, %v2151_v31  ;;  %v447_v32 = vpop.f32.mrf.mxu0 }
 0x203   :  { %v4008_v30 = vpop.eup %4007  ;;  %v2024_v33 = vmul.f32 %v4004_v9, %v1704_v56  ;;  %v1836_v29 = vmul.f32 %v1772_v53, %v5324_v12  ;;  %v1197_v63 = vmul.f32 1.0614054, %v5465_v59  ;;  %v1641_v55 = vadd.f32 0.2548296, %v1577_v35 }
 0x204   :  { %6824 = vst [vmem:[#allocation47_spill] sm:$0xff] %v5475_v48  ;;  %v5485_v37 = vsel %vm748_vm15, 1.0, %v6776_v22  ;;  %vm749_vm0 = vcmp.ge.f32.partialorder %v5332_v45, 0.0  ;;  %v1837_v62 = vmul.f32 %v1773_v47, %v5350_v42  ;;  %v1515_v15 = vadd.f32 -0.28449672, %v1451_v38 }
 0x205   :  { %v5489_v8 = vpop.eup %4009  ;;  %v1450_v9 = vmul.f32 %v5397_v58, %v1386_v26  ;;  %v1324_v12 = vmul.f32 %v5435_v40, %v1260_v54  ;;  %v945_v23 = vmul.f32 0.3275911, %v5471_v28  ;;  %v2214_v31 = vadd.f32 1.0, %v2150_v36 }
 0x206   :  { %4017 = vpow2.f32 %v1927_v24  ;;  %v5495_v56 = vmul.f32 0.70710677, %v5478_v17  ;;  %v5498_v39 = vadd.f32 %v443_v14, %v4465_v18  ;;  %v5501_v53 = vmul.f32 %v2215_v16, %v5257_v46  ;;  %v556_v46 = vpop.f32.mrf.mxu1  ;;  %v6826_v16 = vld [vmem:[#allocation38_spill] sm:$0xff] }
 0x207   :  { %v2088_v42 = vsub.f32 1.0, %v2024_v33  ;;  %v1931_v51 = vmul.f32 1.442695, %v1836_v29  ;;  %v1261_v35 = vadd.f32 -1.4531521, %v1197_v63  ;;  %v1705_v38 = vmul.f32 %v5334_v60, %v1641_v55  ;;  %v3868_v63 = vld [vmem:[#allocation8 + $0x80] sm:$0xff]  }
 0x208   :  { %6825 = vst [vmem:[#allocation48_spill] sm:$0xff] %v5501_v53  ;;  %v5507_v47 = vsel %vm749_vm0, 1.0, %v6776_v22  ;;  %v1933_v26 = vmul.f32 1.442695, %v1837_v62  ;;  %v1199_v54 = vmul.f32 1.0614054, %v5489_v8  ;;  %v1579_v36 = vmul.f32 %v5373_v49, %v1515_v15  ;;  %3629 = vmatpush3.bf16.msra.mxu1 %v3868_v63 }
 0x209   :  { %v1514_v24 = vadd.f32 -0.28449672, %v1450_v9  ;;  %v1388_v14 = vadd.f32 1.4214138, %v1324_v12  ;;  %v1009_v3 = vadd.f32 1.0, %v945_v23  ;;  %v5512_v33 = vmul.f32 %v2214_v31, %v6826_v16 }
 0x20a   :  { %v5515_v29 = vmul.f32 0.5, %v5338_v34  ;;  %v5518_v60 = vand.u32 2147483647, %v5495_v56  ;;  %v5521_v45 = vmul.f32 0.70710677, %v5498_v39  ;;  %v4012_v55 = vpop.eup %4011  ;;  %v2152_v62 = vmul.f32 %v2088_v42, %v5345_v41 }
 0x20b   :  { %6827 = vst [vmem:[#allocation38_spill] sm:$0xff] %v5512_v33  ;;  %4019 = vpow2.f32 %v1931_v51  ;;  %v1325_v15 = vmul.f32 %v5465_v59, %v1261_v35  ;;  %v5526_v9 = vmul.f32 0.5, %v5371_v5  ;;  %vm751_vm1 = vcmp.ge.f32.partialorder %v5358_v7, 0.0 }
 0x20c   :  { %6828 = vst [vmem:[#allocation49_spill] sm:$0xff] %v5515_v29  ;;  %v1263_v34 = vadd.f32 -1.4531521, %v1199_v54  ;;  %v1775_v12 = vsub.f32 0.0, %v5368_v13  ;;  %v5531_v23 = vadd.f32 %v556_v46, %v4467_v20  ;;  %v2025_v16 = vmul.f32 %v4008_v30, %v1705_v38 }
 0x20d   :  { %6829 = vst [vmem:[#allocation50_spill] sm:$0xff] %v5526_v9  ;;  %v5533_v31 = vpop.eup %4013  ;;  %v1643_v53 = vadd.f32 0.2548296, %v1579_v36  ;;  %v1452_v41 = vmul.f32 %v5435_v40, %v1388_v14  ;;  %4021 = vrcp.f32 %v1009_v3  ;;  %v1578_v5 = vmul.f32 %v5397_v58, %v1514_v24 }
 0x20e   :  { %6830 = vst [vmem:[#allocation51_spill] sm:$0xff] %v5531_v23  ;;  %v5536_v42 = vpop.eup %4015  ;;  %4023 = vpow2.f32 %v1933_v26  ;;  %v947_v51 = vmul.f32 0.3275911, %v5518_v60  ;;  %v5541_v35 = vand.u32 2147483647, %v5521_v45  ;;  %v2216_v54 = vadd.f32 1.0, %v2152_v62 }
 0x20f   :  { %v1389_v46 = vadd.f32 1.4214138, %v1325_v15  ;;  %vm750_vm2 = vcmp.ge.f32.partialorder %v5391_v21, 0.0  ;;  %v1774_v30 = vsub.f32 0.0, %v5409_v0  ;;  %v1327_v38 = vmul.f32 %v5489_v8, %v1263_v34 }
 0x210   :  { %v1839_v3 = vmul.f32 %v1775_v12, %v5368_v13  ;;  %v1198_v36 = vmul.f32 1.0614054, %v5533_v31  ;;  %v5549_v24 = vmul.f32 0.70710677, %v5531_v23  ;;  %v2089_v26 = vsub.f32 1.0, %v2025_v16 }
 0x211   :  { %v1707_v14 = vmul.f32 %v5373_v49, %v1643_v53  ;;  %v1516_v63 = vadd.f32 -0.28449672, %v1452_v41  ;;  %v1200_v62 = vmul.f32 1.0614054, %v5536_v42  ;;  %v1642_v15 = vadd.f32 0.2548296, %v1578_v5 }
 0x212   :  { %v5556_v43 = vsel %vm751_vm1, 1.0, %v6776_v22  ;;  %v1011_v34 = vadd.f32 1.0, %v947_v51  ;;  %v946_v13 = vmul.f32 0.3275911, %v5541_v35  ;;  %v1453_v33 = vmul.f32 %v5465_v59, %v1389_v46  ;;  %v6832_v41 = vld [vmem:[#allocation39_spill] sm:$0xff] }
 0x213   :  { %v4018_v12 = vpop.eup %4017  ;;  %v5563_v16 = vsel %vm750_vm2, 1.0, %v6776_v22  ;;  %v1838_v49 = vmul.f32 %v1774_v30, %v5409_v0  ;;  %v5567_v53 = vand.u32 2147483647, %v5549_v24  ;;  %v5570_v7 = vmul.f32 %v2216_v54, %v6832_v41 }
 0x214   :  { %6831 = vst [vmem:[#allocation52_spill] sm:$0xff] %v5563_v16  ;;  %v1391_v5 = vadd.f32 1.4214138, %v1327_v38  ;;  %v1937_v51 = vmul.f32 1.442695, %v1839_v3  ;;  %v2153_v9 = vmul.f32 %v2089_v26, %v5381_v50  ;;  %v2027_v46 = vmul.f32 %v4012_v55, %v1707_v14  ;;  %v560_v14 = vpop.f32.mrf.mxu1 }
 0x215   :  { %6833 = vst [vmem:[#allocation39_spill] sm:$0xff] %v5570_v7  ;;  %v1262_v25 = vadd.f32 -1.4531521, %v1198_v36  ;;  %v1580_v29 = vmul.f32 %v5435_v40, %v1516_v63  ;;  %v1264_v21 = vadd.f32 -1.4531521, %v1200_v62  ;;  %v1706_v16 = vmul.f32 %v5397_v58, %v1642_v15 }
 0x216   :  { %v1776_v0 = vsub.f32 0.0, %v5417_v2  ;;  %4025 = vrcp.f32 %v1011_v34  ;;  %v1010_v30 = vadd.f32 1.0, %v946_v13  ;;  %v1517_v23 = vadd.f32 -0.28449672, %v1453_v33 }
 0x217   :  { %v1935_v48 = vmul.f32 1.442695, %v1838_v49  ;;  %v948_v54 = vmul.f32 0.3275911, %v5567_v53  ;;  %v5578_v38 = vadd.f32 %v447_v32, %v4455_v10  ;;  %v1455_v50 = vmul.f32 %v5489_v8, %v1391_v5 }
 0x218   :  { %v4020_v3 = vpop.eup %4019  ;;  %4027 = vpow2.f32 %v1937_v51  ;;  %v1326_v55 = vmul.f32 %v5533_v31, %v1262_v25  ;;  %v5583_v36 = vmul.f32 0.5, %v5384_v52  ;;  %v2217_v58 = vadd.f32 1.0, %v2153_v9 }
 0x219   :  { %v1644_v26 = vadd.f32 0.2548296, %v1580_v29  ;;  %vm752_vm3 = vcmp.ge.f32.partialorder %v5402_v27, 0.0  ;;  %v1328_v33 = vmul.f32 %v5536_v42, %v1264_v21  ;;  %v2091_v32 = vsub.f32 1.0, %v2027_v46  ;;  %v449_v21 = vpop.f32.mrf.mxu0 }
 0x21a   :  { %v5587_v63 = vpop.eup %4021  ;;  %v2026_v62 = vmul.f32 %v4018_v12, %v1706_v16  ;;  %v1840_v15 = vmul.f32 %v1776_v0, %v5417_v2  ;;  %4029 = vrcp.f32 %v1010_v30  ;;  %v1581_v25 = vmul.f32 %v5465_v59, %v1517_v23  ;;  %v6834_v12 = vld [vmem:[#allocation42_spill] sm:$0xff] }
 0x21b   :  { %v4024_v34 = vpop.eup %4023  ;;  %4031 = vpow2.f32 %v1935_v48  ;;  %v1012_v52 = vadd.f32 1.0, %v948_v54  ;;  %v5592_v9 = vmul.f32 0.70710677, %v5578_v38  ;;  %v1519_v29 = vadd.f32 -0.28449672, %v1455_v50 }
 0x21c   :  { %v1390_v27 = vadd.f32 1.4214138, %v1326_v55  ;;  %v5595_v13 = vsel %vm752_vm3, 1.0, %v6776_v22  ;;  %v5598_v49 = vadd.f32 %v560_v14, %v4457_v11  ;;  %v5601_v16 = vmul.f32 %v2217_v58, %v6834_v12 }
 0x21d   :  { %v1708_v2 = vmul.f32 %v5435_v40, %v1644_v26  ;;  %v1392_v41 = vadd.f32 1.4214138, %v1328_v33  ;;  %v1201_v48 = vmul.f32 1.0614054, %v5587_v63  ;;  %v2155_v23 = vmul.f32 %v2091_v32, %v5429_v6 }
 0x21e   :  { %6835 = vst [vmem:[#allocation42_spill] sm:$0xff] %v5601_v16  ;;  %v2090_v5 = vsub.f32 1.0, %v2026_v62  ;;  %v1939_v51 = vmul.f32 1.442695, %v1840_v15  ;;  %v5607_v46 = vmul.f32 0.5, %v5433_v19  ;;  %vm753_vm4 = vcmp.ge.f32.partialorder %v5455_v1, 0.0 }
 0x21f   :  { %v1645_v0 = vadd.f32 0.2548296, %v1581_v25  ;;  %4033 = vrcp.f32 %v1012_v52  ;;  %v5611_v30 = vand.u32 2147483647, %v5592_v9  ;;  %v1583_v40 = vmul.f32 %v5489_v8, %v1519_v29 }
 0x220   :  { %v1454_v54 = vmul.f32 %v5533_v31, %v1390_v27  ;;  %v1777_v50 = vsub.f32 0.0, %v5471_v28  ;;  %v5617_v6 = vmul.f32 0.70710677, %v5598_v49  ;;  %v2028_v55 = vmul.f32 %v4020_v3, %v1708_v2  ;;  %v562_v27 = vpop.f32.mrf.mxu1 }
 0x221   :  { %v1456_v19 = vmul.f32 %v5536_v42, %v1392_v41  ;;  %v1265_v58 = vadd.f32 -1.4531521, %v1201_v48  ;;  %v5621_v26 = vadd.f32 %v449_v21, %v4465_v18  ;;  %v2219_v1 = vadd.f32 1.0, %v2155_v23 }
 0x222   :  { %v2154_v33 = vmul.f32 %v2090_v5, %v5447_v57  ;;  %v5625_v14 = vsel %vm753_vm4, 1.0, %v6776_v22  ;;  %v5628_v32 = vmul.f32 0.5, %v5478_v17  ;;  %v1709_v15 = vmul.f32 %v5465_v59, %v1645_v0 }
 0x223   :  { %v5630_v62 = vpop.eup %4025  ;;  %4035 = vpow2.f32 %v1939_v51  ;;  %vm755_vm5 = vcmp.ge.f32.partialorder %v5495_v56, 0.0  ;;  %v949_v3 = vmul.f32 0.3275911, %v5611_v30  ;;  %v1647_v25 = vadd.f32 0.2548296, %v1583_v40 }
 0x224   :  { %v1518_v52 = vadd.f32 -0.28449672, %v1454_v54  ;;  %v1841_v29 = vmul.f32 %v1777_v50, %v5471_v28  ;;  %v5637_v57 = vand.u32 2147483647, %v5617_v6  ;;  %v2092_v17 = vsub.f32 1.0, %v2028_v55 }
 0x225   :  { %v4028_v12 = vpop.eup %4027  ;;  %v1520_v2 = vadd.f32 -0.28449672, %v1456_v19  ;;  %v1329_v41 = vmul.f32 %v5587_v63, %v1265_v58  ;;  %v5641_v59 = vmul.f32 0.70710677, %v5621_v26  ;;  %v5644_v48 = vmul.f32 %v2219_v1, %v5406_v44 }
 0x226   :  { %v2218_v23 = vadd.f32 1.0, %v2154_v33  ;;  %v1203_v5 = vmul.f32 1.0614054, %v5630_v62  ;;  %v1779_v28 = vsub.f32 0.0, %v5518_v60  ;;  %v2029_v21 = vmul.f32 %v4024_v34, %v1709_v15 }
 0x227   :  { %6836 = vst [vmem:[#allocation53_spill] sm:$0xff] %v5644_v48  ;;  %v5648_v51 = vpop.eup %4029  ;;  %v5653_v0 = vsel %vm755_vm5, 1.0, %v6776_v22  ;;  %v1013_v40 = vadd.f32 1.0, %v949_v3  ;;  %v5656_v54 = vadd.f32 %v562_v27, %v4467_v20  ;;  %v1711_v44 = vmul.f32 %v5489_v8, %v1647_v25 }
 0x228   :  { %v4032_v50 = vpop.eup %4031  ;;  %v1582_v55 = vmul.f32 %v5533_v31, %v1518_v52  ;;  %v951_v19 = vmul.f32 0.3275911, %v5637_v57  ;;  %v5662_v58 = vand.u32 2147483647, %v5641_v59  ;;  %v2156_v34 = vmul.f32 %v2092_v17, %v5485_v37  ;;  %v451_v37 = vpop.f32.mrf.mxu0 }
 0x229   :  { %v1584_v56 = vmul.f32 %v5536_v42, %v1520_v2  ;;  %v1393_v1 = vadd.f32 1.4214138, %v1329_v41  ;;  %v1941_v33 = vmul.f32 1.442695, %v1841_v29  ;;  %v5667_v15 = vmul.f32 %v2218_v23, %v5438_v61 }
 0x22a   :  { %v1267_v3 = vadd.f32 -1.4531521, %v1203_v5  ;;  %v1843_v27 = vmul.f32 %v1779_v28, %v5518_v60  ;;  %v1202_v8 = vmul.f32 1.0614054, %v5648_v51  ;;  %v2093_v25 = vsub.f32 1.0, %v2029_v21 }
 0x22b   :  { %6837 = vst [vmem:[#allocation54_spill] sm:$0xff] %v5667_v15  ;;  %v5672_v52 = vmul.f32 0.5, %v5498_v39  ;;  %4037 = vrcp.f32 %v1013_v40  ;;  %v5675_v48 = vmul.f32 0.70710677, %v5656_v54  ;;  %v2031_v29 = vmul.f32 %v4028_v12, %v1711_v44 }
 0x22c   :  { %v5677_v17 = vpop.eup %4033  ;;  %v1646_v2 = vadd.f32 0.2548296, %v1582_v55  ;;  %v1015_v61 = vadd.f32 1.0, %v951_v19  ;;  %v950_v41 = vmul.f32 0.3275911, %v5662_v58  ;;  %v2220_v23 = vadd.f32 1.0, %v2156_v34 }
 0x22d   :  { %v1648_v60 = vadd.f32 0.2548296, %v1584_v56  ;;  %v1457_v5 = vmul.f32 %v5587_v63, %v1393_v1  ;;  %4039 = vpow2.f32 %v1941_v33  ;;  %v1331_v39 = vmul.f32 %v5630_v62, %v1267_v3 }
 0x22e   :  { %v1945_v28 = vmul.f32 1.442695, %v1843_v27  ;;  %v1266_v21 = vadd.f32 -1.4531521, %v1202_v8  ;;  %v5683_v40 = vadd.f32 %v451_v37, %v4455_v10  ;;  %v2157_v16 = vmul.f32 %v2093_v25, %v5507_v47  ;;  %v564_v37 = vpop.f32.mrf.mxu1 }
 0x22f   :  { %v1778_v12 = vsub.f32 0.0, %v5541_v35  ;;  %v1204_v44 = vmul.f32 1.0614054, %v5677_v17  ;;  %v5689_v55 = vand.u32 2147483647, %v5675_v48  ;;  %v2095_v34 = vsub.f32 1.0, %v2031_v29 }
 0x230   :  { %v4036_v19 = vpop.eup %4035  ;;  %v1710_v56 = vmul.f32 %v5533_v31, %v1646_v2  ;;  %4041 = vrcp.f32 %v1015_v61  ;;  %v1014_v1 = vadd.f32 1.0, %v950_v41  ;;  %v5693_v33 = vmul.f32 %v2220_v23, %v5459_v4 }
 0x231   :  { %v1712_v3 = vmul.f32 %v5536_v42, %v1648_v60  ;;  %v1521_v27 = vadd.f32 -0.28449672, %v1457_v5  ;;  %vm754_vm6 = vcmp.ge.f32.partialorder %v5521_v45, 0.0  ;;  %v1395_v47 = vadd.f32 1.4214138, %v1331_v39  ;;  %v6839_v39 = vld [vmem:[#allocation47_spill] sm:$0xff] }
 0x232   :  { %6838 = vst [vmem:[#allocation55_spill] sm:$0xff] %v5693_v33  ;;  %4043 = vpow2.f32 %v1945_v28  ;;  %v1330_v8 = vmul.f32 %v5648_v51, %v1266_v21  ;;  %v5699_v25 = vmul.f32 0.70710677, %v5683_v40  ;;  %v2221_v29 = vadd.f32 1.0, %v2157_v16  ;;  %v6841_v21 = vld [vmem:[#allocation51_spill] sm:$0xff] }
 0x233   :  { %v1842_v31 = vmul.f32 %v1778_v12, %v5541_v35  ;;  %v1268_v2 = vadd.f32 -1.4531521, %v1204_v44  ;;  %v952_v4 = vmul.f32 0.3275911, %v5689_v55  ;;  %v2159_v61 = vmul.f32 %v2095_v34, %v5556_v43 }
 0x234   :  { %v2030_v42 = vmul.f32 %v4032_v50, %v1710_v56  ;;  %vm756_vm7 = vcmp.ge.f32.partialorder %v5549_v24, 0.0  ;;  %4045 = vrcp.f32 %v1014_v1  ;;  %v2032_v41 = vmul.f32 %v4036_v19, %v1712_v3 }
 0x235   :  { %v1585_v23 = vmul.f32 %v5587_v63, %v1521_v27  ;;  %v1780_v60 = vsub.f32 0.0, %v5567_v53  ;;  %v5708_v5 = vadd.f32 %v564_v37, %v4457_v11  ;;  %v1459_v16 = vmul.f32 %v5630_v62, %v1395_v47  ;;  %v453_v27 = vpop.f32.mrf.mxu0 }
 0x236   :  { %v5714_v35 = vsel %vm754_vm6, 1.0, %v6776_v22  ;;  %v1394_v43 = vadd.f32 1.4214138, %v1330_v8  ;;  %v5717_v50 = vand.u32 2147483647, %v5699_v25  ;;  %v5720_v28 = vmul.f32 %v2221_v29, %v6839_v39 }
 0x237   :  { %v5723_v12 = vmul.f32 0.5, %v6841_v21  ;;  %v1332_v44 = vmul.f32 %v5677_v17, %v1268_v2  ;;  %v1016_v19 = vadd.f32 1.0, %v952_v4  ;;  %v2223_v56 = vadd.f32 1.0, %v2159_v61  ;;  %v6844_v21 = vld [vmem:[#allocation49_spill] sm:$0xff] }
 0x238   :  { %6840 = vst [vmem:[#allocation47_spill] sm:$0xff] %v5720_v28  ;;  %v5726_v34 = vpop.eup %4037  ;;  %v2094_v1 = vsub.f32 1.0, %v2030_v42  ;;  %v1943_v45 = vmul.f32 1.442695, %v1842_v31  ;;  %v5731_v3 = vsel %vm756_vm7, 1.0, %v6776_v22  ;;  %v2096_v47 = vsub.f32 1.0, %v2032_v41 }
 0x239   :  { %v1649_v8 = vadd.f32 0.2548296, %v1585_v23  ;;  %v1844_v37 = vmul.f32 %v1780_v60, %v5567_v53  ;;  %v5735_v29 = vmul.f32 0.70710677, %v5708_v5  ;;  %v1523_v4 = vadd.f32 -0.28449672, %v1459_v16 }
 0x23a   :  { %v4040_v2 = vpop.eup %4039  ;;  %v1458_v39 = vmul.f32 %v5648_v51, %v1394_v43  ;;  %v1781_v61 = vsub.f32 0.0, %v5611_v30  ;;  %v953_v31 = vmul.f32 0.3275911, %v5717_v50  ;;  %v1396_v42 = vadd.f32 1.4214138, %v1332_v44  ;;  %v6842_v23 = vld [vmem:[#allocation52_spill] sm:$0xff] }
 0x23b   :  { %v1205_v24 = vmul.f32 1.0614054, %v5726_v34  ;;  %4047 = vrcp.f32 %v1016_v19  ;;  %v5742_v41 = vadd.f32 %v453_v27, %v4465_v18  ;;  %v2158_v53 = vmul.f32 %v2094_v1, %v6842_v23 }
 0x23c   :  { %4049 = vpow2.f32 %v1943_v45  ;;  %v5746_v60 = vmul.f32 0.5, %v5578_v38  ;;  %v5749_v16 = vand.u32 2147483647, %v5735_v29  ;;  %v5754_v28 = vmul.f32 %v2223_v56, %v6844_v21  ;;  %v566_v21 = vpop.f32.mrf.mxu1 }
 0x23d   :  { %v5751_v43 = vpop.eup %4041  ;;  %v2160_v44 = vmul.f32 %v2096_v47, %v5595_v13  ;;  %v1713_v19 = vmul.f32 %v5587_v63, %v1649_v8  ;;  %vm757_vm8 = vcmp.ge.f32.partialorder %v5592_v9, 0.0  ;;  %v1587_v1 = vmul.f32 %v5630_v62, %v1523_v4 }
 0x23e   :  { %6843 = vst [vmem:[#allocation51_spill] sm:$0xff] %v5746_v60  ;;  %6845 = vst [vmem:[#allocation52_spill] sm:$0xff] %v5754_v28  ;;  %v1947_v45 = vmul.f32 1.442695, %v1844_v37  ;;  %v1845_v38 = vmul.f32 %v1781_v61, %v5611_v30  ;;  %v1017_v27 = vadd.f32 1.0, %v953_v31  ;;  %v1460_v7 = vmul.f32 %v5677_v17, %v1396_v42  ;;  %v6846_v60 = vld [vmem:[#allocation50_spill] sm:$0xff] }
 0x23f   :  { %v4044_v23 = vpop.eup %4043  ;;  %v1522_v33 = vadd.f32 -0.28449672, %v1458_v39  ;;  %v1269_v15 = vadd.f32 -1.4531521, %v1205_v24  ;;  %v5763_v56 = vmul.f32 0.70710677, %v5742_v41  ;;  %v2033_v37 = vmul.f32 %v4040_v2, %v1713_v19 }
 0x240   :  { %v2222_v13 = vadd.f32 1.0, %v2158_v53  ;;  %v5766_v63 = vsel %vm757_vm8, 1.0, %v6776_v22  ;;  %v1207_v9 = vmul.f32 1.0614054, %v5751_v43  ;;  %v955_v47 = vmul.f32 0.3275911, %v5749_v16 }
 0x241   :  { %v5770_v8 = vpop.eup %4045  ;;  %v2224_v30 = vadd.f32 1.0, %v2160_v44  ;;  %vm759_vm9 = vcmp.ge.f32.partialorder %v5617_v6, 0.0  ;;  %v1783_v4 = vsub.f32 0.0, %v5637_v57  ;;  %v1651_v39 = vadd.f32 0.2548296, %v1587_v1 }
 0x242   :  { %v1949_v61 = vmul.f32 1.442695, %v1845_v38  ;;  %4051 = vrcp.f32 %v1017_v27  ;;  %v5775_v31 = vadd.f32 %v566_v21, %v4467_v20  ;;  %v1586_v42 = vmul.f32 %v5648_v51, %v1522_v33 }
 0x243   :  { %v1524_v24 = vadd.f32 -0.28449672, %v1460_v7  ;;  %v1333_v53 = vmul.f32 %v5726_v34, %v1269_v15  ;;  %v5780_v28 = vand.u32 2147483647, %v5763_v56  ;;  %4053 = vpow2.f32 %v1947_v45 }
 0x244   :  { %v1271_v2 = vadd.f32 -1.4531521, %v1207_v9  ;;  %v1206_v44 = vmul.f32 1.0614054, %v5770_v8  ;;  %v1019_v19 = vadd.f32 1.0, %v955_v47  ;;  %v5784_v1 = vmul.f32 %v2222_v13, %v6846_v60  ;;  %v457_v60 = vpop.f32.mrf.mxu0 }
 0x245   :  { %v2097_v38 = vsub.f32 1.0, %v2033_v37  ;;  %v5787_v27 = vmul.f32 0.5, %v5598_v49  ;;  %v1847_v33 = vmul.f32 %v1783_v4, %v5637_v57  ;;  %v5791_v7 = vmul.f32 %v2224_v30, %v5583_v36 }
 0x246   :  { %6847 = vst [vmem:[#allocation49_spill] sm:$0xff] %v5784_v1  ;;  %v1715_v15 = vmul.f32 %v5630_v62, %v1651_v39  ;;  %v5797_v45 = vsel %vm759_vm9, 1.0, %v6776_v22  ;;  %v5800_v21 = vmul.f32 0.70710677, %v5775_v31  ;;  %v1650_v13 = vadd.f32 0.2548296, %v1586_v42 }
 0x247   :  { %6848 = vst [vmem:[#allocation50_spill] sm:$0xff] %v5791_v7  ;;  %v1397_v9 = vadd.f32 1.4214138, %v1333_v53  ;;  %4055 = vpow2.f32 %v1949_v61  ;;  %v954_v49 = vmul.f32 0.3275911, %v5780_v28  ;;  %v1588_v36 = vmul.f32 %v5677_v17, %v1524_v24 }
 0x248   :  { %v5803_v57 = vpop.eup %4047  ;;  %v1335_v62 = vmul.f32 %v5751_v43, %v1271_v2  ;;  %v1270_v47 = vadd.f32 -1.4531521, %v1206_v44  ;;  %4057 = vrcp.f32 %v1019_v19  ;;  %v2161_v30 = vmul.f32 %v2097_v38, %v5625_v14 }
 0x249   :  { %v4050_v6 = vpop.eup %4049  ;;  %v1953_v37 = vmul.f32 1.442695, %v1847_v33  ;;  %v1782_v4 = vsub.f32 0.0, %v5662_v58  ;;  %v5810_v39 = vadd.f32 %v457_v60, %v4455_v10  ;;  %v2035_v61 = vmul.f32 %v4044_v23, %v1715_v15 }
 0x24a   :  { %v5813_v42 = vmul.f32 0.5, %v5621_v26  ;;  %vm758_vm10 = vcmp.ge.f32.partialorder %v5641_v59, 0.0  ;;  %v5817_v24 = vand.u32 2147483647, %v5800_v21  ;;  %v1714_v53 = vmul.f32 %v5648_v51, %v1650_v13 }
 0x24b   :  { %v1461_v2 = vmul.f32 %v5726_v34, %v1397_v9  ;;  %v1208_v14 = vmul.f32 1.0614054, %v5803_v57  ;;  %v1018_v44 = vadd.f32 1.0, %v954_v49  ;;  %v1652_v19 = vadd.f32 0.2548296, %v1588_v36 }
 0x24c   :  { %v1399_v38 = vadd.f32 1.4214138, %v1335_v62  ;;  %v1334_v33 = vmul.f32 %v5770_v8, %v1270_v47  ;;  %v956_v23 = vmul.f32 0.3275911, %v5817_v24  ;;  %v2225_v26 = vadd.f32 1.0, %v2161_v30 }
 0x24d   :  { %4059 = vpow2.f32 %v1953_v37  ;;  %v1846_v59 = vmul.f32 %v1782_v4, %v5662_v58  ;;  %v5826_v15 = vmul.f32 0.70710677, %v5810_v39  ;;  %v2099_v60 = vsub.f32 1.0, %v2035_v61 }
 0x24e   :  { %v5829_v51 = vsel %vm758_vm10, 1.0, %v6776_v22  ;;  %v5832_v13 = vmul.f32 0.5, %v5656_v54  ;;  %v1784_v9 = vsub.f32 0.0, %v5689_v55  ;;  %v2034_v36 = vmul.f32 %v4050_v6, %v1714_v53 }
 0x24f   :  { %v5835_v49 = vpop.eup %4051  ;;  %v1525_v62 = vadd.f32 -0.28449672, %v1461_v2  ;;  %v1272_v47 = vadd.f32 -1.4531521, %v1208_v14  ;;  %4061 = vrcp.f32 %v1018_v44  ;;  %v1716_v58 = vmul.f32 %v5677_v17, %v1652_v19  ;;  %v570_v2 = vpop.f32.mrf.mxu1 }
 0x250   :  { %6849 = vst [vmem:[#allocation56_spill] sm:$0xff] %v5832_v13  ;;  %v1463_v30 = vmul.f32 %v5751_v43, %v1399_v38  ;;  %v1398_v37 = vadd.f32 1.4214138, %v1334_v33  ;;  %v1020_v4 = vadd.f32 1.0, %v956_v23  ;;  %v4054_v61 = vpop.eup %4053  ;;  %v5840_v7 = vmul.f32 %v2225_v26, %v5607_v46 }
 0x251   :  { %v1951_v54 = vmul.f32 1.442695, %v1846_v59  ;;  %v5843_v1 = vmul.f32 0.5, %v5683_v40  ;;  %v5846_v13 = vand.u32 2147483647, %v5826_v15  ;;  %v2163_v6 = vmul.f32 %v2099_v60, %v5653_v0 }
 0x252   :  { %6850 = vst [vmem:[#allocation57_spill] sm:$0xff] %v5840_v7  ;;  %vm760_vm11 = vcmp.ge.f32.partialorder %v5675_v48, 0.0  ;;  %v1848_v17 = vmul.f32 %v1784_v9, %v5689_v55  ;;  %v1209_v53 = vmul.f32 1.0614054, %v5835_v49  ;;  %v2098_v14 = vsub.f32 1.0, %v2034_v36  ;;  %v459_v36 = vpop.f32.mrf.mxu0 }
 0x253   :  { %v1589_v46 = vmul.f32 %v5726_v34, %v1525_v62  ;;  %v1336_v44 = vmul.f32 %v5803_v57, %v1272_v47  ;;  %v1785_v40 = vsub.f32 0.0, %v5717_v50  ;;  %v2036_v38 = vmul.f32 %v4054_v61, %v1716_v58 }
 0x254   :  { %v4056_v19 = vpop.eup %4055  ;;  %v1527_v33 = vadd.f32 -0.28449672, %v1463_v30  ;;  %v1462_v23 = vmul.f32 %v5770_v8, %v1398_v37  ;;  %4063 = vrcp.f32 %v1020_v4  ;;  %v5859_v48 = vsel %vm760_vm11, 1.0, %v6776_v22 }
 0x255   :  { %v5856_v0 = vpop.eup %4057  ;;  %4065 = vpow2.f32 %v1951_v54  ;;  %v957_v55 = vmul.f32 0.3275911, %v5846_v13  ;;  %v5863_v26 = vadd.f32 %v570_v2, %v4457_v11  ;;  %v2227_v59 = vadd.f32 1.0, %v2163_v6 }
 0x256   :  { %v1955_v60 = vmul.f32 1.442695, %v1848_v17  ;;  %vm761_vm12 = vcmp.ge.f32.partialorder %v5699_v25, 0.0  ;;  %v1273_v9 = vadd.f32 -1.4531521, %v1209_v53  ;;  %v2162_v62 = vmul.f32 %v2098_v14, %v5714_v35 }
 0x257   :  { %v1653_v47 = vadd.f32 0.2548296, %v1589_v46  ;;  %v1400_v58 = vadd.f32 1.4214138, %v1336_v44  ;;  %v1849_v30 = vmul.f32 %v1785_v40, %v5717_v50  ;;  %v2100_v37 = vsub.f32 1.0, %v2036_v38  ;;  %v572_v46 = vpop.f32.mrf.mxu1 }
 0x258   :  { %v1591_v4 = vmul.f32 %v5751_v43, %v1527_v33  ;;  %v1526_v61 = vadd.f32 -0.28449672, %v1462_v23  ;;  %v1211_v54 = vmul.f32 1.0614054, %v5856_v0  ;;  %v5871_v2 = vsel %vm761_vm12, 1.0, %v6776_v22 }
 0x259   :  { %v1021_v6 = vadd.f32 1.0, %v957_v55  ;;  %v5874_v25 = vmul.f32 0.70710677, %v5863_v26  ;;  %v5877_v17 = vadd.f32 %v459_v36, %v4465_v18  ;;  %v5880_v53 = vmul.f32 %v2227_v59, %v5628_v32 }
 0x25a   :  { %v4060_v35 = vpop.eup %4059  ;;  %4067 = vpow2.f32 %v1955_v60  ;;  %v1337_v50 = vmul.f32 %v5835_v49, %v1273_v9  ;;  %v1787_v14 = vsub.f32 0.0, %v5749_v16  ;;  %v2226_v44 = vadd.f32 1.0, %v2162_v62 }
 0x25b   :  { %6851 = vst [vmem:[#allocation58_spill] sm:$0xff] %v5880_v53  ;;  %v1717_v40 = vmul.f32 %v5726_v34, %v1653_v47  ;;  %v1464_v38 = vmul.f32 %v5803_v57, %v1400_v58  ;;  %v1957_v33 = vmul.f32 1.442695, %v1849_v30  ;;  %v2164_v55 = vmul.f32 %v2100_v37, %v5731_v3 }
 0x25c   :  { %v5886_v23 = vpop.eup %4061  ;;  %v1655_v36 = vadd.f32 0.2548296, %v1591_v4  ;;  %v1590_v32 = vmul.f32 %v5770_v8, %v1526_v61  ;;  %v1275_v59 = vadd.f32 -1.4531521, %v1211_v54  ;;  %4069 = vrcp.f32 %v1021_v6 }
 0x25d   :  { %v5891_v60 = vand.u32 2147483647, %v5874_v25  ;;  %v5894_v9 = vmul.f32 0.70710677, %v5877_v17  ;;  %v5897_v34 = vadd.f32 %v572_v46, %v4467_v20  ;;  %v1401_v62 = vadd.f32 1.4214138, %v1337_v50 }
 0x25e   :  { %v5900_v47 = vmul.f32 0.5, %v5708_v5  ;;  %vm763_vm13 = vcmp.ge.f32.partialorder %v5735_v29, 0.0  ;;  %v1851_v3 = vmul.f32 %v1787_v14, %v5749_v16  ;;  %v5905_v58 = vmul.f32 %v2226_v44, %v5672_v52 }
 0x25f   :  { %v2037_v30 = vmul.f32 %v4056_v19, %v1717_v40  ;;  %v1528_v37 = vadd.f32 -0.28449672, %v1464_v38  ;;  %v1210_v4 = vmul.f32 1.0614054, %v5886_v23  ;;  %v2228_v61 = vadd.f32 1.0, %v2164_v55 }
 0x260   :  { %6852 = vst [vmem:[#allocation59_spill] sm:$0xff] %v5905_v58  ;;  %v1719_v54 = vmul.f32 %v5751_v43, %v1655_v36  ;;  %v1654_v6 = vadd.f32 0.2548296, %v1590_v32  ;;  %v1339_v50 = vmul.f32 %v5856_v0, %v1275_v59  ;;  %4071 = vpow2.f32 %v1957_v33  ;;  %v461_v32 = vpop.f32.mrf.mxu0 }
 0x261   :  { %v5910_v46 = vpop.eup %4063  ;;  %v959_v5 = vmul.f32 0.3275911, %v5891_v60  ;;  %v5914_v16 = vand.u32 2147483647, %v5894_v9  ;;  %v5917_v52 = vmul.f32 0.70710677, %v5897_v34  ;;  %v1465_v14 = vmul.f32 %v5835_v49, %v1401_v62 }
 0x262   :  { %v4066_v19 = vpop.eup %4065  ;;  %v5923_v43 = vsel %vm763_vm13, 1.0, %v6776_v22  ;;  %v1961_v44 = vmul.f32 1.442695, %v1851_v3  ;;  %v5926_v40 = vmul.f32 0.5, %v5742_v41  ;;  %v2101_v38 = vsub.f32 1.0, %v2037_v30 }
 0x263   :  { %v1592_v33 = vmul.f32 %v5803_v57, %v1528_v37  ;;  %v1274_v55 = vadd.f32 -1.4531521, %v1210_v4  ;;  %v5930_v36 = vand.u32 2147483647, %v5917_v52  ;;  %v2039_v59 = vmul.f32 %v4060_v35, %v1719_v54 }
 0x264   :  { %6853 = vst [vmem:[#allocation60_spill] sm:$0xff] %v5926_v40  ;;  %v1403_v53 = vadd.f32 1.4214138, %v1339_v50  ;;  %v1786_v62 = vsub.f32 0.0, %v5780_v28  ;;  %v1212_v29 = vmul.f32 1.0614054, %v5910_v46  ;;  %v5935_v7 = vmul.f32 %v2228_v61, %v5723_v12 }
 0x265   :  { %v1718_v41 = vmul.f32 %v5770_v8, %v1654_v6  ;;  %v1023_v3 = vadd.f32 1.0, %v959_v5  ;;  %v958_v30 = vmul.f32 0.3275911, %v5914_v16  ;;  %v1529_v37 = vadd.f32 -0.28449672, %v1465_v14 }
 0x266   :  { %6854 = vst [vmem:[#allocation61_spill] sm:$0xff] %v5935_v7  ;;  %vm762_vm14 = vcmp.ge.f32.partialorder %v5763_v56, 0.0  ;;  %v960_v4 = vmul.f32 0.3275911, %v5930_v36  ;;  %v5942_v35 = vadd.f32 %v461_v32, %v4455_v10  ;;  %v2165_v50 = vmul.f32 %v2101_v38, %v5766_v63  ;;  %v574_v56 = vpop.f32.mrf.mxu1 }
 0x267   :  { %v4068_v54 = vpop.eup %4067  ;;  %v1656_v58 = vadd.f32 0.2548296, %v1592_v33  ;;  %4073 = vpow2.f32 %v1961_v44  ;;  %v1338_v12 = vmul.f32 %v5886_v23, %v1274_v55  ;;  %v2103_v61 = vsub.f32 1.0, %v2039_v59 }
 0x268   :  { %v1467_v8 = vmul.f32 %v5856_v0, %v1403_v53  ;;  %v1850_v6 = vmul.f32 %v1786_v62, %v5780_v28  ;;  %v1276_v5 = vadd.f32 -1.4531521, %v1212_v29  ;;  %v2038_v14 = vmul.f32 %v4066_v19, %v1718_v41 }
 0x269   :  { %4075 = vrcp.f32 %v1023_v3  ;;  %v1022_v7 = vadd.f32 1.0, %v958_v30  ;;  %v5949_v40 = vmul.f32 0.70710677, %v5942_v35  ;;  %v5951_v32 = vpop.eup %4069  ;;  %v1593_v63 = vmul.f32 %v5835_v49, %v1529_v37 }
 0x26a   :  { %v5957_v44 = vsel %vm762_vm14, 1.0, %v6776_v22  ;;  %v5960_v53 = vmul.f32 0.5, %v5775_v31  ;;  %v1024_v28 = vadd.f32 1.0, %v960_v4  ;;  %v2229_v38 = vadd.f32 1.0, %v2165_v50 }
 0x26b   :  { %v1720_v19 = vmul.f32 %v5803_v57, %v1656_v58  ;;  %v1402_v33 = vadd.f32 1.4214138, %v1338_v12  ;;  %v5964_v55 = vand.u32 2147483647, %v5949_v40  ;;  %v1531_v59 = vadd.f32 -0.28449672, %v1467_v8 }
 0x26c   :  { %v1959_v62 = vmul.f32 1.442695, %v1850_v6  ;;  %v1340_v29 = vmul.f32 %v5910_v46, %v1276_v5  ;;  %v1788_v41 = vsub.f32 0.0, %v5817_v24  ;;  %v2167_v3 = vmul.f32 %v2103_v61, %v5797_v45  ;;  %v6855_v45 = vld [vmem:[#allocation51_spill] sm:$0xff] }
 0x26d   :  { %v2102_v30 = vsub.f32 1.0, %v2038_v14  ;;  %v1213_v31 = vmul.f32 1.0614054, %v5951_v32  ;;  %4077 = vrcp.f32 %v1022_v7  ;;  %v4072_v37 = vpop.eup %4071  ;;  %v1657_v4 = vadd.f32 0.2548296, %v1593_v63 }
 0x26e   :  { %vm764_vm15 = vcmp.ge.f32.partialorder %v5800_v21, 0.0  ;;  %v1789_v57 = vsub.f32 0.0, %v5846_v13  ;;  %4079 = vrcp.f32 %v1024_v28  ;;  %v2040_v58 = vmul.f32 %v4068_v54, %v1720_v19  ;;  %v463_v28 = vpop.f32.mrf.mxu0 }
 0x26f   :  { %v1466_v50 = vmul.f32 %v5886_v23, %v1402_v33  ;;  %v961_v12 = vmul.f32 0.3275911, %v5964_v55  ;;  %v5975_v8 = vadd.f32 %v574_v56, %v4457_v11  ;;  %v5978_v61 = vmul.f32 %v2229_v38, %v6855_v45  ;;  %v576_v45 = vpop.f32.mrf.mxu1 }
 0x270   :  { %v1595_v7 = vmul.f32 %v5856_v0, %v1531_v59  ;;  %v1404_v6 = vadd.f32 1.4214138, %v1340_v29  ;;  %v1852_v5 = vmul.f32 %v1788_v41, %v5817_v24  ;;  %v2231_v14 = vadd.f32 1.0, %v2167_v3 }
 0x271   :  { %6856 = vst [vmem:[#allocation51_spill] sm:$0xff] %v5978_v61  ;;  %v2166_v63 = vmul.f32 %v2102_v30, %v5829_v51  ;;  %4081 = vpow2.f32 %v1959_v62  ;;  %v1277_v54 = vadd.f32 -1.4531521, %v1213_v31  ;;  %v1721_v19 = vmul.f32 %v5835_v49, %v1657_v4 }
 0x272   :  { %v5987_v33 = vsel %vm764_vm15, 1.0, %v6776_v22  ;;  %vm765_vm0 = vcmp.ge.f32.partialorder %v5826_v15, 0.0  ;;  %v1853_v38 = vmul.f32 %v1789_v57, %v5846_v13  ;;  %v2104_v59 = vsub.f32 1.0, %v2040_v58 }
 0x273   :  { %v1530_v29 = vadd.f32 -0.28449672, %v1466_v50  ;;  %v1025_v24 = vadd.f32 1.0, %v961_v12  ;;  %v5992_v41 = vmul.f32 0.70710677, %v5975_v8  ;;  %v1468_v56 = vmul.f32 %v5910_v46, %v1404_v6 }
 0x274   :  { %v4074_v51 = vpop.eup %4073  ;;  %v1659_v62 = vadd.f32 0.2548296, %v1595_v7  ;;  %v1963_v49 = vmul.f32 1.442695, %v1852_v5  ;;  %v5996_v3 = vadd.f32 %v463_v28, %v4465_v18  ;;  %v5999_v21 = vmul.f32 %v2231_v14, %v5787_v27 }
 0x275   :  { %v2230_v30 = vadd.f32 1.0, %v2166_v63  ;;  %v6002_v13 = vmul.f32 0.5, %v5810_v39  ;;  %v1341_v31 = vmul.f32 %v5951_v32, %v1277_v54  ;;  %v2041_v57 = vmul.f32 %v4072_v37, %v1721_v19 }
 0x276   :  { %6857 = vst [vmem:[#allocation62_spill] sm:$0xff] %v5999_v21  ;;  %v6005_v4 = vpop.eup %4075  ;;  %v6010_v58 = vsel %vm765_vm0, 1.0, %v6776_v22  ;;  %v1965_v50 = vmul.f32 1.442695, %v1853_v38  ;;  %vm767_vm1 = vcmp.ge.f32.partialorder %v5874_v25, 0.0  ;;  %v2168_v27 = vmul.f32 %v2104_v59, %v5859_v48 }
 0x277   :  { %6858 = vst [vmem:[#allocation63_spill] sm:$0xff] %v6002_v13  ;;  %v1594_v12 = vmul.f32 %v5886_v23, %v1530_v29  ;;  %4083 = vrcp.f32 %v1025_v24  ;;  %v6016_v39 = vand.u32 2147483647, %v5992_v41  ;;  %v1723_v7 = vmul.f32 %v5856_v0, %v1659_v62 }
 0x278   :  { %v1532_v37 = vadd.f32 -0.28449672, %v1468_v56  ;;  %4085 = vpow2.f32 %v1963_v49  ;;  %v6020_v15 = vmul.f32 0.70710677, %v5996_v3  ;;  %v6023_v6 = vmul.f32 %v2230_v30, %v5813_v42 }
 0x279   :  { %v1405_v5 = vadd.f32 1.4214138, %v1341_v31  ;;  %v6026_v48 = vmul.f32 0.5, %v5863_v26  ;;  %v1215_v14 = vmul.f32 1.0614054, %v6005_v4  ;;  %v2105_v54 = vsub.f32 1.0, %v2041_v57 }
 0x27a   :  { %6859 = vst [vmem:[#allocation64_spill] sm:$0xff] %v6023_v6  ;;  %v6029_v63 = vpop.eup %4077  ;;  %4087 = vpow2.f32 %v1965_v50  ;;  %v6034_v0 = vsel %vm767_vm1, 1.0, %v6776_v22  ;;  %v6037_v28 = vadd.f32 %v576_v45, %v4467_v20  ;;  %v2232_v19 = vadd.f32 1.0, %v2168_v27  ;;  %v6861_v27 = vld [vmem:[#allocation56_spill] sm:$0xff] }
 0x27b   :  { %6860 = vst [vmem:[#allocation65_spill] sm:$0xff] %v6026_v48  ;;  %v6039_v42 = vpop.eup %4079  ;;  %v1658_v38 = vadd.f32 0.2548296, %v1594_v12  ;;  %v1791_v26 = vsub.f32 0.0, %v5891_v60  ;;  %v963_v59 = vmul.f32 0.3275911, %v6016_v39  ;;  %v2043_v29 = vmul.f32 %v4074_v51, %v1723_v7 }
 0x27c   :  { %v1596_v24 = vmul.f32 %v5910_v46, %v1532_v37  ;;  %v6045_v62 = vmul.f32 0.5, %v5877_v17  ;;  %v6048_v25 = vand.u32 2147483647, %v6020_v15  ;;  %v1469_v56 = vmul.f32 %v5951_v32, %v1405_v5 }
 0x27d   :  { %v1279_v49 = vadd.f32 -1.4531521, %v1215_v14  ;;  %v1214_v30 = vmul.f32 1.0614054, %v6029_v63  ;;  %v1790_v31 = vsub.f32 0.0, %v5914_v16  ;;  %v2169_v50 = vmul.f32 %v2105_v54, %v5871_v2 }
 0x27e   :  { %v4082_v57 = vpop.eup %4081  ;;  %vm766_vm2 = vcmp.ge.f32.partialorder %v5894_v9, 0.0  ;;  %v1216_v51 = vmul.f32 1.0614054, %v6039_v42  ;;  %v6057_v17 = vmul.f32 0.70710677, %v6037_v28  ;;  %v6060_v12 = vmul.f32 %v2232_v19, %v6861_v27  ;;  %v467_v27 = vpop.f32.mrf.mxu0 }
 0x27f   :  { %v1722_v45 = vmul.f32 %v5886_v23, %v1658_v38  ;;  %v1855_v7 = vmul.f32 %v1791_v26, %v5891_v60  ;;  %v1027_v37 = vadd.f32 1.0, %v963_v59  ;;  %v2107_v5 = vsub.f32 1.0, %v2043_v29 }
 0x280   :  { %v1660_v14 = vadd.f32 0.2548296, %v1596_v24  ;;  %v1792_v48 = vsub.f32 0.0, %v5930_v36  ;;  %v962_v2 = vmul.f32 0.3275911, %v6048_v25  ;;  %v1343_v13 = vmul.f32 %v6005_v4, %v1279_v49 }
 0x281   :  { %v1533_v54 = vadd.f32 -0.28449672, %v1469_v56  ;;  %v1278_v21 = vadd.f32 -1.4531521, %v1214_v30  ;;  %v1854_v61 = vmul.f32 %v1790_v31, %v5914_v16  ;;  %v2233_v6 = vadd.f32 1.0, %v2169_v50 }
 0x282   :  { %v6071_v23 = vsel %vm766_vm2, 1.0, %v6776_v22  ;;  %v1280_v60 = vadd.f32 -1.4531521, %v1216_v51  ;;  %v6074_v19 = vand.u32 2147483647, %v6057_v17  ;;  %v2042_v38 = vmul.f32 %v4082_v57, %v1722_v45 }
 0x283   :  { %v1969_v26 = vmul.f32 1.442695, %v1855_v7  ;;  %vm768_vm3 = vcmp.ge.f32.partialorder %v5917_v52, 0.0  ;;  %4089 = vrcp.f32 %v1027_v37  ;;  %v2171_v29 = vmul.f32 %v2107_v5, %v5923_v43 }
 0x284   :  { %v6077_v59 = vpop.eup %4083  ;;  %v1724_v16 = vmul.f32 %v5910_v46, %v1660_v14  ;;  %v1856_v24 = vmul.f32 %v1792_v48, %v5930_v36  ;;  %v1026_v9 = vadd.f32 1.0, %v962_v2  ;;  %v1597_v49 = vmul.f32 %v5951_v32, %v1533_v54  ;;  %v469_v14 = vpop.f32.mrf.mxu0 }
 0x285   :  { %v4086_v56 = vpop.eup %4085  ;;  %v1407_v30 = vadd.f32 1.4214138, %v1343_v13  ;;  %v1342_v31 = vmul.f32 %v6029_v63, %v1278_v21  ;;  %v1967_v57 = vmul.f32 1.442695, %v1854_v61  ;;  %v6085_v50 = vmul.f32 %v2233_v6, %v5843_v1 }
 0x286   :  { %v6088_v51 = vmul.f32 0.5, %v5897_v34  ;;  %v1344_v43 = vmul.f32 %v6039_v42, %v1280_v60  ;;  %v964_v46 = vmul.f32 0.3275911, %v6074_v19  ;;  %v2106_v48 = vsub.f32 1.0, %v2042_v38 }
 0x287   :  { %6862 = vst [vmem:[#allocation56_spill] sm:$0xff] %v6085_v50  ;;  %v4088_v36 = vpop.eup %4087  ;;  %4091 = vpow2.f32 %v1969_v26  ;;  %v6095_v13 = vsel %vm768_vm3, 1.0, %v6776_v22  ;;  %v1217_v61 = vmul.f32 1.0614054, %v6077_v59  ;;  %v2235_v1 = vadd.f32 1.0, %v2171_v29  ;;  %v580_v26 = vpop.f32.mrf.mxu1 }
 0x288   :  { %v2044_v21 = vmul.f32 %v4086_v56, %v1724_v16  ;;  %v1971_v6 = vmul.f32 1.442695, %v1856_v24  ;;  %4093 = vrcp.f32 %v1026_v9  ;;  %v1661_v34 = vadd.f32 0.2548296, %v1597_v49 }
 0x289   :  { %v1471_v45 = vmul.f32 %v6005_v4, %v1407_v30  ;;  %v1406_v7 = vadd.f32 1.4214138, %v1342_v31  ;;  %4095 = vpow2.f32 %v1967_v57  ;;  %v1408_v37 = vadd.f32 1.4214138, %v1344_v43  ;;  %v582_v43 = vpop.f32.mrf.mxu1 }
 0x28a   :  { %v6100_v5 = vmul.f32 0.5, %v5942_v35  ;;  %vm769_vm4 = vcmp.ge.f32.partialorder %v5949_v40, 0.0  ;;  %v1028_v52 = vadd.f32 1.0, %v964_v46  ;;  %v2170_v2 = vmul.f32 %v2106_v48, %v5957_v44 }
 0x28b   :  { %v1281_v54 = vadd.f32 -1.4531521, %v1217_v61  ;;  %v1793_v60 = vsub.f32 0.0, %v5964_v55  ;;  %v6106_v38 = vadd.f32 %v467_v27, %v4455_v10  ;;  %v6109_v29 = vmul.f32 %v2235_v1, %v5900_v47 }
 0x28c   :  { %6863 = vst [vmem:[#allocation66_spill] sm:$0xff] %v6100_v5  ;;  %v2108_v16 = vsub.f32 1.0, %v2044_v21  ;;  %4097 = vpow2.f32 %v1971_v6  ;;  %v6112_v35 = vmul.f32 0.5, %v5975_v8  ;;  %v1725_v24 = vmul.f32 %v5951_v32, %v1661_v34 }
 0x28d   :  { %6864 = vst [vmem:[#allocation67_spill] sm:$0xff] %v6106_v38  ;;  %6865 = vst [vmem:[#allocation68_spill] sm:$0xff] %v6109_v29  ;;  %v1535_v9 = vadd.f32 -0.28449672, %v1471_v45  ;;  %v1470_v44 = vmul.f32 %v6029_v63, %v1406_v7  ;;  %v6117_v56 = vadd.f32 %v469_v14, %v4465_v18  ;;  %v1472_v49 = vmul.f32 %v6039_v42, %v1408_v37 }
 0x28e   :  { %6866 = vst [vmem:[#allocation69_spill] sm:$0xff] %v6112_v35  ;;  %v6123_v47 = vsel %vm769_vm4, 1.0, %v6776_v22  ;;  %v1795_v30 = vsub.f32 0.0, %v6016_v39  ;;  %4099 = vrcp.f32 %v1028_v52  ;;  %v2234_v8 = vadd.f32 1.0, %v2170_v2 }
 0x28f   :  { %v1345_v31 = vmul.f32 %v6077_v59, %v1281_v54  ;;  %v1857_v32 = vmul.f32 %v1793_v60, %v5964_v55  ;;  %v6129_v57 = vmul.f32 0.70710677, %v6106_v38  ;;  %v2172_v27 = vmul.f32 %v2108_v16, %v5987_v33 }
 0x290   :  { %v6131_v46 = vpop.eup %4089  ;;  %vm771_vm5 = vcmp.ge.f32.partialorder %v5992_v41, 0.0  ;;  %v6136_v40 = vmul.f32 0.5, %v5996_v3  ;;  %v6139_v48 = vadd.f32 %v580_v26, %v4457_v11  ;;  %v2045_v61 = vmul.f32 %v4088_v36, %v1725_v24  ;;  %v6869_v3 = vld [vmem:[#allocation60_spill] sm:$0xff] }
 0x291   :  { %v1599_v1 = vmul.f32 %v6005_v4, %v1535_v9  ;;  %v1534_v55 = vadd.f32 -0.28449672, %v1470_v44  ;;  %v6143_v21 = vmul.f32 0.70710677, %v6117_v56  ;;  %v1536_v6 = vadd.f32 -0.28449672, %v1472_v49 }
 0x292   :  { %6867 = vst [vmem:[#allocation70_spill] sm:$0xff] %v6139_v48  ;;  %v1859_v34 = vmul.f32 %v1795_v30, %v6016_v39  ;;  %vm770_vm6 = vcmp.ge.f32.partialorder %v6020_v15, 0.0  ;;  %v6148_v33 = vadd.f32 %v582_v43, %v4467_v20  ;;  %v6151_v45 = vmul.f32 %v2234_v8, %v6869_v3 }
 0x293   :  { %v1409_v7 = vadd.f32 1.4214138, %v1345_v31  ;;  %v1219_v36 = vmul.f32 1.0614054, %v6131_v46  ;;  %v6155_v37 = vand.u32 2147483647, %v6129_v57  ;;  %v1598_v24 = vmul.f32 %v6029_v63, %v1534_v55  ;;  %v471_v55 = vpop.f32.mrf.mxu0 }
 0x294   :  { %6868 = vst [vmem:[#allocation71_spill] sm:$0xff] %v6148_v33  ;;  %v4092_v52 = vpop.eup %4091  ;;  %v2236_v14 = vadd.f32 1.0, %v2172_v27  ;;  %v1973_v2 = vmul.f32 1.442695, %v1857_v32  ;;  %v6160_v39 = vsel %vm771_vm5, 1.0, %v6776_v22  ;;  %v2109_v26 = vsub.f32 1.0, %v2045_v61 }
 0x295   :  { %v6163_v54 = vmul.f32 0.70710677, %v6139_v48  ;;  %v6165_v60 = vpop.eup %4093  ;;  %v1663_v16 = vadd.f32 0.2548296, %v1599_v1  ;;  %v6169_v9 = vand.u32 2147483647, %v6143_v21  ;;  %v1600_v49 = vmul.f32 %v6039_v42, %v1536_v6 }
 0x296   :  { %v4096_v44 = vpop.eup %4095  ;;  %v1977_v30 = vmul.f32 1.442695, %v1859_v34  ;;  %v6175_v41 = vsel %vm770_vm6, 1.0, %v6776_v22  ;;  %v6178_v8 = vmul.f32 0.70710677, %v6148_v33  ;;  %v1473_v31 = vmul.f32 %v6077_v59, %v1409_v7 }
 0x297   :  { %v1283_v32 = vadd.f32 -1.4531521, %v1219_v36  ;;  %v965_v43 = vmul.f32 0.3275911, %v6155_v37  ;;  %v966_v27 = vmul.f32 0.3275911, %v6169_v9  ;;  %4101 = vpow2.f32 %v1973_v2 }
 0x298   :  { %v1218_v61 = vmul.f32 1.0614054, %v6165_v60  ;;  %v6185_v1 = vand.u32 2147483647, %v6163_v54  ;;  %v6188_v15 = vand.u32 2147483647, %v6178_v8  ;;  %v1727_v34 = vmul.f32 %v6005_v4, %v1663_v16 }
 0x299   :  { %v4098_v6 = vpop.eup %4097  ;;  %v1662_v3 = vadd.f32 0.2548296, %v1598_v24  ;;  %v1794_v7 = vsub.f32 0.0, %v6048_v25  ;;  %v1030_v36 = vadd.f32 1.0, %v966_v27  ;;  %v6193_v48 = vmul.f32 %v2236_v14, %v5960_v53  ;;  %v584_v14 = vpop.f32.mrf.mxu1 }
 0x29a   :  { %v2173_v2 = vmul.f32 %v2109_v26, %v6010_v58  ;;  %v1664_v38 = vadd.f32 0.2548296, %v1600_v49  ;;  %v968_v35 = vmul.f32 0.3275911, %v6188_v15  ;;  %v1537_v33 = vadd.f32 -0.28449672, %v1473_v31 }
 0x29b   :  { %v6197_v5 = vpop.eup %4099  ;;  %v1029_v29 = vadd.f32 1.0, %v965_v43  ;;  %4103 = vrcp.f32 %v1030_v36  ;;  %v6200_v50 = vadd.f32 %v471_v55, %v4455_v10  ;;  %v1347_v4 = vmul.f32 %v6131_v46, %v1283_v32 }
 0x29c   :  { %v1282_v16 = vadd.f32 -1.4531521, %v1218_v61  ;;  %v967_v24 = vmul.f32 0.3275911, %v6185_v1  ;;  %v1032_v53 = vadd.f32 1.0, %v968_v35  ;;  %v2047_v27 = vmul.f32 %v4092_v52, %v1727_v34 }
 0x29d   :  { %6870 = vst [vmem:[#allocation60_spill] sm:$0xff] %v6200_v50  ;;  %v1726_v58 = vmul.f32 %v6029_v63, %v1662_v3  ;;  %4105 = vpow2.f32 %v1977_v30  ;;  %v1858_v26 = vmul.f32 %v1794_v7, %v6048_v25  ;;  %v1728_v49 = vmul.f32 %v6039_v42, %v1664_v38  ;;  %v6872_v30 = vld [vmem:[#allocation29_spill] sm:$0xff] }
 0x29e   :  { %v1220_v31 = vmul.f32 1.0614054, %v6197_v5  ;;  %v1796_v10 = vsub.f32 0.0, %v6074_v19  ;;  %4107 = vrcp.f32 %v1032_v53  ;;  %v1601_v32 = vmul.f32 %v6077_v59, %v1537_v33  ;;  %v6873_v42 = vld [vmem:[#allocation21_spill] sm:$0xff] }
 0x29f   :  { %4109 = vrcp.f32 %v1029_v29  ;;  %v6211_v43 = vmul.f32 0.70710677, %v6200_v50  ;;  %v6214_v35 = vadd.f32 %v584_v14, %v4457_v11  ;;  %v1411_v63 = vadd.f32 1.4214138, %v1347_v4  ;;  %v6889_v50 = vld [vmem:[#allocation35_spill] sm:$0xff] }
 0x2a0   :  { %v1346_v52 = vmul.f32 %v6165_v60, %v1282_v16  ;;  %v1031_v25 = vadd.f32 1.0, %v967_v24  ;;  %v2318_v38 = vpack.c.bf16 %v6873_v42, %v6872_v30  ;;  %v6219_v61 = vadd.f32 1.0, %v2173_v2  ;;  %v6876_v16 = vld [vmem:[#allocation27_spill] sm:$0xff] }
 0x2a1   :  { %6871 = vst [vmem:[#allocation72_spill] sm:$0xff] %v6214_v35  ;;  %v2046_v55 = vmul.f32 %v4096_v44, %v1726_v58  ;;  %v6222_v34 = vmul.f32 0.5, %v6037_v28  ;;  %vm772_vm7 = vcmp.ge.f32.partialorder %v6057_v17, 0.0  ;;  %v2111_v29 = vsub.f32 1.0, %v2047_v27  ;;  %v6875_v44 = vld [vmem:[#allocation31_spill] sm:$0xff] }
 0x2a2   :  { %6874 = vst [vmem:[#allocation29_spill] sm:$0xff] %v6219_v61  ;;  %v1284_v33 = vadd.f32 -1.4531521, %v1220_v31  ;;  %v1860_v11 = vmul.f32 %v1796_v10, %v6074_v19  ;;  %v6227_v3 = vand.u32 2147483647, %v6211_v43  ;;  %2644 = vmatprep.mubr.bf16.mxu0 %v2318_v38  ;;  %v2048_v7 = vmul.f32 %v4098_v6, %v1728_v49 }
 0x2a3   :  { %v1665_v36 = vadd.f32 0.2548296, %v1601_v32  ;;  %v1975_v4 = vmul.f32 1.442695, %v1858_v26  ;;  %v6230_v2 = vmul.f32 0.70710677, %v6214_v35  ;;  %v6877_v28 = vpack.c.bf16 %v6875_v44, %v6876_v16  ;;  %v586_v16 = vpop.f32.mrf.mxu1 }
 0x2a4   :  { %v1475_v24 = vmul.f32 %v6131_v46, %v1411_v63  ;;  %v1410_v53 = vadd.f32 1.4214138, %v1346_v52  ;;  %4111 = vrcp.f32 %v1031_v25  ;;  %v969_v19 = vmul.f32 0.3275911, %v6227_v3  ;;  %v4102_v14 = vpop.eup %4101  ;;  %v6879_v44 = vld [vmem:[#allocation30_spill] sm:$0xff] }
 0x2a5   :  { %2645 = vmatmul.mubr.bf16.vlgmr.msra.gmra.mxu0 %v6877_v28  ;;  %v2110_v27 = vsub.f32 1.0, %v2046_v55  ;;  %v6240_v6 = vsel %vm772_vm7, 1.0, %v6776_v22  ;;  %v1797_v58 = vsub.f32 0.0, %v6155_v37  ;;  %v6244_v26 = vand.u32 2147483647, %v6230_v2 }
 0x2a6   :  { %v2175_v49 = vmul.f32 %v2111_v29, %v6034_v0  ;;  %v1348_v31 = vmul.f32 %v6197_v5, %v1284_v33  ;;  %v1979_v10 = vmul.f32 1.442695, %v1860_v11  ;;  %v1033_v32 = vadd.f32 1.0, %v969_v19  ;;  %v473_v33 = vpop.f32.mrf.mxu0 }
 0x2a7   :  { %v2112_v63 = vsub.f32 1.0, %v2048_v7  ;;  %4113 = vpow2.f32 %v1975_v4  ;;  %vm773_vm8 = vcmp.ge.f32.partialorder %v6129_v57, 0.0  ;;  %v971_v52 = vmul.f32 0.3275911, %v6244_v26 }
 0x2a8   :  { %v6250_v17 = vpop.eup %4103  ;;  %v1729_v25 = vmul.f32 %v6077_v59, %v1665_v36  ;;  %v1539_v30 = vadd.f32 -0.28449672, %v1475_v24  ;;  %v1474_v42 = vmul.f32 %v6165_v60, %v1410_v53  ;;  %4115 = vrcp.f32 %v1033_v32  ;;  %v6880_v59 = vld [vmem:[#allocation22_spill] sm:$0xff]  ;;  %v6883_v32 = vld [vmem:[#allocation32_spill] sm:$0xff] }
 0x2a9   :  { %v2174_v0 = vmul.f32 %v2110_v27, %v6071_v23  ;;  %v1861_v38 = vmul.f32 %v1797_v58, %v6155_v37  ;;  %v1222_v55 = vmul.f32 1.0614054, %v6250_v17  ;;  %v1035_v29 = vadd.f32 1.0, %v971_v52 }
 0x2aa   :  { %v6257_v11 = vpop.eup %4105  ;;  %v6259_v7 = vadd.f32 1.0, %v2175_v49  ;;  %v1412_v4 = vadd.f32 1.4214138, %v1348_v31  ;;  %4117 = vpow2.f32 %v1979_v10  ;;  %v2320_v36 = vpack.c.bf16 %v6880_v59, %v6879_v44 }
 0x2ab   :  { %v6263_v28 = vpop.eup %4107  ;;  %v2176_v23 = vmul.f32 %v2112_v63, %v6095_v13  ;;  %v6269_v37 = vsel %vm773_vm8, 1.0, %v6776_v22  ;;  %v1799_v24 = vsub.f32 0.0, %v6185_v1  ;;  %4119 = vrcp.f32 %v1035_v29  ;;  %v6884_v63 = vld [vmem:[#allocation28_spill] sm:$0xff] }
 0x2ac   :  { %6878 = vst [vmem:[#allocation21_spill] sm:$0xff] %v6259_v7  ;;  %6881 = vst [vmem:[#allocation31_spill] sm:$0xff] %v6269_v37  ;;  %v6272_v53 = vpop.eup %4109  ;;  %v2049_v19 = vmul.f32 %v4102_v14, %v1729_v25  ;;  %v1603_v27 = vmul.f32 %v6131_v46, %v1539_v30  ;;  %v1538_v58 = vadd.f32 -0.28449672, %v1474_v42  ;;  %2741 = vmatprep.mubr.bf16.mxu1 %v2320_v36  ;;  %v2238_v31 = vadd.f32 1.0, %v2174_v0  ;;  %v6887_v0 = vld [vmem:[#allocation34_spill] sm:$0xff] }
 0x2ad   :  { %v6276_v49 = vadd.f32 %v473_v33, %v4465_v18  ;;  %v1981_v13 = vmul.f32 1.442695, %v1861_v38  ;;  %v1286_v10 = vadd.f32 -1.4531521, %v1222_v55  ;;  %v6279_v57 = vadd.f32 %v586_v16, %v4467_v20  ;;  %v6888_v38 = vld [vmem:[#allocation19_spill] sm:$0xff] }
 0x2ae   :  { %v6885_v52 = vpack.c.bf16 %v6883_v32, %v6884_v63  ;;  %v1476_v29 = vmul.f32 %v6197_v5, %v1412_v4  ;;  %v6286_v14 = vmul.f32 0.5, %v6117_v56  ;;  %v1224_v25 = vmul.f32 1.0614054, %v6263_v28 }
 0x2af   :  { %6882 = vst [vmem:[#allocation27_spill] sm:$0xff] %v6279_v57  ;;  %v6290_v18 = vmul.f32 0.70710677, %v6276_v49  ;;  %v2240_v30 = vadd.f32 1.0, %v2176_v23  ;;  %v1221_v42 = vmul.f32 1.0614054, %v6272_v53  ;;  %v1863_v20 = vmul.f32 %v1799_v24, %v6185_v1 }
 0x2b0   :  { %2742 = vmatmul.mubr.bf16.vlgmr.msra.gmra.mxu1 %v6885_v52  ;;  %6886 = vst [vmem:[#allocation30_spill] sm:$0xff] %v6286_v14  ;;  %v2322_v55 = vpack.c.bf16 %v6888_v38, %v6887_v0  ;;  %v2113_v33 = vsub.f32 1.0, %v2049_v19  ;;  %v1667_v44 = vadd.f32 0.2548296, %v1603_v27  ;;  %v1602_v4 = vmul.f32 %v6165_v60, %v1538_v58 }
 0x2b1   :  { %v6298_v56 = vand.u32 2147483647, %v6290_v18  ;;  %v6300_v59 = vpop.eup %4111  ;;  %v1350_v36 = vmul.f32 %v6250_v17, %v1286_v10  ;;  %v1798_v16 = vsub.f32 0.0, %v6169_v9  ;;  %v1800_v23 = vsub.f32 0.0, %v6188_v15 }
 0x2b2   :  { %v6306_v1 = vmul.f32 0.70710677, %v6279_v57  ;;  %2652 = vmatprep.mubr.bf16.mxu0 %v2322_v55  ;;  %v6309_v24 = vmul.f32 %v2238_v31, %v6045_v62  ;;  %v1540_v19 = vadd.f32 -0.28449672, %v1476_v29  ;;  %v1288_v27 = vadd.f32 -1.4531521, %v1224_v25 }
 0x2b3   :  { %v970_v58 = vmul.f32 0.3275911, %v6298_v56  ;;  %v1285_v32 = vadd.f32 -1.4531521, %v1221_v42  ;;  %4121 = vpow2.f32 %v1981_v13  ;;  %v1985_v63 = vmul.f32 1.442695, %v1863_v20 }
 0x2b4   :  { %v6313_v10 = vand.u32 2147483647, %v6306_v1  ;;  %v4114_v52 = vpop.eup %4113  ;;  %v6316_v0 = vmul.f32 %v2240_v30, %v6088_v51  ;;  %v1666_v38 = vadd.f32 0.2548296, %v1602_v4  ;;  %v1223_v55 = vmul.f32 1.0614054, %v6300_v59 }
 0x2b5   :  { %v1034_v35 = vadd.f32 1.0, %v970_v58  ;;  %v6319_v62 = vpop.eup %4115  ;;  %v1414_v31 = vadd.f32 1.4214138, %v1350_v36  ;;  %v1862_v29 = vmul.f32 %v1798_v16, %v6169_v9  ;;  %v1864_v25 = vmul.f32 %v1800_v23, %v6188_v15  ;;  %v6898_v57 = vld [vmem:[#allocation45_spill] sm:$0xff] }
 0x2b6   :  { %v972_v13 = vmul.f32 0.3275911, %v6313_v10  ;;  %v1604_v42 = vmul.f32 %v6197_v5, %v1540_v19  ;;  %v1352_v20 = vmul.f32 %v6263_v28, %v1288_v27  ;;  %v1225_v51 = vmul.f32 1.0614054, %v6319_v62  ;;  %v6890_v27 = vld [vmem:[#allocation20_spill] sm:$0xff] }
 0x2b7   :  { %4123 = vrcp.f32 %v1034_v35  ;;  %v4118_v30 = vpop.eup %4117  ;;  %v6328_v4 = vmul.f32 %v2113_v33, %v6123_v47  ;;  %v1731_v58 = vmul.f32 %v6131_v46, %v1667_v44  ;;  %v1349_v36 = vmul.f32 %v6272_v53, %v1285_v32 }
 0x2b8   :  { %v1036_v9 = vadd.f32 1.0, %v972_v13  ;;  %v6332_v16 = vpop.eup %4119  ;;  %v1730_v15 = vmul.f32 %v6165_v60, %v1666_v38  ;;  %v1287_v23 = vadd.f32 -1.4531521, %v1223_v55  ;;  %v1289_v19 = vadd.f32 -1.4531521, %v1225_v51  ;;  %v6891_v55 = vld [vmem:[#allocation24_spill] sm:$0xff] }
 0x2b9   :  { %v2324_v37 = vpack.c.bf16 %v6890_v27, %v6889_v50  ;;  %v1478_v35 = vmul.f32 %v6250_v17, %v1414_v31  ;;  %v1983_v7 = vmul.f32 1.442695, %v1862_v29  ;;  %v1987_v61 = vmul.f32 1.442695, %v1864_v25  ;;  %v6892_v13 = vld [vmem:[#allocation36_spill] sm:$0xff]  ;;  %v6893_v25 = vld [vmem:[#allocation33_spill] sm:$0xff] }
 0x2ba   :  { %v1227_v47 = vmul.f32 1.0614054, %v6332_v16  ;;  %v1668_v33 = vadd.f32 0.2548296, %v1604_v42  ;;  %v1416_v46 = vadd.f32 1.4214138, %v1352_v20  ;;  %4125 = vrcp.f32 %v1036_v9 }
 0x2bb   :  { %v1801_v44 = vsub.f32 0.0, %v6227_v3  ;;  %2749 = vmatprep.mubr.bf16.mxu1 %v2324_v37  ;;  %v1413_v32 = vadd.f32 1.4214138, %v1349_v36  ;;  %v1353_v60 = vmul.f32 %v6319_v62, %v1289_v19  ;;  %v2321_v51 = vpack.c.bf16 %v6892_v13, %v6891_v55  ;;  %v6894_v42 = vld [vmem:[#allocation37_spill] sm:$0xff]  ;;  %v6895_v37 = vld [vmem:[#allocation23_spill] sm:$0xff]  ;;  %v6896_v36 = vld [vmem:[#allocation44_spill] sm:$0xff] }
 0x2bc   :  { %v1291_v38 = vadd.f32 -1.4531521, %v1227_v47  ;;  %v1351_v50 = vmul.f32 %v6300_v59, %v1287_v23  ;;  %v1803_v31 = vsub.f32 0.0, %v6244_v26  ;;  %v1802_v29 = vsub.f32 0.0, %v6298_v56  ;;  %v6897_v47 = vld [vmem:[#allocation40_spill] sm:$0xff] }
 0x2bd   :  { %v2323_v20 = vpack.c.bf16 %v6894_v42, %v6893_v25  ;;  %v1542_v27 = vadd.f32 -0.28449672, %v1478_v35  ;;  %2653 = vmatmul.mubr.bf16.gmra.mxu0 %v2321_v51  ;;  %v2326_v19 = vpack.c.bf16 %v6896_v36, %v6895_v37  ;;  %v2328_v14 = vpack.c.bf16 %v6898_v57, %v6897_v47  ;;  %v6906_v37 = vld [vmem:[#allocation43_spill] sm:$0xff] }
 0x2be   :  { %v1355_v9 = vmul.f32 %v6332_v16, %v1291_v38  ;;  %v1732_v55 = vmul.f32 %v6197_v5, %v1668_v33  ;;  %4127 = vpow2.f32 %v1985_v63  ;;  %v1480_v23 = vmul.f32 %v6263_v28, %v1416_v46 }
 0x2bf   :  { %v1865_v13 = vmul.f32 %v1801_v44, %v6227_v3  ;;  %2750 = vmatmul.mubr.bf16.gmra.mxu1 %v2323_v20  ;;  %v6357_v25 = vmul.f32 %v6257_v11, %v1731_v58  ;;  %4129 = vpow2.f32 %v1983_v7  ;;  %v1417_v35 = vadd.f32 1.4214138, %v1353_v60  ;;  %2660 = vmatprep.mubr.bf16.mxu0 %v2326_v19  ;;  %v6899_v60 = vld [vmem:[#allocation38_spill] sm:$0xff] }
 0x2c0   :  { %v1804_v38 = vsub.f32 0.0, %v6313_v10  ;;  %2757 = vmatprep.mubr.bf16.mxu1 %v2328_v14  ;;  %v6360_v51 = vpop.eup %4121  ;;  %v6362_v57 = vmul.f32 %v4114_v52, %v1730_v15  ;;  %4131 = vpow2.f32 %v1987_v61  ;;  %v1419_v5 = vadd.f32 1.4214138, %v1355_v9  ;;  %v6900_v14 = vld [vmem:[#allocation54_spill] sm:$0xff]  ;;  %v6902_v15 = vld [vmem:[#allocation41_spill] sm:$0xff] }
 0x2c1   :  { %v1866_v63 = vmul.f32 %v1802_v29, %v6298_v56  ;;  %v1477_v3 = vmul.f32 %v6272_v53, %v1413_v32  ;;  %v1415_v33 = vadd.f32 1.4214138, %v1351_v50  ;;  %v1606_v11 = vmul.f32 %v6250_v17, %v1542_v27  ;;  %v6901_v52 = vld [vmem:[#allocation26_spill] sm:$0xff]  ;;  %v6903_v50 = vld [vmem:[#allocation39_spill] sm:$0xff]  ;;  %v6905_v9 = vld [vmem:[#allocation25_spill] sm:$0xff] }
 0x2c2   :  { %v1867_v7 = vmul.f32 %v1803_v31, %v6244_v26  ;;  %v2052_v58 = vmul.f32 %v4118_v30, %v1732_v55  ;;  %v1544_v46 = vadd.f32 -0.28449672, %v1480_v23  ;;  %v1989_v44 = vmul.f32 1.442695, %v1865_v13  ;;  %v6904_v29 = vld [vmem:[#allocation55_spill] sm:$0xff] }
 0x2c3   :  { %v2330_v42 = vpack.c.bf16 %v6900_v14, %v6899_v60  ;;  %vm774_vm9 = vcmp.ge.f32.partialorder %v6143_v21, 0.0  ;;  %v1481_v61 = vmul.f32 %v6319_v62, %v1417_v35  ;;  %v1868_v56 = vmul.f32 %v1804_v38, %v6313_v10 }
 0x2c4   :  { %v6370_v20 = vpop.eup %4123  ;;  %v2325_v32 = vpack.c.bf16 %v6902_v15, %v6901_v52  ;;  %v2332_v26 = vpack.c.bf16 %v6904_v29, %v6903_v50  ;;  %vm776_vm10 = vcmp.ge.f32.partialorder %v6178_v8, 0.0  ;;  %v1483_v30 = vmul.f32 %v6332_v16, %v1419_v5  ;;  %v6910_v50 = vld [vmem:[#allocation42_spill] sm:$0xff] }
 0x2c5   :  { %v1226_v31 = vmul.f32 1.0614054, %v6370_v20  ;;  %v1991_v27 = vmul.f32 1.442695, %v1866_v63  ;;  %v2327_v36 = vpack.c.bf16 %v6906_v37, %v6905_v9  ;;  %v1541_v19 = vadd.f32 -0.28449672, %v1477_v3 }
 0x2c6   :  { %v1479_v47 = vmul.f32 %v6300_v59, %v1415_v33  ;;  %v1670_v10 = vadd.f32 0.2548296, %v1606_v11  ;;  %v1993_v55 = vmul.f32 1.442695, %v1867_v7  ;;  %2661 = vmatmul.mubr.bf16.gmra.mxu0 %v2325_v32  ;;  %v2115_v23 = vsub.f32 1.0, %v6357_v25  ;;  %v6909_v32 = vld [vmem:[#allocation46_spill] sm:$0xff] }
 0x2c7   :  { %v2114_v13 = vsub.f32 1.0, %v6362_v57  ;;  %v1608_v35 = vmul.f32 %v6263_v28, %v1544_v46  ;;  %v1290_v38 = vadd.f32 -1.4531521, %v1226_v31  ;;  %2758 = vmatmul.mubr.bf16.gmra.mxu1 %v2327_v36  ;;  %2668 = vmatprep.mubr.bf16.mxu0 %v2330_v42  ;;  %v6388_v5 = vpop.eup %4125  ;;  %v2116_v63 = vsub.f32 1.0, %v2052_v58  ;;  %v6907_v58 = vld [vmem:[#allocation49_spill] sm:$0xff]  ;;  %v6913_v36 = vld [vmem:[#allocation48_spill] sm:$0xff] }
 0x2c8   :  { %v1545_v60 = vadd.f32 -0.28449672, %v1481_v61  ;;  %4133 = vpow2.f32 %v1989_v44  ;;  %v1995_v3 = vmul.f32 1.442695, %v1868_v56  ;;  %2765 = vmatprep.mubr.bf16.mxu1 %v2332_v26  ;;  %v1547_v33 = vadd.f32 -0.28449672, %v1483_v30 }
 0x2c9   :  { %v1354_v11 = vmul.f32 %v6370_v20, %v1290_v38  ;;  %4135 = vpow2.f32 %v1991_v27  ;;  %v1228_v25 = vmul.f32 1.0614054, %v6388_v5  ;;  %v1605_v57 = vmul.f32 %v6272_v53, %v1541_v19  ;;  %v6908_v61 = vld [vmem:[#allocation59_spill] sm:$0xff]  ;;  %v6911_v26 = vld [vmem:[#allocation50_spill] sm:$0xff]  ;;  %v6912_v30 = vld [vmem:[#allocation61_spill] sm:$0xff] }
 0x2ca   :  { %v1543_v7 = vadd.f32 -0.28449672, %v1479_v47  ;;  %v1734_v46 = vmul.f32 %v6250_v17, %v1670_v10  ;;  %4137 = vpow2.f32 %v1993_v55  ;;  %v1672_v14 = vadd.f32 0.2548296, %v1608_v35  ;;  %v6914_v19 = vld [vmem:[#allocation53_spill] sm:$0xff] }
 0x2cb   :  { %v1418_v42 = vadd.f32 1.4214138, %v1354_v11  ;;  %v1292_v52 = vadd.f32 -1.4531521, %v1228_v25  ;;  %v2334_v44 = vpack.c.bf16 %v6908_v61, %v6907_v58  ;;  %v6396_v56 = vpop.eup %4127  ;;  %v1609_v15 = vmul.f32 %v6319_v62, %v1545_v60 }
 0x2cc   :  { %4139 = vpow2.f32 %v1995_v3  ;;  %v2329_v29 = vpack.c.bf16 %v6910_v50, %v6909_v32  ;;  %v2336_v31 = vpack.c.bf16 %v6912_v30, %v6911_v26  ;;  %v4130_v27 = vpop.eup %4129  ;;  %v1611_v17 = vmul.f32 %v6332_v16, %v1547_v33 }
 0x2cd   :  { %v1482_v9 = vmul.f32 %v6370_v20, %v1418_v42  ;;  %v1356_v37 = vmul.f32 %v6388_v5, %v1292_v52  ;;  %v2331_v47 = vpack.c.bf16 %v6914_v19, %v6913_v36  ;;  %v4132_v10 = vpop.eup %4131  ;;  %v2178_v55 = vmul.f32 %v2114_v13, %v6175_v41 }
 0x2ce   :  { %v2180_v35 = vmul.f32 %v2116_v63, %v6240_v6  ;;  %v1669_v38 = vadd.f32 0.2548296, %v1605_v57  ;;  %v1607_v60 = vmul.f32 %v6300_v59, %v1543_v7  ;;  %2669 = vmatmul.mubr.bf16.gmra.mxu0 %v2329_v29  ;;  %v838_v3 = vsel %vm774_vm9, 1.0, %v6776_v22 }
 0x2cf   :  { %v1736_v33 = vmul.f32 %v6263_v28, %v1672_v14  ;;  %v1546_v11 = vadd.f32 -0.28449672, %v1482_v9  ;;  %v1420_v25 = vadd.f32 1.4214138, %v1356_v37  ;;  %2766 = vmatmul.mubr.bf16.gmra.mxu1 %v2331_v47  ;;  %2676 = vmatprep.mubr.bf16.mxu0 %v2334_v44  ;;  %v6416_v42 = vadd.f32 1.0, %v6328_v4  ;;  %v6915_v44 = vld [vmem:[#allocation64_spill] sm:$0xff] }
 0x2d0   :  { %v2054_v41 = vmul.f32 %v4130_v27, %v1734_v46  ;;  %v840_v6 = vsel %vm776_vm10, 1.0, %v6776_v22  ;;  %v1673_v13 = vadd.f32 0.2548296, %v1609_v15  ;;  %2773 = vmatprep.mubr.bf16.mxu1 %v2336_v31  ;;  %v2179_v63 = vmul.f32 %v2115_v23, %v6160_v39  ;;  %v6916_v39 = vld [vmem:[#allocation47_spill] sm:$0xff]  ;;  %v6917_v23 = vld [vmem:[#allocation57_spill] sm:$0xff]  ;;  %v6918_v27 = vld [vmem:[#allocation52_spill] sm:$0xff] }
 0x2d1   :  { %v1675_v21 = vadd.f32 0.2548296, %v1611_v17  ;;  %v1610_v57 = vmul.f32 %v6370_v20, %v1546_v11  ;;  %v1484_v28 = vmul.f32 %v6388_v5, %v1420_v25  ;;  %v2242_v7 = vadd.f32 1.0, %v2178_v55  ;;  %v6919_v17 = vld [vmem:[#allocation58_spill] sm:$0xff] }
 0x2d2   :  { %v2244_v14 = vadd.f32 1.0, %v2180_v35  ;;  %v1733_v52 = vmul.f32 %v6272_v53, %v1669_v38  ;;  %v1671_v4 = vadd.f32 0.2548296, %v1607_v60  ;;  %v2056_v58 = vmul.f32 %v4132_v10, %v1736_v33 }
 0x2d3   :  { %v1674_v46 = vadd.f32 0.2548296, %v1610_v57  ;;  %v1548_v61 = vadd.f32 -0.28449672, %v1484_v28  ;;  %v2338_v8 = vpack.c.bf16 %v6151_v45, %v6915_v44  ;;  %v2118_v15 = vsub.f32 1.0, %v2054_v41 }
 0x2d4   :  { %v1737_v32 = vmul.f32 %v6319_v62, %v1673_v13  ;;  %v2333_v50 = vpack.c.bf16 %v6917_v23, %v6916_v39  ;;  %v2340_v29 = vpack.c.bf16 %v6193_v48, %v6060_v12  ;;  %v1739_v30 = vmul.f32 %v6332_v16, %v1675_v21  ;;  %v6921_v21 = vld [vmem:[#allocation56_spill] sm:$0xff] }
 0x2d5   :  { %v4134_v26 = vpop.eup %4133  ;;  %v1738_v53 = vmul.f32 %v6370_v20, %v1674_v46  ;;  %v1612_v31 = vmul.f32 %v6388_v5, %v1548_v61  ;;  %v2335_v9 = vpack.c.bf16 %v6919_v17, %v6918_v27  ;;  %v2243_v37 = vadd.f32 1.0, %v2179_v63  ;;  %v6920_v63 = vld [vmem:[#allocation51_spill] sm:$0xff]  ;;  %v6930_v27 = vld [vmem:[#allocation29_spill] sm:$0xff] }
 0x2d6   :  { %v4136_v45 = vpop.eup %4135  ;;  %v2306_v62 = vmul.f32 %v2242_v7, %v6136_v40  ;;  %v1735_v36 = vmul.f32 %v6300_v59, %v1671_v4  ;;  %vm777_vm11 = vcmp.ge.f32.partialorder %v6211_v43, 0.0  ;;  %2677 = vmatmul.mubr.bf16.gmra.mxu0 %v2333_v50  ;;  %vm775_vm12 = vcmp.ge.f32.partialorder %v6163_v54, 0.0  ;;  %v6922_v7 = vld [vmem:[#allocation62_spill] sm:$0xff]  ;;  %v6924_v4 = vld [vmem:[#allocation71_spill] sm:$0xff] }
 0x2d7   :  { %v4138_v12 = vpop.eup %4137  ;;  %v2120_v48 = vsub.f32 1.0, %v2056_v58  ;;  %vm778_vm13 = vcmp.ge.f32.partialorder %v6290_v18, 0.0  ;;  %v2058_v16 = vmul.f32 %v4136_v45, %v1738_v53  ;;  %v1676_v20 = vadd.f32 0.2548296, %v1612_v31  ;;  %2774 = vmatmul.mubr.bf16.gmra.mxu1 %v2335_v9  ;;  %2684 = vmatprep.mubr.bf16.mxu0 %v2338_v8  ;;  %v6923_v18 = vld [vmem:[#allocation68_spill] sm:$0xff]  ;;  %v6925_v8 = vld [vmem:[#allocation66_spill] sm:$0xff] }
 0x2d8   :  { %v2308_v19 = vmul.f32 %v2244_v14, %v6222_v34  ;;  %v2182_v47 = vmul.f32 %v2118_v15, %v838_v3  ;;  %v2057_v10 = vmul.f32 %v4134_v26, %v1737_v32  ;;  %vm779_vm14 = vcmp.ge.f32.partialorder %v6230_v2, 0.0  ;;  %2781 = vmatprep.mubr.bf16.mxu1 %v2340_v29  ;;  %v6926_v32 = vld [vmem:[#allocation69_spill] sm:$0xff]  ;;  %v6928_v26 = vld [vmem:[#allocation27_spill] sm:$0xff] }
 0x2d9   :  { %v4140_v40 = vpop.eup %4139  ;;  %v2053_v59 = vmul.f32 %v6360_v51, %v1733_v52  ;;  %v2059_v55 = vmul.f32 %v4138_v12, %v1739_v30  ;;  %v2122_v35 = vsub.f32 1.0, %v2058_v16  ;;  %v1740_v38 = vmul.f32 %v6388_v5, %v1676_v20  ;;  %v6929_v31 = vld [vmem:[#allocation63_spill] sm:$0xff]  ;;  %v6931_v9 = vld [vmem:[#allocation65_spill] sm:$0xff] }
 0x2da   :  { %v2055_v60 = vmul.f32 %v6396_v56, %v1735_v36  ;;  %v650_v33 = vmul.f32 0.5, %v6276_v49  ;;  %v842_v34 = vsel %vm778_vm13, 1.0, %v6776_v22  ;;  %vm780_vm15 = vcmp.ge.f32.partialorder %v6306_v1, 0.0  ;;  %v6927_v1 = vld [vmem:[#allocation30_spill] sm:$0xff]  ;;  %v6932_v45 = vld [vmem:[#allocation21_spill] sm:$0xff]  ;;  %v6936_v54 = vld [vmem:[#allocation67_spill] sm:$0xff] }
 0x2db   :  { %v2184_v3 = vmul.f32 %v2120_v48, %v840_v6  ;;  %v2186_v11 = vmul.f32 %v2122_v35, %v842_v34  ;;  %v2060_v25 = vmul.f32 %v4140_v40, %v1740_v38  ;;  %v2342_v41 = vpack.c.bf16 %v2306_v62, %v6309_v24  ;;  %v6933_v62 = vld [vmem:[#allocation31_spill] sm:$0xff] }
 0x2dc   :  { %v2246_v51 = vadd.f32 1.0, %v2182_v47  ;;  %v2121_v13 = vsub.f32 1.0, %v2057_v10  ;;  %v2337_v5 = vpack.c.bf16 %v6921_v21, %v6920_v63  ;;  %v2344_v56 = vpack.c.bf16 %v2308_v19, %v6316_v0 }
 0x2dd   :  { %v2123_v57 = vsub.f32 1.0, %v2059_v55  ;;  %v2250_v49 = vadd.f32 1.0, %v2186_v11  ;;  %v2124_v28 = vsub.f32 1.0, %v2060_v25  ;;  %v2339_v14 = vpack.c.bf16 %v6923_v18, %v6922_v7  ;;  %v6934_v55 = vld [vmem:[#allocation60_spill] sm:$0xff] }
 0x2de   :  { %v2117_v52 = vsub.f32 1.0, %v2053_v59  ;;  %v648_v6 = vmul.f32 0.5, %v6924_v4  ;;  %v841_v24 = vsel %vm777_vm11, 1.0, %v6776_v22  ;;  %v844_v58 = vsel %vm780_vm15, 1.0, %v6776_v22  ;;  %2685 = vmatmul.mubr.bf16.gmra.mxu0 %v2337_v5 }
 0x2df   :  { %v2119_v46 = vsub.f32 1.0, %v2055_v60  ;;  %v2248_v0 = vadd.f32 1.0, %v2184_v3  ;;  %v2314_v61 = vmul.f32 %v2250_v49, %v650_v33  ;;  %v2188_v44 = vmul.f32 %v2124_v28, %v844_v58  ;;  %2782 = vmatmul.mubr.bf16.gmra.mxu1 %v2339_v14  ;;  %2692 = vmatprep.mubr.bf16.mxu0 %v2342_v41  ;;  %v6935_v60 = vld [vmem:[#allocation72_spill] sm:$0xff]  ;;  %v6937_v3 = vld [vmem:[#allocation70_spill] sm:$0xff]  ;;  %v6488_v49 = vld [vmem:[%s6745_s5] ss:$0 sm:$0xff] }
 0x2e0   :  { %v2305_v15 = vmul.f32 %v6416_v42, %v6925_v8  ;;  %v2307_v39 = vmul.f32 %v2243_v37, %v6926_v32  ;;  %v2185_v23 = vmul.f32 %v2121_v13, %v841_v24  ;;  %v843_v43 = vsel %vm779_vm14, 1.0, %v6776_v22  ;;  %2789 = vmatprep.mubr.bf16.mxu1 %v2344_v56 }
 0x2e1   :  { %v2310_v50 = vmul.f32 %v2246_v51, %v6927_v1  ;;  %v2187_v29 = vmul.f32 %v2123_v57, %v843_v43  ;;  %v652_v30 = vmul.f32 0.5, %v6928_v26  ;;  %v2252_v53 = vadd.f32 1.0, %v2188_v44 }
 0x2e2   :  { %v2301_v17 = vmul.f32 %v6930_v27, %v6929_v31  ;;  %v2303_v42 = vmul.f32 %v6932_v45, %v6931_v9  ;;  %v2181_v37 = vmul.f32 %v2117_v52, %v6933_v62  ;;  %v839_v2 = vsel %vm775_vm12, 1.0, %v6776_v22 }
 0x2e3   :  { %v2183_v36 = vmul.f32 %v2119_v46, %v839_v2  ;;  %v2312_v12 = vmul.f32 %v2248_v0, %v648_v6  ;;  %v2316_v48 = vmul.f32 %v2252_v53, %v652_v30  ;;  %v2346_v16 = vpack.c.bf16 %v2314_v61, %v2310_v50 }
 0x2e4   :  { %v2249_v20 = vadd.f32 1.0, %v2185_v23  ;;  %v2341_v19 = vpack.c.bf16 %v2305_v15, %v2301_v17  ;;  %v2251_v47 = vadd.f32 1.0, %v2187_v29  ;;  %v2343_v10 = vpack.c.bf16 %v2307_v39, %v2303_v42 }
 0x2e5   :  { %v2348_v40 = vpack.c.bf16 %v2316_v48, %v2312_v12  ;;  %v2245_v59 = vadd.f32 1.0, %v2181_v37  ;;  %v649_v35 = vmul.f32 0.5, %v6934_v55  ;;  %v2247_v38 = vadd.f32 1.0, %v2183_v36 }
 0x2e6   :  { %2693 = vmatmul.mubr.bf16.gmra.mxu0 %v2341_v19  ;;  %v651_v33 = vmul.f32 0.5, %v6935_v60  ;;  %v645_v22 = vmul.f32 0.5, %v6936_v54  ;;  %v647_v11 = vmul.f32 0.5, %v6937_v3 }
 0x2e7   :  { %2790 = vmatmul.mubr.bf16.gmra.mxu1 %v2343_v10  ;;  %2700 = vmatprep.mubr.bf16.mxu0 %v2346_v16  ;;  %v2313_v34 = vmul.f32 %v2249_v20, %v649_v35 }
 0x2e8   :  { %2797 = vmatprep.mubr.bf16.mxu1 %v2348_v40  ;;  %v2315_v25 = vmul.f32 %v2251_v47, %v651_v33  ;;  %v2309_v41 = vmul.f32 %v2245_v59, %v645_v22  ;;  %v2311_v51 = vmul.f32 %v2247_v38, %v647_v11 }
 0x2ea   :  { %v2345_v13 = vpack.c.bf16 %v2313_v34, %v2309_v41  ;;  %v2347_v63 = vpack.c.bf16 %v2315_v25, %v2311_v51 }
 0x2ee   :  { %2701 = vmatmul.mubr.bf16.gmra.mxu0 %v2345_v13 }
 0x2ef   :  { %2798 = vmatmul.mubr.bf16.gmra.mxu1 %v2347_v63 }
 0x365   :  { %v3566_v21 = vpop.f32.mrf.mxu0 }
 0x367   :  { %v3567_v5 = vpop.f32.mrf.mxu0 }
 0x368   :  { %v3568_v57 = vadd.f32 %v3567_v5, %v3566_v21 }
 0x369   :  { %v3569_v56 = vpop.f32.mrf.mxu0 }
 0x36a   :  { %v2647_v18 = vadd.f32 %v3568_v57, %v6488_v49 }
 0x36b   :  { %v3570_v28 = vpop.f32.mrf.mxu0 }
 0x36c   :  { %v3571_v14 = vadd.f32 %v3570_v28, %v3569_v56 }
 0x36e   :  { %v2650_v24 = vadd.f32 %v3571_v14, %v6488_v49 }
 0x370   :  { %v3630_v7 = vpop.f32.mrf.mxu1 }
 0x372   :  { %v3631_v52 = vpop.f32.mrf.mxu1 }
 0x373   :  { %v3632_v4 = vadd.f32 %v3631_v52, %v3630_v7 }
 0x374   :  { %v3633_v6 = vpop.f32.mrf.mxu1 }
 0x375   :  { %v6492_v58 = vadd.f32 %v3632_v4, %v2647_v18 }
 0x376   :  { %v3634_v46 = vpop.f32.mrf.mxu1 }
 0x377   :  { %v3635_v0 = vadd.f32 %v3634_v46, %v3633_v6  ;;  %2808 = vadd.xlane.f32.xlu0 %v6492_v58 }
 0x379   :  { %v6495_v61 = vadd.f32 %v3635_v0, %v2650_v24 }
 0x37b   :  { %2810 = vadd.xlane.f32.xlu0 %v6495_v61 }
 0x37d   :  { %v3572_v44 = vpop.f32.mrf.mxu0 }
 0x37f   :  { %v3636_v8 = vpop.f32.mrf.mxu1  ;;  %v3573_v15 = vpop.f32.mrf.mxu0 }
 0x380   :  { %v3574_v32 = vadd.f32 %v3573_v15, %v3572_v44 }
 0x381   :  { %v3637_v39 = vpop.f32.mrf.mxu1  ;;  %v3575_v23 = vpop.f32.mrf.mxu0 }
 0x382   :  { %v2655_v43 = vadd.f32 %v3574_v32, %v6488_v49  ;;  %v3638_v1 = vadd.f32 %v3637_v39, %v3636_v8 }
 0x383   :  { %v3639_v50 = vpop.f32.mrf.mxu1  ;;  %v3576_v29 = vpop.f32.mrf.mxu0 }
 0x384   :  { %v3577_v26 = vadd.f32 %v3576_v29, %v3575_v23  ;;  %v6499_v53 = vadd.f32 %v3638_v1, %v2655_v43 }
 0x385   :  { %v3640_v30 = vpop.f32.mrf.mxu1 }
 0x386   :  { %v3578_v31 = vpop.f32.mrf.mxu0  ;;  %v2658_v27 = vadd.f32 %v3577_v26, %v6488_v49  ;;  %v3641_v17 = vadd.f32 %v3640_v30, %v3639_v50  ;;  %2812 = vadd.xlane.f32.xlu1 %v6499_v53 }
 0x387   :  { %v3642_v9 = vpop.f32.mrf.mxu1 }
 0x388   :  { %v3579_v45 = vpop.f32.mrf.mxu0  ;;  %v6503_v37 = vadd.f32 %v3641_v17, %v2658_v27 }
 0x389   :  { %v3580_v42 = vadd.f32 %v3579_v45, %v3578_v31  ;;  %v3643_v62 = vpop.f32.mrf.mxu1 }
 0x38a   :  { %v3581_v2 = vpop.f32.mrf.mxu0  ;;  %v3644_v12 = vadd.f32 %v3643_v62, %v3642_v9  ;;  %2814 = vadd.xlane.f32.xlu1 %v6503_v37 }
 0x38b   :  { %v2663_v36 = vadd.f32 %v3580_v42, %v6488_v49  ;;  %v3645_v48 = vpop.f32.mrf.mxu1 }
 0x38c   :  { %v3582_v16 = vpop.f32.mrf.mxu0 }
 0x38d   :  { %v3583_v20 = vadd.f32 %v3582_v16, %v3581_v2  ;;  %v3646_v19 = vpop.f32.mrf.mxu1  ;;  %v6507_v47 = vadd.f32 %v3644_v12, %v2663_v36 }
 0x38e   :  { %v3584_v10 = vpop.f32.mrf.mxu0  ;;  %v3647_v59 = vadd.f32 %v3646_v19, %v3645_v48 }
 0x38f   :  { %v2666_v40 = vadd.f32 %v3583_v20, %v6488_v49  ;;  %v3648_v55 = vpop.f32.mrf.mxu1  ;;  %2816 = vadd.xlane.f32.xlu0 %v6507_v47 }
 0x390   :  { %v3585_v35 = vpop.f32.mrf.mxu0 }
 0x391   :  { %v3586_v38 = vadd.f32 %v3585_v35, %v3584_v10  ;;  %v3649_v60 = vpop.f32.mrf.mxu1  ;;  %v6511_v33 = vadd.f32 %v3647_v59, %v2666_v40 }
 0x392   :  { %v3587_v54 = vpop.f32.mrf.mxu0  ;;  %v3650_v34 = vadd.f32 %v3649_v60, %v3648_v55 }
 0x393   :  { %v2671_v22 = vadd.f32 %v3586_v38, %v6488_v49  ;;  %v3651_v3 = vpop.f32.mrf.mxu1  ;;  %2818 = vadd.xlane.f32.xlu1 %v6511_v33 }
 0x394   :  { %v3588_v11 = vpop.f32.mrf.mxu0 }
 0x395   :  { %v3589_v25 = vadd.f32 %v3588_v11, %v3587_v54  ;;  %v3652_v41 = vpop.f32.mrf.mxu1  ;;  %v6515_v51 = vadd.f32 %v3650_v34, %v2671_v22 }
 0x396   :  { %v3590_v13 = vpop.f32.mrf.mxu0  ;;  %v3653_v21 = vadd.f32 %v3652_v41, %v3651_v3 }
 0x397   :  { %v2674_v63 = vadd.f32 %v3589_v25, %v6488_v49  ;;  %v3654_v5 = vpop.f32.mrf.mxu1  ;;  %2820 = vadd.xlane.f32.xlu0 %v6515_v51 }
 0x398   :  { %v3591_v56 = vpop.f32.mrf.mxu0 }
 0x399   :  { %v3592_v57 = vadd.f32 %v3591_v56, %v3590_v13  ;;  %v3655_v28 = vpop.f32.mrf.mxu1  ;;  %v6519_v7 = vadd.f32 %v3653_v21, %v2674_v63 }
 0x39a   :  { %v3593_v18 = vpop.f32.mrf.mxu0  ;;  %v3656_v52 = vadd.f32 %v3655_v28, %v3654_v5 }
 0x39b   :  { %v2679_v14 = vadd.f32 %v3592_v57, %v6488_v49  ;;  %v3657_v4 = vpop.f32.mrf.mxu1  ;;  %2822 = vadd.xlane.f32.xlu1 %v6519_v7 }
 0x39c   :  { %v3594_v6 = vpop.f32.mrf.mxu0 }
 0x39d   :  { %v3595_v24 = vadd.f32 %v3594_v6, %v3593_v18  ;;  %v3658_v46 = vpop.f32.mrf.mxu1  ;;  %v6523_v0 = vadd.f32 %v3656_v52, %v2679_v14  ;;  %v3869_v6 = vld [vmem:[#allocation10 + $0x38] sm:$0xff]  }
 0x39e   :  { %v3596_v44 = vpop.f32.mrf.mxu0  ;;  %v3659_v15 = vadd.f32 %v3658_v46, %v3657_v4  ;;  %3710 = vmatprep.subr.bf16.mxu0 %v3869_v6 }
 0x39f   :  { %v2682_v8 = vadd.f32 %v3595_v24, %v6488_v49  ;;  %v3660_v32 = vpop.f32.mrf.mxu1  ;;  %2824 = vadd.xlane.f32.xlu0 %v6523_v0  ;;  %v3870_v24 = vld [vmem:[#allocation11 + $0x38] sm:$0xff]   ;;  %3711 = vmatpush3.bf16.msra.mxu0 %v3869_v6  ;;  %v3880_v6 = vld [vmem:[#allocation11 + $0x10] sm:$0xff]  }
 0x3a0   :  { %v3597_v39 = vpop.f32.mrf.mxu0  ;;  %3742 = vmatprep.subr.bf16.mxu1 %v3870_v24 }
 0x3a1   :  { %v3598_v23 = vadd.f32 %v3597_v39, %v3596_v44  ;;  %v3661_v43 = vpop.f32.mrf.mxu1  ;;  %v6527_v1 = vadd.f32 %v3659_v15, %v2682_v8  ;;  %3743 = vmatpush3.bf16.msra.mxu1 %v3870_v24 }
 0x3a2   :  { %v3599_v50 = vpop.f32.mrf.mxu0  ;;  %v3662_v26 = vadd.f32 %v3661_v43, %v3660_v32 }
 0x3a3   :  { %v2687_v29 = vadd.f32 %v3598_v23, %v6488_v49  ;;  %v3663_v30 = vpop.f32.mrf.mxu1  ;;  %2826 = vadd.xlane.f32.xlu1 %v6527_v1 }
 0x3a4   :  { %v3600_v31 = vpop.f32.mrf.mxu0 }
 0x3a5   :  { %v3601_v27 = vadd.f32 %v3600_v31, %v3599_v50  ;;  %v3664_v17 = vpop.f32.mrf.mxu1  ;;  %v6531_v9 = vadd.f32 %v3662_v26, %v2687_v29 }
 0x3a6   :  { %v3602_v45 = vpop.f32.mrf.mxu0  ;;  %v3665_v62 = vadd.f32 %v3664_v17, %v3663_v30 }
 0x3a7   :  { %v2690_v42 = vadd.f32 %v3601_v27, %v6488_v49  ;;  %v3666_v2 = vpop.f32.mrf.mxu1  ;;  %2828 = vadd.xlane.f32.xlu0 %v6531_v9  ;;  %v3872_v27 = vld [vmem:[#allocation11 + $0x30] sm:$0xff]  }
 0x3a8   :  { %v3603_v36 = vpop.f32.mrf.mxu0  ;;  %3744 = vmatprep.subr.bf16.mxu1 %v3872_v27 }
 0x3a9   :  { %v3604_v12 = vadd.f32 %v3603_v36, %v3602_v45  ;;  %v3667_v48 = vpop.f32.mrf.mxu1  ;;  %v6535_v16 = vadd.f32 %v3665_v62, %v2690_v42  ;;  %3745 = vmatpush3.bf16.msra.mxu1 %v3872_v27  ;;  %v3206_v27 = vld [vmem:[#allocation5 + $0x8] sm:$0xff] }
 0x3aa   :  { %v3605_v20 = vpop.f32.mrf.mxu0  ;;  %v3668_v10 = vadd.f32 %v3667_v48, %v3666_v2 }
 0x3ab   :  { %v2695_v19 = vadd.f32 %v3604_v12, %v6488_v49  ;;  %v3669_v40 = vpop.f32.mrf.mxu1  ;;  %2830 = vadd.xlane.f32.xlu1 %v6535_v16 }
 0x3ac   :  { %v3606_v59 = vpop.f32.mrf.mxu0 }
 0x3ad   :  { %v3607_v55 = vadd.f32 %v3606_v59, %v3605_v20  ;;  %v3670_v35 = vpop.f32.mrf.mxu1  ;;  %v6539_v38 = vadd.f32 %v3668_v10, %v2695_v19 }
 0x3ae   :  { %v3608_v60 = vpop.f32.mrf.mxu0  ;;  %v3671_v22 = vadd.f32 %v3670_v35, %v3669_v40 }
 0x3af   :  { %v2698_v54 = vadd.f32 %v3607_v55, %v6488_v49  ;;  %v3672_v34 = vpop.f32.mrf.mxu1  ;;  %2832 = vadd.xlane.f32.xlu0 %v6539_v38 }
 0x3b0   :  { %v3609_v3 = vpop.f32.mrf.mxu0 }
 0x3b1   :  { %v3610_v11 = vadd.f32 %v3609_v3, %v3608_v60  ;;  %v3673_v25 = vpop.f32.mrf.mxu1  ;;  %v6543_v41 = vadd.f32 %v3671_v22, %v2698_v54  ;;  %v3873_v60 = vld [vmem:[#allocation10 + $0x28] sm:$0xff]   ;;  %v3875_v3 = vld [vmem:[#allocation10 + $0x20] sm:$0xff]  }
 0x3b2   :  { %v3611_v13 = vpop.f32.mrf.mxu0  ;;  %v3674_v21 = vadd.f32 %v3673_v25, %v3672_v34  ;;  %v3876_v25 = vld [vmem:[#allocation11 + $0x20] sm:$0xff]  }
 0x3b3   :  { %v2703_v63 = vadd.f32 %v3610_v11, %v6488_v49  ;;  %v3675_v5 = vpop.f32.mrf.mxu1  ;;  %2834 = vadd.xlane.f32.xlu1 %v6543_v41 }
 0x3b4   :  { %v3612_v56 = vpop.f32.mrf.mxu0 }
 0x3b5   :  { %v3613_v57 = vadd.f32 %v3612_v56, %v3611_v13  ;;  %v3676_v28 = vpop.f32.mrf.mxu1  ;;  %v6547_v18 = vadd.f32 %v3674_v21, %v2703_v63  ;;  %v3877_v21 = vld [vmem:[#allocation10 + $0x18] sm:$0xff]  }
 0x3b6   :  { %v3677_v52 = vadd.f32 %v3676_v28, %v3675_v5  ;;  %v3878_v56 = vld [vmem:[#allocation11 + $0x18] sm:$0xff]  }
 0x3b7   :  { %v2706_v14 = vadd.f32 %v3613_v57, %v6488_v49  ;;  %2836 = vadd.xlane.f32.xlu0 %v6547_v18 }
 0x3b9   :  { %v6551_v4 = vadd.f32 %v3677_v52, %v2706_v14  ;;  %v3879_v14 = vld [vmem:[#allocation10 + $0x10] sm:$0xff]  }
 0x3bb   :  { %2838 = vadd.xlane.f32.xlu1 %v6551_v4 }
 0x400   :  { %v2809_v46 = vpop.xlane.xlu0 %2808 }
 0x401   :  { %v2841_v44 = vmul.f32 0.0078125, %v2809_v46 }
 0x403   :  { %v6555_v8 = vsub.f32 %v6492_v58, %v2841_v44  ;;  %v3881_v44 = vld [vmem:[#allocation10 + $0x8] sm:$0xff]  }
 0x404   :  { %v2811_v15 = vpop.xlane.xlu0 %2810 }
 0x405   :  { %v2842_v49 = vmul.f32 0.0078125, %v2811_v15  ;;  %v2873_v32 = vmul.f32 %v6555_v8, %v6555_v8 }
 0x407   :  { %v6560_v39 = vsub.f32 %v6495_v61, %v2842_v49  ;;  %2889 = vadd.xlane.f32.xlu0 %v2873_v32  ;;  %v3871_v61 = vld [vmem:[#allocation10 + $0x30] sm:$0xff]   ;;  %v3882_v49 = vld [vmem:[#allocation11 + $0x8] sm:$0xff]  }
 0x408   :  { %3712 = vmatprep.subr.bf16.mxu0 %v3871_v61 }
 0x409   :  { %v2874_v23 = vmul.f32 %v6560_v39, %v6560_v39  ;;  %3713 = vmatpush3.bf16.msra.mxu0 %v3871_v61  ;;  %v3205_v61 = vld [vmem:[#allocation5] sm:$0xff] }
 0x40a   :  { %3714 = vmatprep.subr.bf16.mxu0 %v3873_v60 }
 0x40b   :  { %2891 = vadd.xlane.f32.xlu1 %v2874_v23 }
 0x40d   :  { %3715 = vmatpush3.bf16.msra.mxu0 %v3873_v60  ;;  %v3214_v60 = vld [vmem:[#allocation5 + $0x48] sm:$0xff] }
 0x40e   :  { %3716 = vmatprep.subr.bf16.mxu0 %v3875_v3 }
 0x40f   :  { %v2813_v43 = vpop.xlane.xlu1 %2812 }
 0x410   :  { %v2843_v50 = vmul.f32 0.0078125, %v2813_v43  ;;  %v3883_v43 = vld [vmem:[#allocation10] sm:$0xff]  }
 0x411   :  { %3717 = vmatpush3.bf16.msra.mxu0 %v3875_v3  ;;  %v3218_v3 = vld [vmem:[#allocation5 + $0x68] sm:$0xff] }
 0x412   :  { %v6565_v29 = vsub.f32 %v6499_v53, %v2843_v50  ;;  %3718 = vmatprep.subr.bf16.mxu0 %v3877_v21 }
 0x413   :  { %v2815_v58 = vpop.xlane.xlu1 %2814 }
 0x414   :  { %v2844_v26 = vmul.f32 0.0078125, %v2815_v58  ;;  %v2875_v30 = vmul.f32 %v6565_v29, %v6565_v29  ;;  %v3884_v58 = vld [vmem:[#allocation11] sm:$0xff]  }
 0x415   :  { %3719 = vmatpush3.bf16.msra.mxu0 %v3877_v21 }
 0x416   :  { %v6570_v31 = vsub.f32 %v6503_v37, %v2844_v26  ;;  %2893 = vadd.xlane.f32.xlu0 %v2875_v30  ;;  %3720 = vmatprep.subr.bf16.mxu0 %v3879_v14 }
 0x418   :  { %v2817_v17 = vpop.xlane.xlu0 %2816  ;;  %v2876_v42 = vmul.f32 %v6570_v31, %v6570_v31 }
 0x419   :  { %v2845_v45 = vmul.f32 0.0078125, %v2817_v17  ;;  %3721 = vmatpush3.bf16.msra.mxu0 %v3879_v14  ;;  %v3221_v17 = vpack.c.bf16 %v3206_v27, %v3205_v61 }
 0x41a   :  { %2895 = vadd.xlane.f32.xlu1 %v2876_v42  ;;  %3722 = vmatprep.subr.bf16.mxu0 %v3881_v44  ;;  %v3208_v42 = vld [vmem:[#allocation5 + $0x18] sm:$0xff] }
 0x41b   :  { %v6575_v53 = vsub.f32 %v6507_v47, %v2845_v45  ;;  %v3207_v45 = vld [vmem:[#allocation5 + $0x10] sm:$0xff]  ;;  %3758 = vmatprep.mubr.bf16.mxu1 %v3221_v17 }
 0x41c   :  { %v2819_v62 = vpop.xlane.xlu1 %2818 }
 0x41d   :  { %v2846_v2 = vmul.f32 0.0078125, %v2819_v62  ;;  %v2877_v37 = vmul.f32 %v6575_v53, %v6575_v53  ;;  %3723 = vmatpush3.bf16.msra.mxu0 %v3881_v44  ;;  %v6638_v44 = vld [vmem:[%s6746_s6] ss:$0 sm:$0xff] }
 0x41e   :  { %3724 = vmatprep.subr.bf16.mxu0 %v3883_v43 }
 0x41f   :  { %v6580_v36 = vsub.f32 %v6511_v33, %v2846_v2  ;;  %2897 = vadd.xlane.f32.xlu0 %v2877_v37 }
 0x420   :  { %v2821_v12 = vpop.xlane.xlu0 %2820 }
 0x421   :  { %v2847_v48 = vmul.f32 0.0078125, %v2821_v12  ;;  %v2878_v20 = vmul.f32 %v6580_v36, %v6580_v36  ;;  %3725 = vmatpush3.bf16.msra.mxu0 %v3883_v43 }
 0x423   :  { %v6585_v19 = vsub.f32 %v6515_v51, %v2847_v48  ;;  %2899 = vadd.xlane.f32.xlu1 %v2878_v20  ;;  %v3874_v51 = vld [vmem:[#allocation11 + $0x28] sm:$0xff]  }
 0x424   :  { %v2823_v47 = vpop.xlane.xlu1 %2822  ;;  %3746 = vmatprep.subr.bf16.mxu1 %v3874_v51 }
 0x425   :  { %v2848_v10 = vmul.f32 0.0078125, %v2823_v47  ;;  %v2879_v40 = vmul.f32 %v6585_v19, %v6585_v19  ;;  %3747 = vmatpush3.bf16.msra.mxu1 %v3874_v51  ;;  %v3209_v47 = vld [vmem:[#allocation5 + $0x20] sm:$0xff]  ;;  %v3215_v51 = vld [vmem:[#allocation5 + $0x50] sm:$0xff] }
 0x426   :  { %3748 = vmatprep.subr.bf16.mxu1 %v3876_v25 }
 0x427   :  { %v6590_v59 = vsub.f32 %v6519_v7, %v2848_v10  ;;  %2901 = vadd.xlane.f32.xlu0 %v2879_v40  ;;  %v3211_v40 = vld [vmem:[#allocation5 + $0x30] sm:$0xff] }
 0x428   :  { %v2825_v33 = vpop.xlane.xlu0 %2824 }
 0x429   :  { %v2849_v55 = vmul.f32 0.0078125, %v2825_v33  ;;  %v2880_v35 = vmul.f32 %v6590_v59, %v6590_v59  ;;  %3749 = vmatpush3.bf16.msra.mxu1 %v3876_v25  ;;  %v3212_v33 = vld [vmem:[#allocation5 + $0x38] sm:$0xff]  ;;  %v3219_v25 = vld [vmem:[#allocation5 + $0x70] sm:$0xff] }
 0x42a   :  { %3750 = vmatprep.subr.bf16.mxu1 %v3878_v56 }
 0x42b   :  { %v6595_v54 = vsub.f32 %v6523_v0, %v2849_v55  ;;  %2903 = vadd.xlane.f32.xlu1 %v2880_v35  ;;  %v3224_v55 = vpack.c.bf16 %v3212_v33, %v3211_v40  ;;  %v3213_v35 = vld [vmem:[#allocation5 + $0x40] sm:$0xff] }
 0x42c   :  { %v2827_v22 = vpop.xlane.xlu1 %2826 }
 0x42d   :  { %v2850_v34 = vmul.f32 0.0078125, %v2827_v22  ;;  %v2881_v7 = vmul.f32 %v6595_v54, %v6595_v54  ;;  %3751 = vmatpush3.bf16.msra.mxu1 %v3878_v56  ;;  %v3225_v22 = vpack.c.bf16 %v3214_v60, %v3213_v35 }
 0x42e   :  { %3752 = vmatprep.subr.bf16.mxu1 %v3880_v6 }
 0x42f   :  { %v6600_v11 = vsub.f32 %v6527_v1, %v2850_v34  ;;  %2905 = vadd.xlane.f32.xlu0 %v2881_v7  ;;  %v3216_v34 = vld [vmem:[#allocation5 + $0x58] sm:$0xff]  ;;  %v3217_v7 = vld [vmem:[#allocation5 + $0x60] sm:$0xff] }
 0x430   :  { %v2829_v0 = vpop.xlane.xlu0 %2828 }
 0x431   :  { %v2851_v13 = vmul.f32 0.0078125, %v2829_v0  ;;  %v2882_v63 = vmul.f32 %v6600_v11, %v6600_v11  ;;  %3753 = vmatpush3.bf16.msra.mxu1 %v3880_v6  ;;  %v3227_v0 = vpack.c.bf16 %v3218_v3, %v3217_v7 }
 0x432   :  { %3754 = vmatprep.subr.bf16.mxu1 %v3882_v49 }
 0x433   :  { %v6605_v5 = vsub.f32 %v6531_v9, %v2851_v13  ;;  %2907 = vadd.xlane.f32.xlu1 %v2882_v63  ;;  %v3220_v13 = vld [vmem:[#allocation5 + $0x78] sm:$0xff] }
 0x434   :  { %v2831_v1 = vpop.xlane.xlu1 %2830  ;;  %v3228_v63 = vpack.c.bf16 %v3220_v13, %v3219_v25 }
 0x435   :  { %v2852_v57 = vmul.f32 0.0078125, %v2831_v1  ;;  %v2883_v28 = vmul.f32 %v6605_v5, %v6605_v5  ;;  %3755 = vmatpush3.bf16.msra.mxu1 %v3882_v49 }
 0x436   :  { %3756 = vmatprep.subr.bf16.mxu1 %v3884_v58 }
 0x437   :  { %v6610_v52 = vsub.f32 %v6535_v16, %v2852_v57  ;;  %2909 = vadd.xlane.f32.xlu0 %v2883_v28 }
 0x438   :  { %v2833_v9 = vpop.xlane.xlu0 %2832 }
 0x439   :  { %v2853_v24 = vmul.f32 0.0078125, %v2833_v9  ;;  %v2884_v46 = vmul.f32 %v6610_v52, %v6610_v52  ;;  %3757 = vmatpush3.bf16.msra.mxu1 %v3884_v58 }
 0x43b   :  { %v6615_v15 = vsub.f32 %v6539_v38, %v2853_v24  ;;  %2911 = vadd.xlane.f32.xlu1 %v2884_v46 }
 0x43c   :  { %v2835_v16 = vpop.xlane.xlu1 %2834 }
 0x43d   :  { %v2854_v32 = vmul.f32 0.0078125, %v2835_v16  ;;  %v2885_v23 = vmul.f32 %v6615_v15, %v6615_v15 }
 0x43f   :  { %v6620_v50 = vsub.f32 %v6543_v41, %v2854_v32  ;;  %2913 = vadd.xlane.f32.xlu0 %v2885_v23  ;;  %v3222_v41 = vpack.c.bf16 %v3208_v42, %v3207_v45 }
 0x440   :  { %v2837_v38 = vpop.xlane.xlu0 %2836 }
 0x441   :  { %v2855_v26 = vmul.f32 0.0078125, %v2837_v38  ;;  %v2886_v30 = vmul.f32 %v6620_v50, %v6620_v50  ;;  %3759 = vmatmul.mubr.bf16.vlgmr.msra.gmra.mxu1 %v3222_v41  ;;  %v6645_v38 = vld [vmem:[%s6747_s7] ss:$0 sm:$0xff] }
 0x443   :  { %v6625_v62 = vsub.f32 %v6547_v18, %v2855_v26  ;;  %2915 = vadd.xlane.f32.xlu1 %v2886_v30  ;;  %v3210_v18 = vld [vmem:[#allocation5 + $0x28] sm:$0xff] }
 0x444   :  { %v2839_v2 = vpop.xlane.xlu1 %2838  ;;  %v3223_v10 = vpack.c.bf16 %v3210_v18, %v3209_v47 }
 0x445   :  { %v2856_v37 = vmul.f32 0.0078125, %v2839_v2  ;;  %v2887_v12 = vmul.f32 %v6625_v62, %v6625_v62 }
 0x446   :  { %3762 = vmatprep.mubr.bf16.mxu1 %v3223_v10 }
 0x447   :  { %v6630_v48 = vsub.f32 %v6551_v4, %v2856_v37  ;;  %2917 = vadd.xlane.f32.xlu0 %v2887_v12  ;;  %v3226_v4 = vpack.c.bf16 %v3216_v34, %v3215_v51 }
 0x449   :  { %v2888_v20 = vmul.f32 %v6630_v48, %v6630_v48  ;;  %3763 = vmatmul.mubr.bf16.gmra.mxu1 %v3224_v55 }
 0x44a   :  { %3766 = vmatprep.mubr.bf16.mxu1 %v3225_v22 }
 0x44b   :  { %2919 = vadd.xlane.f32.xlu1 %v2888_v20 }
 0x451   :  { %3767 = vmatmul.mubr.bf16.gmra.mxu1 %v3226_v4 }
 0x452   :  { %3770 = vmatprep.mubr.bf16.mxu1 %v3227_v0 }
 0x459   :  { %3771 = vmatmul.mubr.bf16.gmra.mxu1 %v3228_v63 }
 0x490   :  { %v2890_v21 = vpop.xlane.xlu0 %2889 }
 0x491   :  { %v2921_v56 = vmul.f32 0.0078125, %v2890_v21 }
 0x493   :  { %v2937_v1 = vadd.f32 1e-05, %v2921_v56 }
 0x494   :  { %v2892_v57 = vpop.xlane.xlu1 %2891 }
 0x495   :  { %4141 = vrsqrt.f32 %v2937_v1  ;;  %v2922_v28 = vmul.f32 0.0078125, %v2892_v57 }
 0x497   :  { %v2938_v14 = vadd.f32 1e-05, %v2922_v28 }
 0x499   :  { %4143 = vrsqrt.f32 %v2938_v14 }
 0x49f   :  { %v2894_v9 = vpop.xlane.xlu0 %2893 }
 0x4a0   :  { %v2923_v24 = vmul.f32 0.0078125, %v2894_v9 }
 0x4a2   :  { %v4142_v6 = vpop.eup %4141  ;;  %v2939_v49 = vadd.f32 1e-05, %v2923_v24 }
 0x4a3   :  { %v2969_v46 = vmul.f32 %v4142_v6, %v6555_v8  ;;  %v2896_v32 = vpop.xlane.xlu1 %2895 }
 0x4a4   :  { %4145 = vrsqrt.f32 %v2939_v49  ;;  %v2924_v23 = vmul.f32 0.0078125, %v2896_v32 }
 0x4a5   :  { %v2991_v58 = vmul.f32 %v6638_v44, %v2969_v46 }
 0x4a6   :  { %v4144_v16 = vpop.eup %4143  ;;  %v2940_v8 = vadd.f32 1e-05, %v2924_v23 }
 0x4a7   :  { %v2970_v43 = vmul.f32 %v4144_v16, %v6560_v39  ;;  %v3013_v27 = vadd.f32 %v6645_v38, %v2991_v58 }
 0x4a8   :  { %v2898_v30 = vpop.xlane.xlu0 %2897  ;;  %4147 = vrsqrt.f32 %v2940_v8 }
 0x4a9   :  { %v2992_v26 = vmul.f32 %v6638_v44, %v2970_v43  ;;  %v2925_v61 = vmul.f32 0.0078125, %v2898_v30 }
 0x4ab   :  { %v3014_v17 = vadd.f32 %v6645_v38, %v2992_v26  ;;  %v2941_v45 = vadd.f32 1e-05, %v2925_v61 }
 0x4ac   :  { %v2900_v39 = vpop.xlane.xlu1 %2899 }
 0x4ad   :  { %v3029_v42 = vpack.c.bf16 %v3014_v17, %v3013_v27  ;;  %4149 = vrsqrt.f32 %v2941_v45  ;;  %v2926_v41 = vmul.f32 0.0078125, %v2900_v39 }
 0x4af   :  { %3726 = vmatprep.mubr.bf16.mxu0 %v3029_v42  ;;  %v2942_v2 = vadd.f32 1e-05, %v2926_v41 }
 0x4b0   :  { %v2902_v37 = vpop.xlane.xlu0 %2901 }
 0x4b1   :  { %4151 = vrsqrt.f32 %v2942_v2  ;;  %v2927_v12 = vmul.f32 0.0078125, %v2902_v37  ;;  %v4146_v20 = vpop.eup %4145 }
 0x4b2   :  { %v2971_v47 = vmul.f32 %v4146_v20, %v6565_v29 }
 0x4b3   :  { %v2943_v18 = vadd.f32 1e-05, %v2927_v12 }
 0x4b4   :  { %v2904_v10 = vpop.xlane.xlu1 %2903  ;;  %v2993_v60 = vmul.f32 %v6638_v44, %v2971_v47 }
 0x4b5   :  { %4153 = vrsqrt.f32 %v2943_v18  ;;  %v2928_v40 = vmul.f32 0.0078125, %v2904_v10  ;;  %v4148_v33 = vpop.eup %4147 }
 0x4b6   :  { %v2972_v55 = vmul.f32 %v4148_v33, %v6570_v31  ;;  %v3015_v3 = vadd.f32 %v6645_v38, %v2993_v60 }
 0x4b7   :  { %v2944_v35 = vadd.f32 1e-05, %v2928_v40 }
 0x4b8   :  { %v2906_v51 = vpop.xlane.xlu0 %2905  ;;  %v2994_v34 = vmul.f32 %v6638_v44, %v2972_v55 }
 0x4b9   :  { %4155 = vrsqrt.f32 %v2944_v35  ;;  %v2929_v22 = vmul.f32 0.0078125, %v2906_v51 }
 0x4ba   :  { %v4150_v4 = vpop.eup %4149  ;;  %v3016_v29 = vadd.f32 %v6645_v38, %v2994_v34 }
 0x4bb   :  { %v2945_v7 = vadd.f32 1e-05, %v2929_v22  ;;  %v2973_v25 = vmul.f32 %v4150_v4, %v6575_v53 }
 0x4bc   :  { %v2908_v0 = vpop.xlane.xlu1 %2907  ;;  %v3030_v31 = vpack.c.bf16 %v3016_v29, %v3015_v3 }
 0x4bd   :  { %4157 = vrsqrt.f32 %v2945_v7  ;;  %v2930_v13 = vmul.f32 0.0078125, %v2908_v0  ;;  %v2995_v1 = vmul.f32 %v6638_v44, %v2973_v25 }
 0x4be   :  { %v4152_v63 = vpop.eup %4151  ;;  %3727 = vmatmul.mubr.bf16.vlgmr.msra.gmra.mxu0 %v3030_v31 }
 0x4bf   :  { %v2946_v21 = vadd.f32 1e-05, %v2930_v13  ;;  %v2974_v56 = vmul.f32 %v4152_v63, %v6580_v36  ;;  %v3017_v53 = vadd.f32 %v6645_v38, %v2995_v1 }
 0x4c0   :  { %v2910_v57 = vpop.xlane.xlu0 %2909 }
 0x4c1   :  { %4159 = vrsqrt.f32 %v2946_v21  ;;  %v2931_v28 = vmul.f32 0.0078125, %v2910_v57  ;;  %v2996_v14 = vmul.f32 %v6638_v44, %v2974_v56 }
 0x4c2   :  { %v4154_v6 = vpop.eup %4153 }
 0x4c3   :  { %v2947_v9 = vadd.f32 1e-05, %v2931_v28  ;;  %v3018_v24 = vadd.f32 %v6645_v38, %v2996_v14  ;;  %v2975_v46 = vmul.f32 %v4154_v6, %v6585_v19 }
 0x4c4   :  { %v2912_v49 = vpop.xlane.xlu1 %2911 }
 0x4c5   :  { %4161 = vrsqrt.f32 %v2947_v9  ;;  %v2932_v16 = vmul.f32 0.0078125, %v2912_v49  ;;  %v3031_v32 = vpack.c.bf16 %v3018_v24, %v3017_v53  ;;  %v2997_v58 = vmul.f32 %v6638_v44, %v2975_v46 }
 0x4c6   :  { %v4156_v36 = vpop.eup %4155 }
 0x4c7   :  { %v2948_v23 = vadd.f32 1e-05, %v2932_v16  ;;  %3730 = vmatprep.mubr.bf16.mxu0 %v3031_v32  ;;  %v2976_v43 = vmul.f32 %v4156_v36, %v6590_v59  ;;  %v3019_v19 = vadd.f32 %v6645_v38, %v2997_v58 }
 0x4c8   :  { %v2914_v8 = vpop.xlane.xlu0 %2913 }
 0x4c9   :  { %4163 = vrsqrt.f32 %v2948_v23  ;;  %v2933_v26 = vmul.f32 0.0078125, %v2914_v8  ;;  %v2998_v30 = vmul.f32 %v6638_v44, %v2976_v43 }
 0x4ca   :  { %v4158_v61 = vpop.eup %4157 }
 0x4cb   :  { %v2949_v27 = vadd.f32 1e-05, %v2933_v26  ;;  %v3020_v17 = vadd.f32 %v6645_v38, %v2998_v30  ;;  %v2977_v45 = vmul.f32 %v4158_v61, %v6595_v54 }
 0x4cc   :  { %v2916_v42 = vpop.xlane.xlu1 %2915 }
 0x4cd   :  { %4165 = vrsqrt.f32 %v2949_v27  ;;  %v2934_v39 = vmul.f32 0.0078125, %v2916_v42  ;;  %v3032_v41 = vpack.c.bf16 %v3020_v17, %v3019_v19  ;;  %v2999_v12 = vmul.f32 %v6638_v44, %v2977_v45 }
 0x4ce   :  { %v4160_v59 = vpop.eup %4159 }
 0x4cf   :  { %v2950_v2 = vadd.f32 1e-05, %v2934_v39  ;;  %3731 = vmatmul.mubr.bf16.gmra.mxu0 %v3032_v41  ;;  %v2978_v37 = vmul.f32 %v4160_v59, %v6600_v11  ;;  %v3021_v54 = vadd.f32 %v6645_v38, %v2999_v12 }
 0x4d0   :  { %v2918_v20 = vpop.xlane.xlu0 %2917 }
 0x4d1   :  { %4167 = vrsqrt.f32 %v2950_v2  ;;  %v2935_v47 = vmul.f32 0.0078125, %v2918_v20  ;;  %v3000_v18 = vmul.f32 %v6638_v44, %v2978_v37 }
 0x4d2   :  { %v4162_v10 = vpop.eup %4161 }
 0x4d3   :  { %v2951_v40 = vadd.f32 1e-05, %v2935_v47  ;;  %v3022_v33 = vadd.f32 %v6645_v38, %v3000_v18  ;;  %v2979_v55 = vmul.f32 %v4162_v10, %v6605_v5 }
 0x4d4   :  { %v2920_v35 = vpop.xlane.xlu1 %2919 }
 0x4d5   :  { %4169 = vrsqrt.f32 %v2951_v40  ;;  %v2936_v60 = vmul.f32 0.0078125, %v2920_v35  ;;  %v3033_v51 = vpack.c.bf16 %v3022_v33, %v3021_v54  ;;  %v3001_v4 = vmul.f32 %v6638_v44, %v2979_v55 }
 0x4d6   :  { %v4164_v11 = vpop.eup %4163 }
 0x4d7   :  { %v2952_v22 = vadd.f32 1e-05, %v2936_v60  ;;  %3734 = vmatprep.mubr.bf16.mxu0 %v3033_v51  ;;  %v2980_v34 = vmul.f32 %v4164_v11, %v6610_v52  ;;  %v3023_v29 = vadd.f32 %v6645_v38, %v3001_v4 }
 0x4d9   :  { %4171 = vrsqrt.f32 %v2952_v22  ;;  %v3002_v7 = vmul.f32 %v6638_v44, %v2980_v34 }
 0x4da   :  { %v4166_v3 = vpop.eup %4165 }
 0x4db   :  { %v3024_v25 = vadd.f32 %v6645_v38, %v3002_v7  ;;  %v2981_v5 = vmul.f32 %v4166_v3, %v6615_v15 }
 0x4dd   :  { %v3034_v0 = vpack.c.bf16 %v3024_v25, %v3023_v29  ;;  %v3003_v63 = vmul.f32 %v6638_v44, %v2981_v5 }
 0x4de   :  { %v4168_v13 = vpop.eup %4167 }
 0x4df   :  { %3735 = vmatmul.mubr.bf16.gmra.mxu0 %v3034_v0  ;;  %v2982_v31 = vmul.f32 %v4168_v13, %v6620_v50  ;;  %v3025_v56 = vadd.f32 %v6645_v38, %v3003_v63 }
 0x4e1   :  { %v3004_v52 = vmul.f32 %v6638_v44, %v2982_v31 }
 0x4e2   :  { %v4170_v21 = vpop.eup %4169 }
 0x4e3   :  { %v3026_v1 = vadd.f32 %v6645_v38, %v3004_v52  ;;  %v2983_v57 = vmul.f32 %v4170_v21, %v6625_v62  ;;  %v6695_v62 = vld [vmem:[%s6749_s9] ss:$0 sm:$0xff]  ;;  %s4337_s9 = smov [#allocation13]  }
 0x4e5   :  { %v3035_v28 = vpack.c.bf16 %v3026_v1, %v3025_v56  ;;  %v3005_v6 = vmul.f32 %v6638_v44, %v2983_v57 }
 0x4e6   :  { %v4172_v14 = vpop.eup %4171 }
 0x4e7   :  { %3738 = vmatprep.mubr.bf16.mxu0 %v3035_v28  ;;  %v2984_v15 = vmul.f32 %v4172_v14, %v6630_v48  ;;  %v3027_v9 = vadd.f32 %v6645_v38, %v3005_v6 }
 0x4e9   :  { %v3006_v50 = vmul.f32 %v6638_v44, %v2984_v15  ;;  %v6701_v44 = vld [vmem:[%s6751_s11] ss:$0 sm:$0xff]  ;;  %s3450_s11 = sshll.u32 %s4337_s9, 4  ;;  %s3451_s11 = int_to_ptr.vmem [resolvable:$true] %s3450_s11 }
 0x4ea   :  { %s4293_s23 = scalar_lea.vmem %s3451_s11, 2048  ;;  %p4298_p3 = scmp.lt.s32.totalorder %s3451_s11, %s3451_s11 }
 0x4eb   :  { %v3028_v53 = vadd.f32 %v6645_v38, %v3006_v50  ;;  %p4294_p2 = scmp.ne.s32.totalorder %s3451_s11, %s4293_s23  ;;  %p4299_p4 = scmp.lt.s32.totalorder %s4293_s23, %s4293_s23 }
 0x4ed   :  { %v3036_v24 = vpack.c.bf16 %v3028_v53, %v3027_v9  ;;  %p4300_p5 = por %p4299_p4, %p4298_p3 }
 0x4ef   :  { %3739 = vmatmul.mubr.bf16.gmra.mxu0 %v3036_v24  ;;  %p4301_p6 = pnand %p4300_p5, %p4294_p2 }
 0x501   :  { %v3760_v46 = vpop.f32.mrf.mxu1 }
 0x503   :  { %v3327_v49 = vpop.f32.mrf.mxu1 }
 0x505   :  { %v3761_v36 = vpop.f32.mrf.mxu1 }
 0x507   :  { %v3330_v61 = vpop.f32.mrf.mxu1 }
 0x509   :  { %v3764_v39 = vpop.f32.mrf.mxu1 }
 0x50b   :  { %v3343_v59 = vpop.f32.mrf.mxu1 }
 0x50d   :  { %v3765_v20 = vpop.f32.mrf.mxu1 }
 0x50f   :  { %v3346_v35 = vpop.f32.mrf.mxu1 }
 0x511   :  { %v3768_v4 = vpop.f32.mrf.mxu1 }
 0x513   :  { %v3359_v3 = vpop.f32.mrf.mxu1 }
 0x515   :  { %v3769_v0 = vpop.f32.mrf.mxu1 }
 0x517   :  { %v3362_v57 = vpop.f32.mrf.mxu1 }
 0x519   :  { %v3772_v53 = vpop.f32.mrf.mxu1 }
 0x51b   :  { %v3375_v24 = vpop.f32.mrf.mxu1 }
 0x57e   :  { %v3728_v16 = vpop.f32.mrf.mxu0 }
 0x57f   :  { %v3151_v48 = vadd.f32 %v3728_v16, %v6695_v62 }
 0x580   :  { %v3142_v32 = vpop.f32.mrf.mxu0 }
 0x581   :  { %v3143_v38 = vadd.f32 %v6695_v62, %v3142_v32  ;;  %v3392_v23 = vadd.f32 %v3760_v46, %v3151_v48 }
 0x582   :  { %v3729_v43 = vpop.f32.mrf.mxu0 }
 0x583   :  { %v3415_v58 = vadd.f32 %v6701_v44, %v3392_v23  ;;  %v3154_v8 = vadd.f32 %v3729_v43, %v6695_v62  ;;  %v3390_v26 = vadd.f32 %v3327_v49, %v3143_v38 }
 0x584   :  { %v3145_v30 = vpop.f32.mrf.mxu0 }
 0x585   :  { %3431 = vst [vmem:[#allocation13 + $0x10] sm:$0xff] %v3415_v58  ;;  %v3413_v27 = vadd.f32 %v6701_v44, %v3390_v26  ;;  %v3146_v19 = vadd.f32 %v6695_v62, %v3145_v30  ;;  %v3393_v17 = vadd.f32 %v3761_v36, %v3154_v8  ;;  %v3773_v36 = vpop.f32.mrf.mxu1 }
 0x587   :  { %3429 = vst [vmem:[#allocation13] sm:$0xff] %v3413_v27  ;;  %v3416_v45 = vadd.f32 %v6701_v44, %v3393_v17  ;;  %v3391_v42 = vadd.f32 %v3330_v61, %v3146_v19  ;;  %v3378_v27 = vpop.f32.mrf.mxu1 }
 0x589   :  { %3432 = vst [vmem:[#allocation13 + $0x18] sm:$0xff] %v3416_v45  ;;  %v3414_v41 = vadd.f32 %v6701_v44, %v3391_v42 }
 0x58b   :  { %3430 = vst [vmem:[#allocation13 + $0x8] sm:$0xff] %v3414_v41 }
 0x58f   :  { %v3732_v2 = vpop.f32.mrf.mxu0 }
 0x590   :  { %v3167_v37 = vadd.f32 %v3732_v2, %v6695_v62 }
 0x591   :  { %v3158_v12 = vpop.f32.mrf.mxu0 }
 0x592   :  { %v3159_v47 = vadd.f32 %v6695_v62, %v3158_v12  ;;  %v3396_v18 = vadd.f32 %v3764_v39, %v3167_v37 }
 0x593   :  { %v3733_v10 = vpop.f32.mrf.mxu0 }
 0x594   :  { %v3419_v40 = vadd.f32 %v6701_v44, %v3396_v18  ;;  %v3170_v54 = vadd.f32 %v3733_v10, %v6695_v62  ;;  %v3394_v33 = vadd.f32 %v3343_v59, %v3159_v47 }
 0x595   :  { %v3161_v55 = vpop.f32.mrf.mxu0 }
 0x596   :  { %3435 = vst [vmem:[#allocation13 + $0x30] sm:$0xff] %v3419_v40  ;;  %v3417_v60 = vadd.f32 %v6701_v44, %v3394_v33  ;;  %v3162_v51 = vadd.f32 %v6695_v62, %v3161_v55  ;;  %v3397_v11 = vadd.f32 %v3765_v20, %v3170_v54 }
 0x598   :  { %3433 = vst [vmem:[#allocation13 + $0x20] sm:$0xff] %v3417_v60  ;;  %v3420_v22 = vadd.f32 %v6701_v44, %v3397_v11  ;;  %v3395_v34 = vadd.f32 %v3346_v35, %v3162_v51 }
 0x59a   :  { %3436 = vst [vmem:[#allocation13 + $0x38] sm:$0xff] %v3420_v22  ;;  %v3418_v7 = vadd.f32 %v6701_v44, %v3395_v34 }
 0x59c   :  { %3434 = vst [vmem:[#allocation13 + $0x28] sm:$0xff] %v3418_v7 }
 0x59f   :  { %v3736_v29 = vpop.f32.mrf.mxu0 }
 0x5a0   :  { %v3183_v25 = vadd.f32 %v3736_v29, %v6695_v62 }
 0x5a1   :  { %v3174_v5 = vpop.f32.mrf.mxu0 }
 0x5a2   :  { %v3175_v13 = vadd.f32 %v6695_v62, %v3174_v5  ;;  %v3400_v31 = vadd.f32 %v3768_v4, %v3183_v25 }
 0x5a3   :  { %v3737_v63 = vpop.f32.mrf.mxu0 }
 0x5a4   :  { %v3423_v52 = vadd.f32 %v6701_v44, %v3400_v31  ;;  %v3186_v21 = vadd.f32 %v3737_v63, %v6695_v62  ;;  %v3398_v56 = vadd.f32 %v3359_v3, %v3175_v13 }
 0x5a5   :  { %v3177_v1 = vpop.f32.mrf.mxu0 }
 0x5a6   :  { %3439 = vst [vmem:[#allocation13 + $0x50] sm:$0xff] %v3423_v52  ;;  %v3421_v28 = vadd.f32 %v6701_v44, %v3398_v56  ;;  %v3178_v14 = vadd.f32 %v6695_v62, %v3177_v1  ;;  %v3401_v15 = vadd.f32 %v3769_v0, %v3186_v21 }
 0x5a8   :  { %3437 = vst [vmem:[#allocation13 + $0x40] sm:$0xff] %v3421_v28  ;;  %v3424_v6 = vadd.f32 %v6701_v44, %v3401_v15  ;;  %v3399_v50 = vadd.f32 %v3362_v57, %v3178_v14 }
 0x5aa   :  { %3440 = vst [vmem:[#allocation13 + $0x58] sm:$0xff] %v3424_v6  ;;  %v3422_v9 = vadd.f32 %v6701_v44, %v3399_v50 }
 0x5ac   :  { %3438 = vst [vmem:[#allocation13 + $0x48] sm:$0xff] %v3422_v9 }
 0x5af   :  { %v3740_v46 = vpop.f32.mrf.mxu0 }
 0x5b0   :  { %v3199_v49 = vadd.f32 %v3740_v46, %v6695_v62 }
 0x5b1   :  { %v3190_v16 = vpop.f32.mrf.mxu0 }
 0x5b2   :  { %v3404_v48 = vadd.f32 %v3772_v53, %v3199_v49  ;;  %v3191_v32 = vadd.f32 %v6695_v62, %v3190_v16 }
 0x5b3   :  { %v3741_v38 = vpop.f32.mrf.mxu0 }
 0x5b4   :  { %v3427_v23 = vadd.f32 %v6701_v44, %v3404_v48  ;;  %v3402_v43 = vadd.f32 %v3375_v24, %v3191_v32  ;;  %v3202_v58 = vadd.f32 %v3741_v38, %v6695_v62 }
 0x5b5   :  { %v3193_v8 = vpop.f32.mrf.mxu0 }
 0x5b6   :  { %3443 = vst [vmem:[#allocation13 + $0x70] sm:$0xff] %v3427_v23  ;;  %v3425_v26 = vadd.f32 %v6701_v44, %v3402_v43  ;;  %v3405_v30 = vadd.f32 %v3773_v36, %v3202_v58  ;;  %v3194_v61 = vadd.f32 %v6695_v62, %v3193_v8 }
 0x5b8   :  { %3441 = vst [vmem:[#allocation13 + $0x60] sm:$0xff] %v3425_v26  ;;  %v3428_v19 = vadd.f32 %v6701_v44, %v3405_v30  ;;  %v3403_v17 = vadd.f32 %v3378_v27, %v3194_v61 }
 0x5ba   :  { %3444 = vst [vmem:[#allocation13 + $0x78] sm:$0xff] %v3428_v19  ;;  %v3426_v45 = vadd.f32 %v6701_v44, %v3403_v17 }
 0x5bc   :  { %3442 = vst [vmem:[#allocation13 + $0x68] sm:$0xff] %v3426_v45 }
 0x5bd   :  { %4304 = shalt.err (!%p4301_p6)
}
 0x5be   :  { %3456 = dma.vmem_to_hbm [thread:$0]  %s3451_s11, 2048, %s6752_s12, [#allocation4], %s4325_s26, %s4325_s26, %s4326_s27  }
 0x5bf   :  { %4321 = dma.done.wait [#allocation4], 2048  }
 0x5c0   :  { %4322 = vsyncadd [#allocation4], 4294965248 }
 0x5c1   :  { %3460 = vsyncpa [#allocation3], 1 }
 0x5c2   :  { %3461 = vsyncpa [#allocation6], 1 }
 0x5c3   :  { %3462 = vsyncpa [#allocation9], 1 }
 0x5c4   :  { %3463 = vsyncpa [#allocation12], 1 }
 0x5c5   :  { %3464 = vsyncpa [#allocation4], 1 }

</bundles_post_ra>
